<compile_context>
chip_gen: v7x
topology: tpu7x:2x2x1
jax: 0.10.0
libtpu: 0.0.40
codegen_flags: <defaults>
</compile_context>

<pallas_src>
import jax
import jax.numpy as jnp
from jax import lax
from jax.experimental import pallas as pl
from jax.experimental.pallas import tpu as pltpu

# ----------------------------- model sizes -----------------------------
B, S, T = 8, 8, 8                 # batch, src len, tgt len
E, H = 16, 32                     # embed_size, hidden_size
V_SRC, V_TGT = 40, 48             # len(vocab.src), len(vocab.tgt)
N_NODES, N_RULES = 24, 56         # len(nodes), len(rules)
DROPOUT = 0.1                     # TODO(synk): dropout applied as identity (eval mode)
HEAD_W = 64                       # per-head padded lane width (rules | tokens)

_BF = jnp.bfloat16
_F32 = jnp.float32

assert B & (B - 1) == 0           # block-diag attention mask uses `lane & (B-1)`
assert 4 * H == 2 * HEAD_W        # packed weight buffer lane width is 4H == 128
assert N_RULES <= HEAD_W and V_TGT <= HEAD_W

# static row offsets into the packed bf16 weight buffer (lane width 4H = 128)
_OFF_IH    = 0                    # (2E,4H)  encoder input proj [fwd ; bwd]
_OFF_Y     = _OFF_IH + 2 * E      # (2E,4H)  decoder input proj (y part, bias folded)
_OFF_OH    = _OFF_Y + 2 * E       # (2H,4H)  decoder [o_prev ; h] recurrent proj
_OFF_HEADS = _OFF_OH + 2 * H      # (H,128)  [rule head | token head], zero-padded
_OFF_HPROJ = _OFF_HEADS + H       # (2H,H)   h_projection   (lanes 0:H)
_OFF_CPROJ = _OFF_HPROJ + 2 * H   # (2H,H)   c_projection
_OFF_ATT   = _OFF_CPROJ + 2 * H   # (2H,H)   att_projection
_OFF_COMB  = _OFF_ATT + 2 * H     # (3H,H)   combined_out_projection
_WPACK_ROWS = _OFF_COMB + 3 * H   # = 448 rows (all offsets multiples of 8)


def _sigmoid(x):
    # exact logistic via tanh (EUP), avoids a full-precision divide
    return 0.5 * jnp.tanh(0.5 * x) + 0.5


# ----------------------------- fused Pallas kernel -----------------------------

def seq2ast_kernel(x_ref, y_ref, gold_ref, wpack_ref, whh_ref, bpack_ref,
                   scores_ref, enc_scr):
    """Fused Seq2AST forward (encoder + decoder + masked log-likelihood).

    x_ref    : (S*2B, 2E) bf16  time-major, fwd/bwd-stacked, zero-padded src embeds
    y_ref    : (T*B, 2E)  bf16  time-major decoder input embeds
    gold_ref : (T*B, 2)   i32   lane0 = gold rule id, lane1 = gold token id
    wpack_ref: (_WPACK_ROWS, 4H) bf16 packed matmul weights
    whh_ref  : (H, 8H)    bf16  [W_hh_fwd | W_hh_bwd]
    bpack_ref: (2B+1, 4H) f32   rows 0:2B encoder gate bias (fwd,bwd), row 2B dec bias
    scores_ref: (B, 1)    f32
    enc_scr  : (S*B, 2H)  f32   [h_fwd | h_bwd] encoder outputs, row = s*B + b

    TODO(synk): pack_padded_sequence / source-length masking omitted (all
    sequences assumed full length); dropout is identity (eval mode).
    """
    # -------- packed weights (static, sublane-aligned slices) --------
    w_ih     = wpack_ref[_OFF_IH:_OFF_IH + 2 * E, :]
    w_y      = wpack_ref[_OFF_Y:_OFF_Y + 2 * E, :]
    w_oh_o   = wpack_ref[_OFF_OH:_OFF_OH + H, :]
    w_oh_h   = wpack_ref[_OFF_OH + H:_OFF_OH + 2 * H, :]
    w_heads  = wpack_ref[_OFF_HEADS:_OFF_HEADS + H, :]
    w_hproj  = wpack_ref[_OFF_HPROJ:_OFF_HPROJ + 2 * H, 0:H]
    w_cproj  = wpack_ref[_OFF_CPROJ:_OFF_CPROJ + 2 * H, 0:H]
    w_att    = wpack_ref[_OFF_ATT:_OFF_ATT + 2 * H, 0:H]
    w_comb_h = wpack_ref[_OFF_COMB:_OFF_COMB + H, 0:H]
    w_comb_c = wpack_ref[_OFF_COMB + H:_OFF_COMB + 3 * H, 0:H]
    whh   = whh_ref[...]                                     # (H, 8H)
    b_enc = bpack_ref[0:2 * B, :]                            # (2B, 4H)
    b_dec = bpack_ref[2 * B:2 * B + 1, :]                    # (1, 4H)

    # -------- hoisted, time-invariant input projections (one matmul each) --------
    xpre = jnp.dot(x_ref[...], w_ih, preferred_element_type=_F32)         # (S*2B, 4H)
    ypre = jnp.dot(y_ref[...], w_y, preferred_element_type=_F32) + b_dec  # (T*B, 4H)

    # -------- hoisted lane masks (shared by encoder & decoder cells) --------
    lane4h = lax.broadcasted_iota(jnp.int32, (1, 4 * H), 1)
    is_g = jnp.logical_and(lane4h >= 2 * H, lane4h < 3 * H)               # g-gate lanes
    gate_scale = jnp.where(is_g, 1.0, 0.5).astype(_F32)                   # 0.5 on i/f/o

    def fused_gates(pre):
        # ONE full-vreg tanh: sigmoid(x)=0.5*tanh(0.5x)+0.5 on i/f/o lanes, tanh on g.
        t = jnp.tanh(pre * gate_scale)
        gt = jnp.where(is_g, t, 0.5 * t + 0.5)
        return gt[:, 0:H], gt[:, H:2 * H], gt[:, 2 * H:3 * H], gt[:, 3 * H:4 * H]

    row_is_fwd = lax.broadcasted_iota(jnp.int32, (2 * B, 4 * H), 0) < B

    # -------- encoder: merged fwd/bwd BiLSTM recurrence, fully unrolled --------
    h_st = jnp.zeros((2 * B, H), _F32)
    c_st = jnp.zeros((2 * B, H), _F32)
    for t in range(S):
        rec = jnp.dot(h_st.astype(_BF), whh, preferred_element_type=_F32)  # (2B, 8H)
        rec = jnp.where(row_is_fwd, rec[:, 0:4 * H], rec[:, 4 * H:8 * H])
        pre = xpre[t * 2 * B:(t + 1) * 2 * B] + b_enc + rec                # (2B, 4H)
        i, f, g, o = fused_gates(pre)
        c_st = f * c_st + i * g
        h_st = o * jnp.tanh(c_st)
        enc_scr[t * B:(t + 1) * B, 0:H] = h_st[0:B]                        # fwd h @ pos t
        enc_scr[(S - 1 - t) * B:(S - t) * B, H:2 * H] = h_st[B:2 * B]      # bwd h @ pos S-1-t

    # -------- decoder init: single K=2H dots on [h_f|h_b] / [c_f|c_b] --------
    hcat = jnp.concatenate([h_st[0:B], h_st[B:2 * B]], axis=1).astype(_BF)  # (B, 2H)
    ccat = jnp.concatenate([c_st[0:B], c_st[B:2 * B]], axis=1).astype(_BF)
    h_t = jnp.dot(hcat, w_hproj, preferred_element_type=_F32)
    c_t = jnp.dot(ccat, w_cproj, preferred_element_type=_F32)

    # -------- attention pre-compute (loop-invariant) --------
    enc_cat = enc_scr[...].astype(_BF)                                      # (S*B, 2H)
    proj = jnp.dot(enc_cat, w_att, preferred_element_type=_F32).astype(_BF)  # (S*B, H)
    # block-diagonal mask: row b may only attend lanes n with n % B == b (B power of 2)
    attn_mask = (jnp.bitwise_and(
        lax.broadcasted_iota(jnp.int32, (B, S * B), 1), B - 1)
        == lax.broadcasted_iota(jnp.int32, (B, S * B), 0))
    # TODO(synk): source mask not applied — the PyTorch code calls the non-in-place
    # masked_fill, so the mask has no effect in the original forward.

    # -------- head / log-likelihood constants (hoisted) --------
    lane_hd = lax.broadcasted_iota(jnp.int32, (1, 2 * HEAD_W), 1)
    head_pad = jnp.logical_or(
        jnp.logical_and(lane_hd >= N_RULES, lane_hd < HEAD_W),
        lane_hd >= HEAD_W + V_TGT)
    cls_iota = lax.broadcasted_iota(jnp.int32, (B, HEAD_W), 1)
    gold = gold_ref[...]                                                    # (T*B, 2)
    ridx_all = gold[:, 0:1]
    tidx_all = gold[:, 1:2]

    def masked_ll(lg, idx):                       # lg (B, HEAD_W) f32, idx (B, 1) i32
        mx = jnp.max(lg, axis=-1, keepdims=True)
        lse = mx + jnp.log(jnp.sum(jnp.exp(lg - mx), axis=-1, keepdims=True))
        sel = jnp.sum(jnp.where(cls_iota == idx, lg, 0.0), axis=-1, keepdims=True)
        return (sel - lse) * (idx != 0).astype(_F32)                        # (B, 1)

    # -------- decoder: attentional LSTMCell + fused heads, fully unrolled --------
    o_prev = jnp.zeros((B, H), _F32)
    score = jnp.zeros((B, 1), _F32)
    for t in range(T):
        pre = (ypre[t * B:(t + 1) * B]
               + jnp.dot(o_prev.astype(_BF), w_oh_o, preferred_element_type=_F32)
               + jnp.dot(h_t.astype(_BF), w_oh_h, preferred_element_type=_F32))
        i, f, g, o = fused_gates(pre)
        c_t = f * c_t + i * g
        h_t = o * jnp.tanh(c_t)
        h_bf = h_t.astype(_BF)

        # e[b, s*B+b'] = <h_t[b], proj[s*B+b']>; only b' == b is kept (block mask)
        e = lax.dot_general(h_bf, proj, (((1,), (1,)), ((), ())),
                            preferred_element_type=_F32)                   # (B, S*B)
        e = jnp.where(attn_mask, e, -1e30)
        mx = jnp.max(e, axis=-1, keepdims=True)
        p = jnp.exp(e - mx)
        a = (p * pl.reciprocal(jnp.sum(p, axis=-1, keepdims=True),
                               approx=True)).astype(_BF)                   # (B, S*B)
        ctx = jnp.dot(a, enc_cat, preferred_element_type=_F32)             # (B, 2H)

        # o_t = tanh(combined_out_projection([h_t ; ctx]))   (dropout = identity)
        o_t = jnp.tanh(
            jnp.dot(h_bf, w_comb_h, preferred_element_type=_F32)
            + jnp.dot(ctx.astype(_BF), w_comb_c, preferred_element_type=_F32))

        # fused output heads + log_softmax + gold gather + pad mask (per step,
        # off the recurrent chain so it interleaves with step t+1)
        logits = jnp.dot(o_t.astype(_BF), w_heads, preferred_element_type=_F32)  # (B,128)
        logits = jnp.where(head_pad, -1e30, logits)
        ridx = ridx_all[t * B:(t + 1) * B]
        tidx = tidx_all[t * B:(t + 1) * B]
        score = (score + masked_ll(logits[:, 0:HEAD_W], ridx)
                 + masked_ll(logits[:, HEAD_W:2 * HEAD_W], tidx))
        o_prev = o_t

    scores_ref[...] = score


# ----------------------------- host-side packing (once) -----------------------------

def pack_params(p):
    """One-time host-side packing of all weights into 3 kernel operands."""
    w_ih_blk = jnp.concatenate([p['w_ih_f'], p['w_ih_b']], axis=0)            # (2E,4H)
    w_y = p['w_ih_dec'][0:2 * E]                                              # (2E,4H)
    w_oh = jnp.concatenate([p['w_ih_dec'][2 * E:], p['w_hh_dec']], axis=0)    # (2H,4H)
    w_heads = jnp.concatenate(
        [p['w_rule'], jnp.zeros((H, HEAD_W - N_RULES), _F32),
         p['w_tok'], jnp.zeros((H, HEAD_W - V_TGT), _F32)], axis=1)           # (H,128)

    def pad4h(w):
        return jnp.pad(w, ((0, 0), (0, 4 * H - w.shape[1])))

    wpack = jnp.concatenate(
        [w_ih_blk, w_y, w_oh, w_heads,
         pad4h(p['w_hproj']), pad4h(p['w_cproj']),
         pad4h(p['w_att']), pad4h(p['w_comb'])], axis=0).astype(_BF)
    assert wpack.shape == (_WPACK_ROWS, 4 * H)

    w_hh_fb = jnp.concatenate([p['w_hh_f'], p['w_hh_b']], axis=1).astype(_BF)  # (H,8H)

    bpack = jnp.concatenate(
        [jnp.broadcast_to(p['b_f'], (B, 4 * H)),
         jnp.broadcast_to(p['b_b'], (B, 4 * H)),
         p['b_dec']], axis=0).astype(_F32)                                     # (2B+1,4H)

    return {'emb_src': p['emb_src'], 'emb_node': p['emb_node'],
            'emb_rule': p['emb_rule'], 'emb_tok': p['emb_tok'],
            'wpack': wpack, 'w_hh_fb': w_hh_fb, 'bpack': bpack}


# ----------------------------- wrapper -----------------------------

def seq2ast_forward(pp, src_idx, node_idx, rule_gold, tok_in, tok_gold):
    """Mirrors Seq2AST.forward; returns scores of shape (B,)."""
    # ---- embeddings + data packing (input-dependent XLA glue only) ----
    src_embed = pp['emb_src'][src_idx]                                  # (B, S, E)
    xf = jnp.transpose(src_embed, (1, 0, 2))                            # (S, B, E)
    xb = xf[::-1]                                                       # time-reversed
    zf = jnp.zeros_like(xf)
    # stacked + zero-padded so ONE matmul against [[W_ih_f],[W_ih_b]] projects both dirs
    xst = jnp.concatenate([jnp.concatenate([xf, zf], axis=-1),
                           jnp.concatenate([zf, xb], axis=-1)], axis=1)  # (S, 2B, 2E)
    xst_flat = xst.reshape(S * 2 * B, 2 * E).astype(_BF)

    # tgt_in_actions = cat(zeros(B,1), gold_rules[:, :-1])
    shifted_rules = jnp.concatenate(
        [jnp.zeros((B, 1), jnp.int32), rule_gold[:, :-1]], axis=1)
    y = jnp.concatenate(
        [pp['emb_node'][node_idx],
         pp['emb_rule'][shifted_rules] + pp['emb_tok'][tok_in]], axis=-1)   # (B, T, 2E)
    y_flat = jnp.transpose(y, (1, 0, 2)).reshape(T * B, 2 * E).astype(_BF)

    gold = jnp.stack([rule_gold.T.reshape(T * B),
                      tok_gold.T.reshape(T * B)], axis=1).astype(jnp.int32)  # (T*B, 2)

    scores = pl.pallas_call(
        seq2ast_kernel,
        out_shape=jax.ShapeDtypeStruct((B, 1), jnp.float32),
        in_specs=[pl.BlockSpec(memory_space=pltpu.MemorySpace.VMEM)] * 6,
        out_specs=pl.BlockSpec(memory_space=pltpu.MemorySpace.VMEM),
        scratch_shapes=[pltpu.VMEM((S * B, 2 * H), jnp.float32)],
    )(xst_flat, y_flat, gold, pp['wpack'], pp['w_hh_fb'], pp['bpack'])
    return scores[:, 0]


# ----------------------------- pure-JAX reference -----------------------------

def ref_forward(p, src_idx, node_idx, rule_gold, tok_in, tok_gold):
    def cell(x, h, c, wih, whh, b):
        pre = x @ wih + h @ whh + b
        i = _sigmoid(pre[:, :H]); f = _sigmoid(pre[:, H:2 * H])
        g = jnp.tanh(pre[:, 2 * H:3 * H]); o = _sigmoid(pre[:, 3 * H:])
        c = f * c + i * g
        return o * jnp.tanh(c), c

    src_embed = p['emb_src'][src_idx]
    hf = cf = hb = cb = jnp.zeros((B, H))
    enc_f = [None] * S
    enc_b = [None] * S
    for t in range(S):
        hf, cf = cell(src_embed[:, t], hf, cf, p['w_ih_f'], p['w_hh_f'], p['b_f'])
        enc_f[t] = hf
        tb = S - 1 - t
        hb, cb = cell(src_embed[:, tb], hb, cb, p['w_ih_b'], p['w_hh_b'], p['b_b'])
        enc_b[tb] = hb
    src_enc = jnp.stack([jnp.concatenate([enc_f[t], enc_b[t]], -1) for t in range(S)], 1)
    h_t = jnp.concatenate([hf, hb], -1) @ p['w_hproj']
    c_t = jnp.concatenate([cf, cb], -1) @ p['w_cproj']
    proj = src_enc @ p['w_att']

    shifted_rules = jnp.concatenate([jnp.zeros((B, 1), jnp.int32), rule_gold[:, :-1]], 1)
    y = jnp.concatenate([p['emb_node'][node_idx],
                         p['emb_rule'][shifted_rules] + p['emb_tok'][tok_in]], -1)
    o_prev = jnp.zeros((B, H))
    outs = []
    for t in range(T):
        i_t = jnp.concatenate([y[:, t], o_prev], -1)
        h_t, c_t = cell(i_t, h_t, c_t, p['w_ih_dec'], p['w_hh_dec'], p['b_dec'])
        e = jnp.einsum('bsh,bh->bs', proj, h_t)
        a = jax.nn.softmax(e, axis=-1)
        ctx = jnp.einsum('bs,bsd->bd', a, src_enc)
        o_t = jnp.tanh(jnp.concatenate([h_t, ctx], -1) @ p['w_comb'])
        outs.append(o_t)
        o_prev = o_t
    dec = jnp.stack(outs, 1)                                        # (B, T, H)

    rule_lp = jax.nn.log_softmax(dec @ p['w_rule'], axis=-1)
    tok_lp = jax.nn.log_softmax(dec @ p['w_tok'], axis=-1)
    rule_sel = jnp.take_along_axis(rule_lp, rule_gold[..., None], axis=-1)[..., 0]
    tok_sel = jnp.take_along_axis(tok_lp, tok_gold[..., None], axis=-1)[..., 0]
    loss_r = rule_sel * (rule_gold != 0)
    loss_t = tok_sel * (tok_gold != 0)
    return (loss_r + loss_t).sum(-1)


# ----------------------------- params -----------------------------

def init_params(key):
    ks = jax.random.split(key, 19)
    w = lambda k, shape, s=0.1: jax.random.normal(k, shape, jnp.float32) * s
    p = {
        'emb_src':  w(ks[0], (V_SRC, E)),
        'emb_node': w(ks[1], (N_NODES, E)),
        'emb_rule': w(ks[2], (N_RULES, E)),
        'emb_tok':  w(ks[3], (V_TGT, E)),
        # encoder BiLSTM (PyTorch (4H,in) weights stored pre-transposed as (in,4H);
        # b = b_ih + b_hh kept as a single (1,4H) vector)
        'w_ih_f': w(ks[4], (E, 4 * H)), 'w_hh_f': w(ks[5], (H, 4 * H)), 'b_f': w(ks[6], (1, 4 * H)),
        'w_ih_b': w(ks[7], (E, 4 * H)), 'w_hh_b': w(ks[8], (H, 4 * H)), 'b_b': w(ks[9], (1, 4 * H)),
        # projections (nn.Linear weights pre-transposed to (in,out))
        'w_hproj': w(ks[10], (2 * H, H)),
        'w_cproj': w(ks[11], (2 * H, H)),
        'w_att':   w(ks[12], (2 * H, H)),
        # decoder LSTMCell
        'w_ih_dec': w(ks[13], (2 * E + H, 4 * H)),
        'w_hh_dec': w(ks[14], (H, 4 * H)),
        'b_dec':    w(ks[15], (1, 4 * H)),
        'w_comb':   w(ks[16], (3 * H, H)),
        # output heads
        'w_rule': w(ks[17], (H, N_RULES)),
        'w_tok':  w(ks[18], (H, V_TGT)),
    }
    return p


if __name__ == "__main__":
    key = jax.random.PRNGKey(0)
    pkey, k1, k2, k3, k4, k5 = jax.random.split(key, 6)
    params = init_params(pkey)
    packed = pack_params(params)          # weights are static: packed ONCE, outside jit

    src_idx   = jax.random.randint(k1, (B, S), 1, V_SRC)     # no pads in src
    node_idx  = jax.random.randint(k2, (B, T), 0, N_NODES)
    rule_gold = jax.random.randint(k3, (B, T), 0, N_RULES)   # 0 == <pad> gets masked
    tok_in    = jax.random.randint(k4, (B, T), 0, V_TGT)
    tok_gold  = jax.random.randint(k5, (B, T), 0, V_TGT)

    scores = jax.jit(seq2ast_forward)(packed, src_idx, node_idx, rule_gold,
                                      tok_in, tok_gold)
    scores = jax.block_until_ready(scores)

    ref = ref_forward(params, src_idx, node_idx, rule_gold, tok_in, tok_gold)
    assert scores.shape == (B,)
    assert jnp.allclose(scores, ref, rtol=2e-2, atol=2e-2), (scores, ref)
    print("KERNEL_OK")
</pallas_src>

<mosaic_0001>
module attributes {stable_mosaic.version = 11 : i64} {
  func.func @seq2ast_kernel(%arg0: memref<128x32xbf16, #tpu.memory_space<vmem>>, %arg1: memref<64x32xbf16, #tpu.memory_space<vmem>>, %arg2: memref<64x2xi32, #tpu.memory_space<vmem>>, %arg3: memref<448x128xbf16, #tpu.memory_space<vmem>>, %arg4: memref<32x256xbf16, #tpu.memory_space<vmem>>, %arg5: memref<17x128xf32, #tpu.memory_space<vmem>>, %arg6: memref<8x1xf32, #tpu.memory_space<vmem>>, %arg7: memref<64x64xf32, #tpu.memory_space<vmem>>) attributes {dimension_semantics = [], scalar_prefetch = 0 : i64, scratch_operands = 1 : i64, tpu.core_type = #tpu.core_type<tc>} {
    %c0 = arith.constant 0 : index
    %c0_0 = arith.constant 0 : index
    %0 = vector.load %arg3[%c0, %c0_0] : memref<448x128xbf16, #tpu.memory_space<vmem>>, vector<32x128xbf16>
    %c32 = arith.constant 32 : index
    %c0_1 = arith.constant 0 : index
    %1 = vector.load %arg3[%c32, %c0_1] : memref<448x128xbf16, #tpu.memory_space<vmem>>, vector<32x128xbf16>
    %c64 = arith.constant 64 : index
    %c0_2 = arith.constant 0 : index
    %2 = vector.load %arg3[%c64, %c0_2] : memref<448x128xbf16, #tpu.memory_space<vmem>>, vector<32x128xbf16>
    %c96 = arith.constant 96 : index
    %c0_3 = arith.constant 0 : index
    %3 = vector.load %arg3[%c96, %c0_3] : memref<448x128xbf16, #tpu.memory_space<vmem>>, vector<32x128xbf16>
    %c128 = arith.constant 128 : index
    %c0_4 = arith.constant 0 : index
    %4 = vector.load %arg3[%c128, %c0_4] : memref<448x128xbf16, #tpu.memory_space<vmem>>, vector<32x128xbf16>
    %c160 = arith.constant 160 : index
    %c0_5 = arith.constant 0 : index
    %5 = vector.load %arg3[%c160, %c0_5] : memref<448x128xbf16, #tpu.memory_space<vmem>>, vector<64x32xbf16>
    %c224 = arith.constant 224 : index
    %c0_6 = arith.constant 0 : index
    %6 = vector.load %arg3[%c224, %c0_6] : memref<448x128xbf16, #tpu.memory_space<vmem>>, vector<64x32xbf16>
    %c288 = arith.constant 288 : index
    %c0_7 = arith.constant 0 : index
    %7 = vector.load %arg3[%c288, %c0_7] : memref<448x128xbf16, #tpu.memory_space<vmem>>, vector<64x32xbf16>
    %c352 = arith.constant 352 : index
    %c0_8 = arith.constant 0 : index
    %8 = vector.load %arg3[%c352, %c0_8] : memref<448x128xbf16, #tpu.memory_space<vmem>>, vector<32x32xbf16>
    %c384 = arith.constant 384 : index
    %c0_9 = arith.constant 0 : index
    %9 = vector.load %arg3[%c384, %c0_9] : memref<448x128xbf16, #tpu.memory_space<vmem>>, vector<64x32xbf16>
    %c0_10 = arith.constant 0 : index
    %c0_11 = arith.constant 0 : index
    %10 = vector.load %arg4[%c0_10, %c0_11] : memref<32x256xbf16, #tpu.memory_space<vmem>>, vector<32x256xbf16>
    %c0_12 = arith.constant 0 : index
    %c0_13 = arith.constant 0 : index
    %11 = vector.load %arg5[%c0_12, %c0_13] : memref<17x128xf32, #tpu.memory_space<vmem>>, vector<16x128xf32>
    %c16 = arith.constant 16 : index
    %c0_14 = arith.constant 0 : index
    %12 = vector.load %arg5[%c16, %c0_14] : memref<17x128xf32, #tpu.memory_space<vmem>>, vector<1x128xf32>
    %c0_15 = arith.constant 0 : index
    %c0_16 = arith.constant 0 : index
    %13 = vector.load %arg0[%c0_15, %c0_16] : memref<128x32xbf16, #tpu.memory_space<vmem>>, vector<128x32xbf16>
    %cst = arith.constant dense<0.000000e+00> : vector<128x128xf32>
    %14 = tpu.matmul %13, %0, %cst {dimension_numbers = #tpu.dot_dimension_numbers<[1], [0], [0], [1], [0, 0, 1, 1], [], []>} : vector<128x32xbf16>, vector<32x128xbf16>, vector<128x128xf32> -> vector<128x128xf32>
    %c0_17 = arith.constant 0 : index
    %c0_18 = arith.constant 0 : index
    %15 = vector.load %arg1[%c0_17, %c0_18] : memref<64x32xbf16, #tpu.memory_space<vmem>>, vector<64x32xbf16>
    %cst_19 = arith.constant dense<0.000000e+00> : vector<64x128xf32>
    %16 = tpu.matmul %15, %1, %cst_19 {dimension_numbers = #tpu.dot_dimension_numbers<[1], [0], [0], [1], [0, 0, 1, 1], [], []>} : vector<64x32xbf16>, vector<32x128xbf16>, vector<64x128xf32> -> vector<64x128xf32>
    %17 = vector.broadcast %12 : vector<1x128xf32> to vector<64x128xf32>
    %18 = arith.addf %16, %17 : vector<64x128xf32>
    %19 = tpu.iota {dimensions = array<i32: 1>} : vector<1x128xi32>
    %c64_i32 = arith.constant 64 : i32
    %20 = vector.broadcast %c64_i32 : i32 to vector<1x128xi32>
    %21 = arith.cmpi sge, %19, %20 : vector<1x128xi32>
    %c96_i32 = arith.constant 96 : i32
    %22 = vector.broadcast %c96_i32 : i32 to vector<1x128xi32>
    %23 = arith.cmpi slt, %19, %22 : vector<1x128xi32>
    %24 = arith.andi %21, %23 : vector<1x128xi1>
    %cst_20 = arith.constant 1.000000e+00 : f32
    %cst_21 = arith.constant 5.000000e-01 : f32
    %25 = vector.broadcast %cst_20 : f32 to vector<1x128xf32>
    %26 = vector.broadcast %cst_21 : f32 to vector<1x128xf32>
    %27 = arith.select %24, %25, %26 : vector<1x128xi1>, vector<1x128xf32>
    %28 = tpu.iota {dimensions = array<i32: 0>} : vector<16x128xi32>
    %c8_i32 = arith.constant 8 : i32
    %29 = vector.broadcast %c8_i32 : i32 to vector<16x128xi32>
    %30 = arith.cmpi slt, %28, %29 : vector<16x128xi32>
    %cst_22 = arith.constant 0.000000e+00 : f32
    %31 = vector.broadcast %cst_22 : f32 to vector<16x32xf32>
    %cst_23 = arith.constant 0.000000e+00 : f32
    %32 = vector.broadcast %cst_23 : f32 to vector<16x32xf32>
    %33 = arith.truncf %31 : vector<16x32xf32> to vector<16x32xbf16>
    %cst_24 = arith.constant dense<0.000000e+00> : vector<16x256xf32>
    %34 = tpu.matmul %33, %10, %cst_24 {dimension_numbers = #tpu.dot_dimension_numbers<[1], [0], [0], [1], [0, 0, 1, 1], [], []>} : vector<16x32xbf16>, vector<32x256xbf16>, vector<16x256xf32> -> vector<16x256xf32>
    %35 = vector.extract_strided_slice %34 {offsets = [0, 0], sizes = [16, 128], strides = [1, 1]} : vector<16x256xf32> to vector<16x128xf32>
    %36 = vector.extract_strided_slice %34 {offsets = [0, 128], sizes = [16, 128], strides = [1, 1]} : vector<16x256xf32> to vector<16x128xf32>
    %37 = arith.select %30, %35, %36 : vector<16x128xi1>, vector<16x128xf32>
    %38 = vector.extract_strided_slice %14 {offsets = [0, 0], sizes = [16, 128], strides = [1, 1]} : vector<128x128xf32> to vector<16x128xf32>
    %39 = arith.addf %38, %11 : vector<16x128xf32>
    %40 = arith.addf %39, %37 : vector<16x128xf32>
    %41 = vector.broadcast %27 : vector<1x128xf32> to vector<16x128xf32>
    %42 = arith.mulf %40, %41 : vector<16x128xf32>
    %43 = math.tanh %42 : vector<16x128xf32>
    %cst_25 = arith.constant 5.000000e-01 : f32
    %44 = vector.broadcast %cst_25 : f32 to vector<16x128xf32>
    %45 = arith.mulf %44, %43 : vector<16x128xf32>
    %cst_26 = arith.constant 5.000000e-01 : f32
    %46 = vector.broadcast %cst_26 : f32 to vector<16x128xf32>
    %47 = arith.addf %45, %46 : vector<16x128xf32>
    %48 = vector.shape_cast %24 : vector<1x128xi1> to vector<1x128xi1>
    %49 = vector.broadcast %48 : vector<1x128xi1> to vector<16x128xi1>
    %50 = arith.select %49, %43, %47 : vector<16x128xi1>, vector<16x128xf32>
    %51 = vector.extract_strided_slice %50 {offsets = [0, 0], sizes = [16, 32], strides = [1, 1]} : vector<16x128xf32> to vector<16x32xf32>
    %52 = vector.extract_strided_slice %50 {offsets = [0, 32], sizes = [16, 32], strides = [1, 1]} : vector<16x128xf32> to vector<16x32xf32>
    %53 = vector.extract_strided_slice %50 {offsets = [0, 64], sizes = [16, 32], strides = [1, 1]} : vector<16x128xf32> to vector<16x32xf32>
    %54 = vector.extract_strided_slice %50 {offsets = [0, 96], sizes = [16, 32], strides = [1, 1]} : vector<16x128xf32> to vector<16x32xf32>
    %55 = arith.mulf %52, %32 : vector<16x32xf32>
    %56 = arith.mulf %51, %53 : vector<16x32xf32>
    %57 = arith.addf %55, %56 : vector<16x32xf32>
    %58 = math.tanh %57 : vector<16x32xf32>
    %59 = arith.mulf %54, %58 : vector<16x32xf32>
    %60 = vector.extract_strided_slice %59 {offsets = [0, 0], sizes = [8, 32], strides = [1, 1]} : vector<16x32xf32> to vector<8x32xf32>
    %c0_27 = arith.constant 0 : index
    %c0_28 = arith.constant 0 : index
    %61 = vector.load %arg7[%c0_27, %c0_28] : memref<64x64xf32, #tpu.memory_space<vmem>>, vector<8x32xf32>
    tpu.vector_store %arg7[%c0_27, %c0_28], %60 {strides = array<i32>} : memref<64x64xf32, #tpu.memory_space<vmem>>, vector<8x32xf32>,
    %62 = vector.extract_strided_slice %59 {offsets = [8, 0], sizes = [8, 32], strides = [1, 1]} : vector<16x32xf32> to vector<8x32xf32>
    %c56 = arith.constant 56 : index
    %c32_29 = arith.constant 32 : index
    %63 = vector.load %arg7[%c56, %c32_29] : memref<64x64xf32, #tpu.memory_space<vmem>>, vector<8x32xf32>
    tpu.vector_store %arg7[%c56, %c32_29], %62 {strides = array<i32>} : memref<64x64xf32, #tpu.memory_space<vmem>>, vector<8x32xf32>,
    %64 = arith.truncf %59 : vector<16x32xf32> to vector<16x32xbf16>
    %cst_30 = arith.constant dense<0.000000e+00> : vector<16x256xf32>
    %65 = tpu.matmul %64, %10, %cst_30 {dimension_numbers = #tpu.dot_dimension_numbers<[1], [0], [0], [1], [0, 0, 1, 1], [], []>} : vector<16x32xbf16>, vector<32x256xbf16>, vector<16x256xf32> -> vector<16x256xf32>
    %66 = vector.extract_strided_slice %65 {offsets = [0, 0], sizes = [16, 128], strides = [1, 1]} : vector<16x256xf32> to vector<16x128xf32>
    %67 = vector.extract_strided_slice %65 {offsets = [0, 128], sizes = [16, 128], strides = [1, 1]} : vector<16x256xf32> to vector<16x128xf32>
    %68 = arith.select %30, %66, %67 : vector<16x128xi1>, vector<16x128xf32>
    %69 = vector.extract_strided_slice %14 {offsets = [16, 0], sizes = [16, 128], strides = [1, 1]} : vector<128x128xf32> to vector<16x128xf32>
    %70 = arith.addf %69, %11 : vector<16x128xf32>
    %71 = arith.addf %70, %68 : vector<16x128xf32>
    %72 = vector.broadcast %27 : vector<1x128xf32> to vector<16x128xf32>
    %73 = arith.mulf %71, %72 : vector<16x128xf32>
    %74 = math.tanh %73 : vector<16x128xf32>
    %cst_31 = arith.constant 5.000000e-01 : f32
    %75 = vector.broadcast %cst_31 : f32 to vector<16x128xf32>
    %76 = arith.mulf %75, %74 : vector<16x128xf32>
    %cst_32 = arith.constant 5.000000e-01 : f32
    %77 = vector.broadcast %cst_32 : f32 to vector<16x128xf32>
    %78 = arith.addf %76, %77 : vector<16x128xf32>
    %79 = vector.shape_cast %24 : vector<1x128xi1> to vector<1x128xi1>
    %80 = vector.broadcast %79 : vector<1x128xi1> to vector<16x128xi1>
    %81 = arith.select %80, %74, %78 : vector<16x128xi1>, vector<16x128xf32>
    %82 = vector.extract_strided_slice %81 {offsets = [0, 0], sizes = [16, 32], strides = [1, 1]} : vector<16x128xf32> to vector<16x32xf32>
    %83 = vector.extract_strided_slice %81 {offsets = [0, 32], sizes = [16, 32], strides = [1, 1]} : vector<16x128xf32> to vector<16x32xf32>
    %84 = vector.extract_strided_slice %81 {offsets = [0, 64], sizes = [16, 32], strides = [1, 1]} : vector<16x128xf32> to vector<16x32xf32>
    %85 = vector.extract_strided_slice %81 {offsets = [0, 96], sizes = [16, 32], strides = [1, 1]} : vector<16x128xf32> to vector<16x32xf32>
    %86 = arith.mulf %83, %57 : vector<16x32xf32>
    %87 = arith.mulf %82, %84 : vector<16x32xf32>
    %88 = arith.addf %86, %87 : vector<16x32xf32>
    %89 = math.tanh %88 : vector<16x32xf32>
    %90 = arith.mulf %85, %89 : vector<16x32xf32>
    %91 = vector.extract_strided_slice %90 {offsets = [0, 0], sizes = [8, 32], strides = [1, 1]} : vector<16x32xf32> to vector<8x32xf32>
    %c8 = arith.constant 8 : index
    %c0_33 = arith.constant 0 : index
    %92 = vector.load %arg7[%c8, %c0_33] : memref<64x64xf32, #tpu.memory_space<vmem>>, vector<8x32xf32>
    tpu.vector_store %arg7[%c8, %c0_33], %91 {strides = array<i32>} : memref<64x64xf32, #tpu.memory_space<vmem>>, vector<8x32xf32>,
    %93 = vector.extract_strided_slice %90 {offsets = [8, 0], sizes = [8, 32], strides = [1, 1]} : vector<16x32xf32> to vector<8x32xf32>
    %c48 = arith.constant 48 : index
    %c32_34 = arith.constant 32 : index
    %94 = vector.load %arg7[%c48, %c32_34] : memref<64x64xf32, #tpu.memory_space<vmem>>, vector<8x32xf32>
    tpu.vector_store %arg7[%c48, %c32_34], %93 {strides = array<i32>} : memref<64x64xf32, #tpu.memory_space<vmem>>, vector<8x32xf32>,
    %95 = arith.truncf %90 : vector<16x32xf32> to vector<16x32xbf16>
    %cst_35 = arith.constant dense<0.000000e+00> : vector<16x256xf32>
    %96 = tpu.matmul %95, %10, %cst_35 {dimension_numbers = #tpu.dot_dimension_numbers<[1], [0], [0], [1], [0, 0, 1, 1], [], []>} : vector<16x32xbf16>, vector<32x256xbf16>, vector<16x256xf32> -> vector<16x256xf32>
    %97 = vector.extract_strided_slice %96 {offsets = [0, 0], sizes = [16, 128], strides = [1, 1]} : vector<16x256xf32> to vector<16x128xf32>
    %98 = vector.extract_strided_slice %96 {offsets = [0, 128], sizes = [16, 128], strides = [1, 1]} : vector<16x256xf32> to vector<16x128xf32>
    %99 = arith.select %30, %97, %98 : vector<16x128xi1>, vector<16x128xf32>
    %100 = vector.extract_strided_slice %14 {offsets = [32, 0], sizes = [16, 128], strides = [1, 1]} : vector<128x128xf32> to vector<16x128xf32>
    %101 = arith.addf %100, %11 : vector<16x128xf32>
    %102 = arith.addf %101, %99 : vector<16x128xf32>
    %103 = vector.broadcast %27 : vector<1x128xf32> to vector<16x128xf32>
    %104 = arith.mulf %102, %103 : vector<16x128xf32>
    %105 = math.tanh %104 : vector<16x128xf32>
    %cst_36 = arith.constant 5.000000e-01 : f32
    %106 = vector.broadcast %cst_36 : f32 to vector<16x128xf32>
    %107 = arith.mulf %106, %105 : vector<16x128xf32>
    %cst_37 = arith.constant 5.000000e-01 : f32
    %108 = vector.broadcast %cst_37 : f32 to vector<16x128xf32>
    %109 = arith.addf %107, %108 : vector<16x128xf32>
    %110 = vector.shape_cast %24 : vector<1x128xi1> to vector<1x128xi1>
    %111 = vector.broadcast %110 : vector<1x128xi1> to vector<16x128xi1>
    %112 = arith.select %111, %105, %109 : vector<16x128xi1>, vector<16x128xf32>
    %113 = vector.extract_strided_slice %112 {offsets = [0, 0], sizes = [16, 32], strides = [1, 1]} : vector<16x128xf32> to vector<16x32xf32>
    %114 = vector.extract_strided_slice %112 {offsets = [0, 32], sizes = [16, 32], strides = [1, 1]} : vector<16x128xf32> to vector<16x32xf32>
    %115 = vector.extract_strided_slice %112 {offsets = [0, 64], sizes = [16, 32], strides = [1, 1]} : vector<16x128xf32> to vector<16x32xf32>
    %116 = vector.extract_strided_slice %112 {offsets = [0, 96], sizes = [16, 32], strides = [1, 1]} : vector<16x128xf32> to vector<16x32xf32>
    %117 = arith.mulf %114, %88 : vector<16x32xf32>
    %118 = arith.mulf %113, %115 : vector<16x32xf32>
    %119 = arith.addf %117, %118 : vector<16x32xf32>
    %120 = math.tanh %119 : vector<16x32xf32>
    %121 = arith.mulf %116, %120 : vector<16x32xf32>
    %122 = vector.extract_strided_slice %121 {offsets = [0, 0], sizes = [8, 32], strides = [1, 1]} : vector<16x32xf32> to vector<8x32xf32>
    %c16_38 = arith.constant 16 : index
    %c0_39 = arith.constant 0 : index
    %123 = vector.load %arg7[%c16_38, %c0_39] : memref<64x64xf32, #tpu.memory_space<vmem>>, vector<8x32xf32>
    tpu.vector_store %arg7[%c16_38, %c0_39], %122 {strides = array<i32>} : memref<64x64xf32, #tpu.memory_space<vmem>>, vector<8x32xf32>,
    %124 = vector.extract_strided_slice %121 {offsets = [8, 0], sizes = [8, 32], strides = [1, 1]} : vector<16x32xf32> to vector<8x32xf32>
    %c40 = arith.constant 40 : index
    %c32_40 = arith.constant 32 : index
    %125 = vector.load %arg7[%c40, %c32_40] : memref<64x64xf32, #tpu.memory_space<vmem>>, vector<8x32xf32>
    tpu.vector_store %arg7[%c40, %c32_40], %124 {strides = array<i32>} : memref<64x64xf32, #tpu.memory_space<vmem>>, vector<8x32xf32>,
    %126 = arith.truncf %121 : vector<16x32xf32> to vector<16x32xbf16>
    %cst_41 = arith.constant dense<0.000000e+00> : vector<16x256xf32>
    %127 = tpu.matmul %126, %10, %cst_41 {dimension_numbers = #tpu.dot_dimension_numbers<[1], [0], [0], [1], [0, 0, 1, 1], [], []>} : vector<16x32xbf16>, vector<32x256xbf16>, vector<16x256xf32> -> vector<16x256xf32>
    %128 = vector.extract_strided_slice %127 {offsets = [0, 0], sizes = [16, 128], strides = [1, 1]} : vector<16x256xf32> to vector<16x128xf32>
    %129 = vector.extract_strided_slice %127 {offsets = [0, 128], sizes = [16, 128], strides = [1, 1]} : vector<16x256xf32> to vector<16x128xf32>
    %130 = arith.select %30, %128, %129 : vector<16x128xi1>, vector<16x128xf32>
    %131 = vector.extract_strided_slice %14 {offsets = [48, 0], sizes = [16, 128], strides = [1, 1]} : vector<128x128xf32> to vector<16x128xf32>
    %132 = arith.addf %131, %11 : vector<16x128xf32>
    %133 = arith.addf %132, %130 : vector<16x128xf32>
    %134 = vector.broadcast %27 : vector<1x128xf32> to vector<16x128xf32>
    %135 = arith.mulf %133, %134 : vector<16x128xf32>
    %136 = math.tanh %135 : vector<16x128xf32>
    %cst_42 = arith.constant 5.000000e-01 : f32
    %137 = vector.broadcast %cst_42 : f32 to vector<16x128xf32>
    %138 = arith.mulf %137, %136 : vector<16x128xf32>
    %cst_43 = arith.constant 5.000000e-01 : f32
    %139 = vector.broadcast %cst_43 : f32 to vector<16x128xf32>
    %140 = arith.addf %138, %139 : vector<16x128xf32>
    %141 = vector.shape_cast %24 : vector<1x128xi1> to vector<1x128xi1>
    %142 = vector.broadcast %141 : vector<1x128xi1> to vector<16x128xi1>
    %143 = arith.select %142, %136, %140 : vector<16x128xi1>, vector<16x128xf32>
    %144 = vector.extract_strided_slice %143 {offsets = [0, 0], sizes = [16, 32], strides = [1, 1]} : vector<16x128xf32> to vector<16x32xf32>
    %145 = vector.extract_strided_slice %143 {offsets = [0, 32], sizes = [16, 32], strides = [1, 1]} : vector<16x128xf32> to vector<16x32xf32>
    %146 = vector.extract_strided_slice %143 {offsets = [0, 64], sizes = [16, 32], strides = [1, 1]} : vector<16x128xf32> to vector<16x32xf32>
    %147 = vector.extract_strided_slice %143 {offsets = [0, 96], sizes = [16, 32], strides = [1, 1]} : vector<16x128xf32> to vector<16x32xf32>
    %148 = arith.mulf %145, %119 : vector<16x32xf32>
    %149 = arith.mulf %144, %146 : vector<16x32xf32>
    %150 = arith.addf %148, %149 : vector<16x32xf32>
    %151 = math.tanh %150 : vector<16x32xf32>
    %152 = arith.mulf %147, %151 : vector<16x32xf32>
    %153 = vector.extract_strided_slice %152 {offsets = [0, 0], sizes = [8, 32], strides = [1, 1]} : vector<16x32xf32> to vector<8x32xf32>
    %c24 = arith.constant 24 : index
    %c0_44 = arith.constant 0 : index
    %154 = vector.load %arg7[%c24, %c0_44] : memref<64x64xf32, #tpu.memory_space<vmem>>, vector<8x32xf32>
    tpu.vector_store %arg7[%c24, %c0_44], %153 {strides = array<i32>} : memref<64x64xf32, #tpu.memory_space<vmem>>, vector<8x32xf32>,
    %155 = vector.extract_strided_slice %152 {offsets = [8, 0], sizes = [8, 32], strides = [1, 1]} : vector<16x32xf32> to vector<8x32xf32>
    %c32_45 = arith.constant 32 : index
    %c32_46 = arith.constant 32 : index
    %156 = vector.load %arg7[%c32_45, %c32_46] : memref<64x64xf32, #tpu.memory_space<vmem>>, vector<8x32xf32>
    tpu.vector_store %arg7[%c32_45, %c32_46], %155 {strides = array<i32>} : memref<64x64xf32, #tpu.memory_space<vmem>>, vector<8x32xf32>,
    %157 = arith.truncf %152 : vector<16x32xf32> to vector<16x32xbf16>
    %cst_47 = arith.constant dense<0.000000e+00> : vector<16x256xf32>
    %158 = tpu.matmul %157, %10, %cst_47 {dimension_numbers = #tpu.dot_dimension_numbers<[1], [0], [0], [1], [0, 0, 1, 1], [], []>} : vector<16x32xbf16>, vector<32x256xbf16>, vector<16x256xf32> -> vector<16x256xf32>
    %159 = vector.extract_strided_slice %158 {offsets = [0, 0], sizes = [16, 128], strides = [1, 1]} : vector<16x256xf32> to vector<16x128xf32>
    %160 = vector.extract_strided_slice %158 {offsets = [0, 128], sizes = [16, 128], strides = [1, 1]} : vector<16x256xf32> to vector<16x128xf32>
    %161 = arith.select %30, %159, %160 : vector<16x128xi1>, vector<16x128xf32>
    %162 = vector.extract_strided_slice %14 {offsets = [64, 0], sizes = [16, 128], strides = [1, 1]} : vector<128x128xf32> to vector<16x128xf32>
    %163 = arith.addf %162, %11 : vector<16x128xf32>
    %164 = arith.addf %163, %161 : vector<16x128xf32>
    %165 = vector.broadcast %27 : vector<1x128xf32> to vector<16x128xf32>
    %166 = arith.mulf %164, %165 : vector<16x128xf32>
    %167 = math.tanh %166 : vector<16x128xf32>
    %cst_48 = arith.constant 5.000000e-01 : f32
    %168 = vector.broadcast %cst_48 : f32 to vector<16x128xf32>
    %169 = arith.mulf %168, %167 : vector<16x128xf32>
    %cst_49 = arith.constant 5.000000e-01 : f32
    %170 = vector.broadcast %cst_49 : f32 to vector<16x128xf32>
    %171 = arith.addf %169, %170 : vector<16x128xf32>
    %172 = vector.shape_cast %24 : vector<1x128xi1> to vector<1x128xi1>
    %173 = vector.broadcast %172 : vector<1x128xi1> to vector<16x128xi1>
    %174 = arith.select %173, %167, %171 : vector<16x128xi1>, vector<16x128xf32>
    %175 = vector.extract_strided_slice %174 {offsets = [0, 0], sizes = [16, 32], strides = [1, 1]} : vector<16x128xf32> to vector<16x32xf32>
    %176 = vector.extract_strided_slice %174 {offsets = [0, 32], sizes = [16, 32], strides = [1, 1]} : vector<16x128xf32> to vector<16x32xf32>
    %177 = vector.extract_strided_slice %174 {offsets = [0, 64], sizes = [16, 32], strides = [1, 1]} : vector<16x128xf32> to vector<16x32xf32>
    %178 = vector.extract_strided_slice %174 {offsets = [0, 96], sizes = [16, 32], strides = [1, 1]} : vector<16x128xf32> to vector<16x32xf32>
    %179 = arith.mulf %176, %150 : vector<16x32xf32>
    %180 = arith.mulf %175, %177 : vector<16x32xf32>
    %181 = arith.addf %179, %180 : vector<16x32xf32>
    %182 = math.tanh %181 : vector<16x32xf32>
    %183 = arith.mulf %178, %182 : vector<16x32xf32>
    %184 = vector.extract_strided_slice %183 {offsets = [0, 0], sizes = [8, 32], strides = [1, 1]} : vector<16x32xf32> to vector<8x32xf32>
    %c32_50 = arith.constant 32 : index
    %c0_51 = arith.constant 0 : index
    %185 = vector.load %arg7[%c32_50, %c0_51] : memref<64x64xf32, #tpu.memory_space<vmem>>, vector<8x32xf32>
    tpu.vector_store %arg7[%c32_50, %c0_51], %184 {strides = array<i32>} : memref<64x64xf32, #tpu.memory_space<vmem>>, vector<8x32xf32>,
    %186 = vector.extract_strided_slice %183 {offsets = [8, 0], sizes = [8, 32], strides = [1, 1]} : vector<16x32xf32> to vector<8x32xf32>
    %c24_52 = arith.constant 24 : index
    %c32_53 = arith.constant 32 : index
    %187 = vector.load %arg7[%c24_52, %c32_53] : memref<64x64xf32, #tpu.memory_space<vmem>>, vector<8x32xf32>
    tpu.vector_store %arg7[%c24_52, %c32_53], %186 {strides = array<i32>} : memref<64x64xf32, #tpu.memory_space<vmem>>, vector<8x32xf32>,
    %188 = arith.truncf %183 : vector<16x32xf32> to vector<16x32xbf16>
    %cst_54 = arith.constant dense<0.000000e+00> : vector<16x256xf32>
    %189 = tpu.matmul %188, %10, %cst_54 {dimension_numbers = #tpu.dot_dimension_numbers<[1], [0], [0], [1], [0, 0, 1, 1], [], []>} : vector<16x32xbf16>, vector<32x256xbf16>, vector<16x256xf32> -> vector<16x256xf32>
    %190 = vector.extract_strided_slice %189 {offsets = [0, 0], sizes = [16, 128], strides = [1, 1]} : vector<16x256xf32> to vector<16x128xf32>
    %191 = vector.extract_strided_slice %189 {offsets = [0, 128], sizes = [16, 128], strides = [1, 1]} : vector<16x256xf32> to vector<16x128xf32>
    %192 = arith.select %30, %190, %191 : vector<16x128xi1>, vector<16x128xf32>
    %193 = vector.extract_strided_slice %14 {offsets = [80, 0], sizes = [16, 128], strides = [1, 1]} : vector<128x128xf32> to vector<16x128xf32>
    %194 = arith.addf %193, %11 : vector<16x128xf32>
    %195 = arith.addf %194, %192 : vector<16x128xf32>
    %196 = vector.broadcast %27 : vector<1x128xf32> to vector<16x128xf32>
    %197 = arith.mulf %195, %196 : vector<16x128xf32>
    %198 = math.tanh %197 : vector<16x128xf32>
    %cst_55 = arith.constant 5.000000e-01 : f32
    %199 = vector.broadcast %cst_55 : f32 to vector<16x128xf32>
    %200 = arith.mulf %199, %198 : vector<16x128xf32>
    %cst_56 = arith.constant 5.000000e-01 : f32
    %201 = vector.broadcast %cst_56 : f32 to vector<16x128xf32>
    %202 = arith.addf %200, %201 : vector<16x128xf32>
    %203 = vector.shape_cast %24 : vector<1x128xi1> to vector<1x128xi1>
    %204 = vector.broadcast %203 : vector<1x128xi1> to vector<16x128xi1>
    %205 = arith.select %204, %198, %202 : vector<16x128xi1>, vector<16x128xf32>
    %206 = vector.extract_strided_slice %205 {offsets = [0, 0], sizes = [16, 32], strides = [1, 1]} : vector<16x128xf32> to vector<16x32xf32>
    %207 = vector.extract_strided_slice %205 {offsets = [0, 32], sizes = [16, 32], strides = [1, 1]} : vector<16x128xf32> to vector<16x32xf32>
    %208 = vector.extract_strided_slice %205 {offsets = [0, 64], sizes = [16, 32], strides = [1, 1]} : vector<16x128xf32> to vector<16x32xf32>
    %209 = vector.extract_strided_slice %205 {offsets = [0, 96], sizes = [16, 32], strides = [1, 1]} : vector<16x128xf32> to vector<16x32xf32>
    %210 = arith.mulf %207, %181 : vector<16x32xf32>
    %211 = arith.mulf %206, %208 : vector<16x32xf32>
    %212 = arith.addf %210, %211 : vector<16x32xf32>
    %213 = math.tanh %212 : vector<16x32xf32>
    %214 = arith.mulf %209, %213 : vector<16x32xf32>
    %215 = vector.extract_strided_slice %214 {offsets = [0, 0], sizes = [8, 32], strides = [1, 1]} : vector<16x32xf32> to vector<8x32xf32>
    %c40_57 = arith.constant 40 : index
    %c0_58 = arith.constant 0 : index
    %216 = vector.load %arg7[%c40_57, %c0_58] : memref<64x64xf32, #tpu.memory_space<vmem>>, vector<8x32xf32>
    tpu.vector_store %arg7[%c40_57, %c0_58], %215 {strides = array<i32>} : memref<64x64xf32, #tpu.memory_space<vmem>>, vector<8x32xf32>,
    %217 = vector.extract_strided_slice %214 {offsets = [8, 0], sizes = [8, 32], strides = [1, 1]} : vector<16x32xf32> to vector<8x32xf32>
    %c16_59 = arith.constant 16 : index
    %c32_60 = arith.constant 32 : index
    %218 = vector.load %arg7[%c16_59, %c32_60] : memref<64x64xf32, #tpu.memory_space<vmem>>, vector<8x32xf32>
    tpu.vector_store %arg7[%c16_59, %c32_60], %217 {strides = array<i32>} : memref<64x64xf32, #tpu.memory_space<vmem>>, vector<8x32xf32>,
    %219 = arith.truncf %214 : vector<16x32xf32> to vector<16x32xbf16>
    %cst_61 = arith.constant dense<0.000000e+00> : vector<16x256xf32>
    %220 = tpu.matmul %219, %10, %cst_61 {dimension_numbers = #tpu.dot_dimension_numbers<[1], [0], [0], [1], [0, 0, 1, 1], [], []>} : vector<16x32xbf16>, vector<32x256xbf16>, vector<16x256xf32> -> vector<16x256xf32>
    %221 = vector.extract_strided_slice %220 {offsets = [0, 0], sizes = [16, 128], strides = [1, 1]} : vector<16x256xf32> to vector<16x128xf32>
    %222 = vector.extract_strided_slice %220 {offsets = [0, 128], sizes = [16, 128], strides = [1, 1]} : vector<16x256xf32> to vector<16x128xf32>
    %223 = arith.select %30, %221, %222 : vector<16x128xi1>, vector<16x128xf32>
    %224 = vector.extract_strided_slice %14 {offsets = [96, 0], sizes = [16, 128], strides = [1, 1]} : vector<128x128xf32> to vector<16x128xf32>
    %225 = arith.addf %224, %11 : vector<16x128xf32>
    %226 = arith.addf %225, %223 : vector<16x128xf32>
    %227 = vector.broadcast %27 : vector<1x128xf32> to vector<16x128xf32>
    %228 = arith.mulf %226, %227 : vector<16x128xf32>
    %229 = math.tanh %228 : vector<16x128xf32>
    %cst_62 = arith.constant 5.000000e-01 : f32
    %230 = vector.broadcast %cst_62 : f32 to vector<16x128xf32>
    %231 = arith.mulf %230, %229 : vector<16x128xf32>
    %cst_63 = arith.constant 5.000000e-01 : f32
    %232 = vector.broadcast %cst_63 : f32 to vector<16x128xf32>
    %233 = arith.addf %231, %232 : vector<16x128xf32>
    %234 = vector.shape_cast %24 : vector<1x128xi1> to vector<1x128xi1>
    %235 = vector.broadcast %234 : vector<1x128xi1> to vector<16x128xi1>
    %236 = arith.select %235, %229, %233 : vector<16x128xi1>, vector<16x128xf32>
    %237 = vector.extract_strided_slice %236 {offsets = [0, 0], sizes = [16, 32], strides = [1, 1]} : vector<16x128xf32> to vector<16x32xf32>
    %238 = vector.extract_strided_slice %236 {offsets = [0, 32], sizes = [16, 32], strides = [1, 1]} : vector<16x128xf32> to vector<16x32xf32>
    %239 = vector.extract_strided_slice %236 {offsets = [0, 64], sizes = [16, 32], strides = [1, 1]} : vector<16x128xf32> to vector<16x32xf32>
    %240 = vector.extract_strided_slice %236 {offsets = [0, 96], sizes = [16, 32], strides = [1, 1]} : vector<16x128xf32> to vector<16x32xf32>
    %241 = arith.mulf %238, %212 : vector<16x32xf32>
    %242 = arith.mulf %237, %239 : vector<16x32xf32>
    %243 = arith.addf %241, %242 : vector<16x32xf32>
    %244 = math.tanh %243 : vector<16x32xf32>
    %245 = arith.mulf %240, %244 : vector<16x32xf32>
    %246 = vector.extract_strided_slice %245 {offsets = [0, 0], sizes = [8, 32], strides = [1, 1]} : vector<16x32xf32> to vector<8x32xf32>
    %c48_64 = arith.constant 48 : index
    %c0_65 = arith.constant 0 : index
    %247 = vector.load %arg7[%c48_64, %c0_65] : memref<64x64xf32, #tpu.memory_space<vmem>>, vector<8x32xf32>
    tpu.vector_store %arg7[%c48_64, %c0_65], %246 {strides = array<i32>} : memref<64x64xf32, #tpu.memory_space<vmem>>, vector<8x32xf32>,
    %248 = vector.extract_strided_slice %245 {offsets = [8, 0], sizes = [8, 32], strides = [1, 1]} : vector<16x32xf32> to vector<8x32xf32>
    %c8_66 = arith.constant 8 : index
    %c32_67 = arith.constant 32 : index
    %249 = vector.load %arg7[%c8_66, %c32_67] : memref<64x64xf32, #tpu.memory_space<vmem>>, vector<8x32xf32>
    tpu.vector_store %arg7[%c8_66, %c32_67], %248 {strides = array<i32>} : memref<64x64xf32, #tpu.memory_space<vmem>>, vector<8x32xf32>,
    %250 = arith.truncf %245 : vector<16x32xf32> to vector<16x32xbf16>
    %cst_68 = arith.constant dense<0.000000e+00> : vector<16x256xf32>
    %251 = tpu.matmul %250, %10, %cst_68 {dimension_numbers = #tpu.dot_dimension_numbers<[1], [0], [0], [1], [0, 0, 1, 1], [], []>} : vector<16x32xbf16>, vector<32x256xbf16>, vector<16x256xf32> -> vector<16x256xf32>
    %252 = vector.extract_strided_slice %251 {offsets = [0, 0], sizes = [16, 128], strides = [1, 1]} : vector<16x256xf32> to vector<16x128xf32>
    %253 = vector.extract_strided_slice %251 {offsets = [0, 128], sizes = [16, 128], strides = [1, 1]} : vector<16x256xf32> to vector<16x128xf32>
    %254 = arith.select %30, %252, %253 : vector<16x128xi1>, vector<16x128xf32>
    %255 = vector.extract_strided_slice %14 {offsets = [112, 0], sizes = [16, 128], strides = [1, 1]} : vector<128x128xf32> to vector<16x128xf32>
    %256 = arith.addf %255, %11 : vector<16x128xf32>
    %257 = arith.addf %256, %254 : vector<16x128xf32>
    %258 = vector.broadcast %27 : vector<1x128xf32> to vector<16x128xf32>
    %259 = arith.mulf %257, %258 : vector<16x128xf32>
    %260 = math.tanh %259 : vector<16x128xf32>
    %cst_69 = arith.constant 5.000000e-01 : f32
    %261 = vector.broadcast %cst_69 : f32 to vector<16x128xf32>
    %262 = arith.mulf %261, %260 : vector<16x128xf32>
    %cst_70 = arith.constant 5.000000e-01 : f32
    %263 = vector.broadcast %cst_70 : f32 to vector<16x128xf32>
    %264 = arith.addf %262, %263 : vector<16x128xf32>
    %265 = vector.shape_cast %24 : vector<1x128xi1> to vector<1x128xi1>
    %266 = vector.broadcast %265 : vector<1x128xi1> to vector<16x128xi1>
    %267 = arith.select %266, %260, %264 : vector<16x128xi1>, vector<16x128xf32>
    %268 = vector.extract_strided_slice %267 {offsets = [0, 0], sizes = [16, 32], strides = [1, 1]} : vector<16x128xf32> to vector<16x32xf32>
    %269 = vector.extract_strided_slice %267 {offsets = [0, 32], sizes = [16, 32], strides = [1, 1]} : vector<16x128xf32> to vector<16x32xf32>
    %270 = vector.extract_strided_slice %267 {offsets = [0, 64], sizes = [16, 32], strides = [1, 1]} : vector<16x128xf32> to vector<16x32xf32>
    %271 = vector.extract_strided_slice %267 {offsets = [0, 96], sizes = [16, 32], strides = [1, 1]} : vector<16x128xf32> to vector<16x32xf32>
    %272 = arith.mulf %269, %243 : vector<16x32xf32>
    %273 = arith.mulf %268, %270 : vector<16x32xf32>
    %274 = arith.addf %272, %273 : vector<16x32xf32>
    %275 = math.tanh %274 : vector<16x32xf32>
    %276 = arith.mulf %271, %275 : vector<16x32xf32>
    %277 = vector.extract_strided_slice %276 {offsets = [0, 0], sizes = [8, 32], strides = [1, 1]} : vector<16x32xf32> to vector<8x32xf32>
    %c56_71 = arith.constant 56 : index
    %c0_72 = arith.constant 0 : index
    %278 = vector.load %arg7[%c56_71, %c0_72] : memref<64x64xf32, #tpu.memory_space<vmem>>, vector<8x32xf32>
    tpu.vector_store %arg7[%c56_71, %c0_72], %277 {strides = array<i32>} : memref<64x64xf32, #tpu.memory_space<vmem>>, vector<8x32xf32>,
    %279 = vector.extract_strided_slice %276 {offsets = [8, 0], sizes = [8, 32], strides = [1, 1]} : vector<16x32xf32> to vector<8x32xf32>
    %c0_73 = arith.constant 0 : index
    %c32_74 = arith.constant 32 : index
    %280 = vector.load %arg7[%c0_73, %c32_74] : memref<64x64xf32, #tpu.memory_space<vmem>>, vector<8x32xf32>
    tpu.vector_store %arg7[%c0_73, %c32_74], %279 {strides = array<i32>} : memref<64x64xf32, #tpu.memory_space<vmem>>, vector<8x32xf32>,
    %281 = vector.extract_strided_slice %276 {offsets = [0, 0], sizes = [8, 32], strides = [1, 1]} : vector<16x32xf32> to vector<8x32xf32>
    %282 = vector.extract_strided_slice %276 {offsets = [8, 0], sizes = [8, 32], strides = [1, 1]} : vector<16x32xf32> to vector<8x32xf32>
    %283 = tpu.concatenate %281, %282 in 1 : vector<8x32xf32>, vector<8x32xf32> -> vector<8x64xf32>
    %284 = arith.truncf %283 : vector<8x64xf32> to vector<8x64xbf16>
    %285 = vector.extract_strided_slice %274 {offsets = [0, 0], sizes = [8, 32], strides = [1, 1]} : vector<16x32xf32> to vector<8x32xf32>
    %286 = vector.extract_strided_slice %274 {offsets = [8, 0], sizes = [8, 32], strides = [1, 1]} : vector<16x32xf32> to vector<8x32xf32>
    %287 = tpu.concatenate %285, %286 in 1 : vector<8x32xf32>, vector<8x32xf32> -> vector<8x64xf32>
    %288 = arith.truncf %287 : vector<8x64xf32> to vector<8x64xbf16>
    %cst_75 = arith.constant dense<0.000000e+00> : vector<8x32xf32>
    %289 = tpu.matmul %284, %5, %cst_75 {dimension_numbers = #tpu.dot_dimension_numbers<[1], [0], [0], [1], [0, 0, 1, 1], [], []>} : vector<8x64xbf16>, vector<64x32xbf16>, vector<8x32xf32> -> vector<8x32xf32>
    %cst_76 = arith.constant dense<0.000000e+00> : vector<8x32xf32>
    %290 = tpu.matmul %288, %6, %cst_76 {dimension_numbers = #tpu.dot_dimension_numbers<[1], [0], [0], [1], [0, 0, 1, 1], [], []>} : vector<8x64xbf16>, vector<64x32xbf16>, vector<8x32xf32> -> vector<8x32xf32>
    %c0_77 = arith.constant 0 : index
    %c0_78 = arith.constant 0 : index
    %291 = vector.load %arg7[%c0_77, %c0_78] : memref<64x64xf32, #tpu.memory_space<vmem>>, vector<64x64xf32>
    %292 = arith.truncf %291 : vector<64x64xf32> to vector<64x64xbf16>
    %cst_79 = arith.constant dense<0.000000e+00> : vector<64x32xf32>
    %293 = tpu.matmul %292, %7, %cst_79 {dimension_numbers = #tpu.dot_dimension_numbers<[1], [0], [0], [1], [0, 0, 1, 1], [], []>} : vector<64x64xbf16>, vector<64x32xbf16>, vector<64x32xf32> -> vector<64x32xf32>
    %294 = arith.truncf %293 : vector<64x32xf32> to vector<64x32xbf16>
    %295 = tpu.iota {dimensions = array<i32: 1>} : vector<8x64xi32>
    %c7_i32 = arith.constant 7 : i32
    %296 = vector.broadcast %c7_i32 : i32 to vector<8x64xi32>
    %297 = arith.andi %295, %296 : vector<8x64xi32>
    %298 = tpu.iota {dimensions = array<i32: 0>} : vector<8x64xi32>
    %299 = arith.cmpi eq, %297, %298 : vector<8x64xi32>
    %300 = tpu.iota {dimensions = array<i32: 1>} : vector<1x128xi32>
    %c56_i32 = arith.constant 56 : i32
    %301 = vector.broadcast %c56_i32 : i32 to vector<1x128xi32>
    %302 = arith.cmpi sge, %300, %301 : vector<1x128xi32>
    %c64_i32_80 = arith.constant 64 : i32
    %303 = vector.broadcast %c64_i32_80 : i32 to vector<1x128xi32>
    %304 = arith.cmpi slt, %300, %303 : vector<1x128xi32>
    %305 = arith.andi %302, %304 : vector<1x128xi1>
    %c112_i32 = arith.constant 112 : i32
    %306 = vector.broadcast %c112_i32 : i32 to vector<1x128xi32>
    %307 = arith.cmpi sge, %300, %306 : vector<1x128xi32>
    %308 = arith.ori %305, %307 : vector<1x128xi1>
    %309 = tpu.iota {dimensions = array<i32: 1>} : vector<8x64xi32>
    %c0_81 = arith.constant 0 : index
    %c0_82 = arith.constant 0 : index
    %310 = vector.load %arg2[%c0_81, %c0_82] : memref<64x2xi32, #tpu.memory_space<vmem>>, vector<64x2xi32>
    %311 = vector.extract_strided_slice %310 {offsets = [0, 0], sizes = [64, 1], strides = [1, 1]} : vector<64x2xi32> to vector<64x1xi32>
    %312 = vector.extract_strided_slice %310 {offsets = [0, 1], sizes = [64, 1], strides = [1, 1]} : vector<64x2xi32> to vector<64x1xi32>
    %cst_83 = arith.constant 0.000000e+00 : f32
    %313 = vector.broadcast %cst_83 : f32 to vector<8x32xf32>
    %cst_84 = arith.constant 0.000000e+00 : f32
    %314 = vector.broadcast %cst_84 : f32 to vector<8x1xf32>
    %315 = vector.extract_strided_slice %18 {offsets = [0, 0], sizes = [8, 128], strides = [1, 1]} : vector<64x128xf32> to vector<8x128xf32>
    %316 = arith.truncf %313 : vector<8x32xf32> to vector<8x32xbf16>
    %cst_85 = arith.constant dense<0.000000e+00> : vector<8x128xf32>
    %317 = tpu.matmul %316, %2, %cst_85 {dimension_numbers = #tpu.dot_dimension_numbers<[1], [0], [0], [1], [0, 0, 1, 1], [], []>} : vector<8x32xbf16>, vector<32x128xbf16>, vector<8x128xf32> -> vector<8x128xf32>
    %318 = arith.addf %315, %317 : vector<8x128xf32>
    %319 = arith.truncf %289 : vector<8x32xf32> to vector<8x32xbf16>
    %cst_86 = arith.constant dense<0.000000e+00> : vector<8x128xf32>
    %320 = tpu.matmul %319, %3, %cst_86 {dimension_numbers = #tpu.dot_dimension_numbers<[1], [0], [0], [1], [0, 0, 1, 1], [], []>} : vector<8x32xbf16>, vector<32x128xbf16>, vector<8x128xf32> -> vector<8x128xf32>
    %321 = arith.addf %318, %320 : vector<8x128xf32>
    %322 = vector.broadcast %27 : vector<1x128xf32> to vector<8x128xf32>
    %323 = arith.mulf %321, %322 : vector<8x128xf32>
    %324 = math.tanh %323 : vector<8x128xf32>
    %cst_87 = arith.constant 5.000000e-01 : f32
    %325 = vector.broadcast %cst_87 : f32 to vector<8x128xf32>
    %326 = arith.mulf %325, %324 : vector<8x128xf32>
    %cst_88 = arith.constant 5.000000e-01 : f32
    %327 = vector.broadcast %cst_88 : f32 to vector<8x128xf32>
    %328 = arith.addf %326, %327 : vector<8x128xf32>
    %329 = vector.shape_cast %24 : vector<1x128xi1> to vector<1x128xi1>
    %330 = vector.broadcast %329 : vector<1x128xi1> to vector<8x128xi1>
    %331 = arith.select %330, %324, %328 : vector<8x128xi1>, vector<8x128xf32>
    %332 = vector.extract_strided_slice %331 {offsets = [0, 0], sizes = [8, 32], strides = [1, 1]} : vector<8x128xf32> to vector<8x32xf32>
    %333 = vector.extract_strided_slice %331 {offsets = [0, 32], sizes = [8, 32], strides = [1, 1]} : vector<8x128xf32> to vector<8x32xf32>
    %334 = vector.extract_strided_slice %331 {offsets = [0, 64], sizes = [8, 32], strides = [1, 1]} : vector<8x128xf32> to vector<8x32xf32>
    %335 = vector.extract_strided_slice %331 {offsets = [0, 96], sizes = [8, 32], strides = [1, 1]} : vector<8x128xf32> to vector<8x32xf32>
    %336 = arith.mulf %333, %290 : vector<8x32xf32>
    %337 = arith.mulf %332, %334 : vector<8x32xf32>
    %338 = arith.addf %336, %337 : vector<8x32xf32>
    %339 = math.tanh %338 : vector<8x32xf32>
    %340 = arith.mulf %335, %339 : vector<8x32xf32>
    %341 = arith.truncf %340 : vector<8x32xf32> to vector<8x32xbf16>
    %cst_89 = arith.constant dense<0.000000e+00> : vector<8x64xf32>
    %342 = tpu.matmul %341, %294, %cst_89 {dimension_numbers = #tpu.dot_dimension_numbers<[1], [1], [0], [0], [0, 0, 1, 0], [], []>} : vector<8x32xbf16>, vector<64x32xbf16>, vector<8x64xf32> -> vector<8x64xf32>
    %cst_90 = arith.constant -1.000000e+30 : f32
    %343 = vector.broadcast %cst_90 : f32 to vector<8x64xf32>
    %344 = arith.select %299, %342, %343 : vector<8x64xi1>, vector<8x64xf32>
    %cst_91 = arith.constant dense<0xFF800000> : vector<8xf32>
    %345 = vector.multi_reduction <maximumf>, %344, %cst_91 [1] : vector<8x64xf32> to vector<8xf32>
    %346 = vector.shape_cast %345 : vector<8xf32> to vector<8x1xf32>
    %347 = vector.broadcast %346 : vector<8x1xf32> to vector<8x64xf32>
    %348 = arith.subf %344, %347 : vector<8x64xf32>
    %349 = math.exp %348 : vector<8x64xf32>
    %cst_92 = arith.constant dense<0.000000e+00> : vector<8xf32>
    %350 = vector.multi_reduction <add>, %349, %cst_92 [1] : vector<8x64xf32> to vector<8xf32>
    %351 = vector.shape_cast %350 : vector<8xf32> to vector<8x1xf32>
    %352 = tpu.reciprocal %351 {approx = true} : vector<8x1xf32> -> vector<8x1xf32>
    %353 = vector.broadcast %352 : vector<8x1xf32> to vector<8x64xf32>
    %354 = arith.mulf %349, %353 : vector<8x64xf32>
    %355 = arith.truncf %354 : vector<8x64xf32> to vector<8x64xbf16>
    %cst_93 = arith.constant dense<0.000000e+00> : vector<8x64xf32>
    %356 = tpu.matmul %355, %292, %cst_93 {dimension_numbers = #tpu.dot_dimension_numbers<[1], [0], [0], [1], [0, 0, 1, 1], [], []>} : vector<8x64xbf16>, vector<64x64xbf16>, vector<8x64xf32> -> vector<8x64xf32>
    %cst_94 = arith.constant dense<0.000000e+00> : vector<8x32xf32>
    %357 = tpu.matmul %341, %8, %cst_94 {dimension_numbers = #tpu.dot_dimension_numbers<[1], [0], [0], [1], [0, 0, 1, 1], [], []>} : vector<8x32xbf16>, vector<32x32xbf16>, vector<8x32xf32> -> vector<8x32xf32>
    %358 = arith.truncf %356 : vector<8x64xf32> to vector<8x64xbf16>
    %cst_95 = arith.constant dense<0.000000e+00> : vector<8x32xf32>
    %359 = tpu.matmul %358, %9, %cst_95 {dimension_numbers = #tpu.dot_dimension_numbers<[1], [0], [0], [1], [0, 0, 1, 1], [], []>} : vector<8x64xbf16>, vector<64x32xbf16>, vector<8x32xf32> -> vector<8x32xf32>
    %360 = arith.addf %357, %359 : vector<8x32xf32>
    %361 = math.tanh %360 : vector<8x32xf32>
    %362 = arith.truncf %361 : vector<8x32xf32> to vector<8x32xbf16>
    %cst_96 = arith.constant dense<0.000000e+00> : vector<8x128xf32>
    %363 = tpu.matmul %362, %4, %cst_96 {dimension_numbers = #tpu.dot_dimension_numbers<[1], [0], [0], [1], [0, 0, 1, 1], [], []>} : vector<8x32xbf16>, vector<32x128xbf16>, vector<8x128xf32> -> vector<8x128xf32>
    %cst_97 = arith.constant -1.000000e+30 : f32
    %364 = vector.shape_cast %308 : vector<1x128xi1> to vector<1x128xi1>
    %365 = vector.broadcast %364 : vector<1x128xi1> to vector<8x128xi1>
    %366 = vector.broadcast %cst_97 : f32 to vector<8x128xf32>
    %367 = arith.select %365, %366, %363 : vector<8x128xi1>, vector<8x128xf32>
    %368 = vector.extract_strided_slice %311 {offsets = [0, 0], sizes = [8, 1], strides = [1, 1]} : vector<64x1xi32> to vector<8x1xi32>
    %369 = vector.extract_strided_slice %312 {offsets = [0, 0], sizes = [8, 1], strides = [1, 1]} : vector<64x1xi32> to vector<8x1xi32>
    %370 = vector.extract_strided_slice %367 {offsets = [0, 0], sizes = [8, 64], strides = [1, 1]} : vector<8x128xf32> to vector<8x64xf32>
    %cst_98 = arith.constant dense<0xFF800000> : vector<8xf32>
    %371 = vector.multi_reduction <maximumf>, %370, %cst_98 [1] : vector<8x64xf32> to vector<8xf32>
    %372 = vector.shape_cast %371 : vector<8xf32> to vector<8x1xf32>
    %373 = vector.broadcast %372 : vector<8x1xf32> to vector<8x64xf32>
    %374 = arith.subf %370, %373 : vector<8x64xf32>
    %375 = math.exp %374 : vector<8x64xf32>
    %cst_99 = arith.constant dense<0.000000e+00> : vector<8xf32>
    %376 = vector.multi_reduction <add>, %375, %cst_99 [1] : vector<8x64xf32> to vector<8xf32>
    %377 = vector.shape_cast %376 : vector<8xf32> to vector<8x1xf32>
    %378 = math.log %377 : vector<8x1xf32>
    %379 = arith.addf %372, %378 : vector<8x1xf32>
    %380 = vector.broadcast %368 : vector<8x1xi32> to vector<8x64xi32>
    %381 = arith.cmpi eq, %309, %380 : vector<8x64xi32>
    %cst_100 = arith.constant 0.000000e+00 : f32
    %382 = vector.broadcast %cst_100 : f32 to vector<8x64xf32>
    %383 = arith.select %381, %370, %382 : vector<8x64xi1>, vector<8x64xf32>
    %cst_101 = arith.constant dense<0.000000e+00> : vector<8xf32>
    %384 = vector.multi_reduction <add>, %383, %cst_101 [1] : vector<8x64xf32> to vector<8xf32>
    %385 = vector.shape_cast %384 : vector<8xf32> to vector<8x1xf32>
    %386 = arith.subf %385, %379 : vector<8x1xf32>
    %c0_i32 = arith.constant 0 : i32
    %387 = vector.broadcast %c0_i32 : i32 to vector<8x1xi32>
    %388 = arith.cmpi ne, %368, %387 : vector<8x1xi32>
    %389 = arith.extui %388 : vector<8x1xi1> to vector<8x1xi32>
    %390 = arith.sitofp %389 : vector<8x1xi32> to vector<8x1xf32>
    %391 = arith.mulf %386, %390 : vector<8x1xf32>
    %392 = arith.addf %314, %391 : vector<8x1xf32>
    %393 = vector.extract_strided_slice %367 {offsets = [0, 64], sizes = [8, 64], strides = [1, 1]} : vector<8x128xf32> to vector<8x64xf32>
    %cst_102 = arith.constant dense<0xFF800000> : vector<8xf32>
    %394 = vector.multi_reduction <maximumf>, %393, %cst_102 [1] : vector<8x64xf32> to vector<8xf32>
    %395 = vector.shape_cast %394 : vector<8xf32> to vector<8x1xf32>
    %396 = vector.broadcast %395 : vector<8x1xf32> to vector<8x64xf32>
    %397 = arith.subf %393, %396 : vector<8x64xf32>
    %398 = math.exp %397 : vector<8x64xf32>
    %cst_103 = arith.constant dense<0.000000e+00> : vector<8xf32>
    %399 = vector.multi_reduction <add>, %398, %cst_103 [1] : vector<8x64xf32> to vector<8xf32>
    %400 = vector.shape_cast %399 : vector<8xf32> to vector<8x1xf32>
    %401 = math.log %400 : vector<8x1xf32>
    %402 = arith.addf %395, %401 : vector<8x1xf32>
    %403 = vector.broadcast %369 : vector<8x1xi32> to vector<8x64xi32>
    %404 = arith.cmpi eq, %309, %403 : vector<8x64xi32>
    %cst_104 = arith.constant 0.000000e+00 : f32
    %405 = vector.broadcast %cst_104 : f32 to vector<8x64xf32>
    %406 = arith.select %404, %393, %405 : vector<8x64xi1>, vector<8x64xf32>
    %cst_105 = arith.constant dense<0.000000e+00> : vector<8xf32>
    %407 = vector.multi_reduction <add>, %406, %cst_105 [1] : vector<8x64xf32> to vector<8xf32>
    %408 = vector.shape_cast %407 : vector<8xf32> to vector<8x1xf32>
    %409 = arith.subf %408, %402 : vector<8x1xf32>
    %c0_i32_106 = arith.constant 0 : i32
    %410 = vector.broadcast %c0_i32_106 : i32 to vector<8x1xi32>
    %411 = arith.cmpi ne, %369, %410 : vector<8x1xi32>
    %412 = arith.extui %411 : vector<8x1xi1> to vector<8x1xi32>
    %413 = arith.sitofp %412 : vector<8x1xi32> to vector<8x1xf32>
    %414 = arith.mulf %409, %413 : vector<8x1xf32>
    %415 = arith.addf %392, %414 : vector<8x1xf32>
    %416 = vector.extract_strided_slice %18 {offsets = [8, 0], sizes = [8, 128], strides = [1, 1]} : vector<64x128xf32> to vector<8x128xf32>
    %417 = arith.truncf %361 : vector<8x32xf32> to vector<8x32xbf16>
    %cst_107 = arith.constant dense<0.000000e+00> : vector<8x128xf32>
    %418 = tpu.matmul %417, %2, %cst_107 {dimension_numbers = #tpu.dot_dimension_numbers<[1], [0], [0], [1], [0, 0, 1, 1], [], []>} : vector<8x32xbf16>, vector<32x128xbf16>, vector<8x128xf32> -> vector<8x128xf32>
    %419 = arith.addf %416, %418 : vector<8x128xf32>
    %420 = arith.truncf %340 : vector<8x32xf32> to vector<8x32xbf16>
    %cst_108 = arith.constant dense<0.000000e+00> : vector<8x128xf32>
    %421 = tpu.matmul %420, %3, %cst_108 {dimension_numbers = #tpu.dot_dimension_numbers<[1], [0], [0], [1], [0, 0, 1, 1], [], []>} : vector<8x32xbf16>, vector<32x128xbf16>, vector<8x128xf32> -> vector<8x128xf32>
    %422 = arith.addf %419, %421 : vector<8x128xf32>
    %423 = vector.broadcast %27 : vector<1x128xf32> to vector<8x128xf32>
    %424 = arith.mulf %422, %423 : vector<8x128xf32>
    %425 = math.tanh %424 : vector<8x128xf32>
    %cst_109 = arith.constant 5.000000e-01 : f32
    %426 = vector.broadcast %cst_109 : f32 to vector<8x128xf32>
    %427 = arith.mulf %426, %425 : vector<8x128xf32>
    %cst_110 = arith.constant 5.000000e-01 : f32
    %428 = vector.broadcast %cst_110 : f32 to vector<8x128xf32>
    %429 = arith.addf %427, %428 : vector<8x128xf32>
    %430 = vector.shape_cast %24 : vector<1x128xi1> to vector<1x128xi1>
    %431 = vector.broadcast %430 : vector<1x128xi1> to vector<8x128xi1>
    %432 = arith.select %431, %425, %429 : vector<8x128xi1>, vector<8x128xf32>
    %433 = vector.extract_strided_slice %432 {offsets = [0, 0], sizes = [8, 32], strides = [1, 1]} : vector<8x128xf32> to vector<8x32xf32>
    %434 = vector.extract_strided_slice %432 {offsets = [0, 32], sizes = [8, 32], strides = [1, 1]} : vector<8x128xf32> to vector<8x32xf32>
    %435 = vector.extract_strided_slice %432 {offsets = [0, 64], sizes = [8, 32], strides = [1, 1]} : vector<8x128xf32> to vector<8x32xf32>
    %436 = vector.extract_strided_slice %432 {offsets = [0, 96], sizes = [8, 32], strides = [1, 1]} : vector<8x128xf32> to vector<8x32xf32>
    %437 = arith.mulf %434, %338 : vector<8x32xf32>
    %438 = arith.mulf %433, %435 : vector<8x32xf32>
    %439 = arith.addf %437, %438 : vector<8x32xf32>
    %440 = math.tanh %439 : vector<8x32xf32>
    %441 = arith.mulf %436, %440 : vector<8x32xf32>
    %442 = arith.truncf %441 : vector<8x32xf32> to vector<8x32xbf16>
    %cst_111 = arith.constant dense<0.000000e+00> : vector<8x64xf32>
    %443 = tpu.matmul %442, %294, %cst_111 {dimension_numbers = #tpu.dot_dimension_numbers<[1], [1], [0], [0], [0, 0, 1, 0], [], []>} : vector<8x32xbf16>, vector<64x32xbf16>, vector<8x64xf32> -> vector<8x64xf32>
    %cst_112 = arith.constant -1.000000e+30 : f32
    %444 = vector.broadcast %cst_112 : f32 to vector<8x64xf32>
    %445 = arith.select %299, %443, %444 : vector<8x64xi1>, vector<8x64xf32>
    %cst_113 = arith.constant dense<0xFF800000> : vector<8xf32>
    %446 = vector.multi_reduction <maximumf>, %445, %cst_113 [1] : vector<8x64xf32> to vector<8xf32>
    %447 = vector.shape_cast %446 : vector<8xf32> to vector<8x1xf32>
    %448 = vector.broadcast %447 : vector<8x1xf32> to vector<8x64xf32>
    %449 = arith.subf %445, %448 : vector<8x64xf32>
    %450 = math.exp %449 : vector<8x64xf32>
    %cst_114 = arith.constant dense<0.000000e+00> : vector<8xf32>
    %451 = vector.multi_reduction <add>, %450, %cst_114 [1] : vector<8x64xf32> to vector<8xf32>
    %452 = vector.shape_cast %451 : vector<8xf32> to vector<8x1xf32>
    %453 = tpu.reciprocal %452 {approx = true} : vector<8x1xf32> -> vector<8x1xf32>
    %454 = vector.broadcast %453 : vector<8x1xf32> to vector<8x64xf32>
    %455 = arith.mulf %450, %454 : vector<8x64xf32>
    %456 = arith.truncf %455 : vector<8x64xf32> to vector<8x64xbf16>
    %cst_115 = arith.constant dense<0.000000e+00> : vector<8x64xf32>
    %457 = tpu.matmul %456, %292, %cst_115 {dimension_numbers = #tpu.dot_dimension_numbers<[1], [0], [0], [1], [0, 0, 1, 1], [], []>} : vector<8x64xbf16>, vector<64x64xbf16>, vector<8x64xf32> -> vector<8x64xf32>
    %cst_116 = arith.constant dense<0.000000e+00> : vector<8x32xf32>
    %458 = tpu.matmul %442, %8, %cst_116 {dimension_numbers = #tpu.dot_dimension_numbers<[1], [0], [0], [1], [0, 0, 1, 1], [], []>} : vector<8x32xbf16>, vector<32x32xbf16>, vector<8x32xf32> -> vector<8x32xf32>
    %459 = arith.truncf %457 : vector<8x64xf32> to vector<8x64xbf16>
    %cst_117 = arith.constant dense<0.000000e+00> : vector<8x32xf32>
    %460 = tpu.matmul %459, %9, %cst_117 {dimension_numbers = #tpu.dot_dimension_numbers<[1], [0], [0], [1], [0, 0, 1, 1], [], []>} : vector<8x64xbf16>, vector<64x32xbf16>, vector<8x32xf32> -> vector<8x32xf32>
    %461 = arith.addf %458, %460 : vector<8x32xf32>
    %462 = math.tanh %461 : vector<8x32xf32>
    %463 = arith.truncf %462 : vector<8x32xf32> to vector<8x32xbf16>
    %cst_118 = arith.constant dense<0.000000e+00> : vector<8x128xf32>
    %464 = tpu.matmul %463, %4, %cst_118 {dimension_numbers = #tpu.dot_dimension_numbers<[1], [0], [0], [1], [0, 0, 1, 1], [], []>} : vector<8x32xbf16>, vector<32x128xbf16>, vector<8x128xf32> -> vector<8x128xf32>
    %cst_119 = arith.constant -1.000000e+30 : f32
    %465 = vector.shape_cast %308 : vector<1x128xi1> to vector<1x128xi1>
    %466 = vector.broadcast %465 : vector<1x128xi1> to vector<8x128xi1>
    %467 = vector.broadcast %cst_119 : f32 to vector<8x128xf32>
    %468 = arith.select %466, %467, %464 : vector<8x128xi1>, vector<8x128xf32>
    %469 = vector.extract_strided_slice %311 {offsets = [8, 0], sizes = [8, 1], strides = [1, 1]} : vector<64x1xi32> to vector<8x1xi32>
    %470 = vector.extract_strided_slice %312 {offsets = [8, 0], sizes = [8, 1], strides = [1, 1]} : vector<64x1xi32> to vector<8x1xi32>
    %471 = vector.extract_strided_slice %468 {offsets = [0, 0], sizes = [8, 64], strides = [1, 1]} : vector<8x128xf32> to vector<8x64xf32>
    %cst_120 = arith.constant dense<0xFF800000> : vector<8xf32>
    %472 = vector.multi_reduction <maximumf>, %471, %cst_120 [1] : vector<8x64xf32> to vector<8xf32>
    %473 = vector.shape_cast %472 : vector<8xf32> to vector<8x1xf32>
    %474 = vector.broadcast %473 : vector<8x1xf32> to vector<8x64xf32>
    %475 = arith.subf %471, %474 : vector<8x64xf32>
    %476 = math.exp %475 : vector<8x64xf32>
    %cst_121 = arith.constant dense<0.000000e+00> : vector<8xf32>
    %477 = vector.multi_reduction <add>, %476, %cst_121 [1] : vector<8x64xf32> to vector<8xf32>
    %478 = vector.shape_cast %477 : vector<8xf32> to vector<8x1xf32>
    %479 = math.log %478 : vector<8x1xf32>
    %480 = arith.addf %473, %479 : vector<8x1xf32>
    %481 = vector.broadcast %469 : vector<8x1xi32> to vector<8x64xi32>
    %482 = arith.cmpi eq, %309, %481 : vector<8x64xi32>
    %cst_122 = arith.constant 0.000000e+00 : f32
    %483 = vector.broadcast %cst_122 : f32 to vector<8x64xf32>
    %484 = arith.select %482, %471, %483 : vector<8x64xi1>, vector<8x64xf32>
    %cst_123 = arith.constant dense<0.000000e+00> : vector<8xf32>
    %485 = vector.multi_reduction <add>, %484, %cst_123 [1] : vector<8x64xf32> to vector<8xf32>
    %486 = vector.shape_cast %485 : vector<8xf32> to vector<8x1xf32>
    %487 = arith.subf %486, %480 : vector<8x1xf32>
    %c0_i32_124 = arith.constant 0 : i32
    %488 = vector.broadcast %c0_i32_124 : i32 to vector<8x1xi32>
    %489 = arith.cmpi ne, %469, %488 : vector<8x1xi32>
    %490 = arith.extui %489 : vector<8x1xi1> to vector<8x1xi32>
    %491 = arith.sitofp %490 : vector<8x1xi32> to vector<8x1xf32>
    %492 = arith.mulf %487, %491 : vector<8x1xf32>
    %493 = arith.addf %415, %492 : vector<8x1xf32>
    %494 = vector.extract_strided_slice %468 {offsets = [0, 64], sizes = [8, 64], strides = [1, 1]} : vector<8x128xf32> to vector<8x64xf32>
    %cst_125 = arith.constant dense<0xFF800000> : vector<8xf32>
    %495 = vector.multi_reduction <maximumf>, %494, %cst_125 [1] : vector<8x64xf32> to vector<8xf32>
    %496 = vector.shape_cast %495 : vector<8xf32> to vector<8x1xf32>
    %497 = vector.broadcast %496 : vector<8x1xf32> to vector<8x64xf32>
    %498 = arith.subf %494, %497 : vector<8x64xf32>
    %499 = math.exp %498 : vector<8x64xf32>
    %cst_126 = arith.constant dense<0.000000e+00> : vector<8xf32>
    %500 = vector.multi_reduction <add>, %499, %cst_126 [1] : vector<8x64xf32> to vector<8xf32>
    %501 = vector.shape_cast %500 : vector<8xf32> to vector<8x1xf32>
    %502 = math.log %501 : vector<8x1xf32>
    %503 = arith.addf %496, %502 : vector<8x1xf32>
    %504 = vector.broadcast %470 : vector<8x1xi32> to vector<8x64xi32>
    %505 = arith.cmpi eq, %309, %504 : vector<8x64xi32>
    %cst_127 = arith.constant 0.000000e+00 : f32
    %506 = vector.broadcast %cst_127 : f32 to vector<8x64xf32>
    %507 = arith.select %505, %494, %506 : vector<8x64xi1>, vector<8x64xf32>
    %cst_128 = arith.constant dense<0.000000e+00> : vector<8xf32>
    %508 = vector.multi_reduction <add>, %507, %cst_128 [1] : vector<8x64xf32> to vector<8xf32>
    %509 = vector.shape_cast %508 : vector<8xf32> to vector<8x1xf32>
    %510 = arith.subf %509, %503 : vector<8x1xf32>
    %c0_i32_129 = arith.constant 0 : i32
    %511 = vector.broadcast %c0_i32_129 : i32 to vector<8x1xi32>
    %512 = arith.cmpi ne, %470, %511 : vector<8x1xi32>
    %513 = arith.extui %512 : vector<8x1xi1> to vector<8x1xi32>
    %514 = arith.sitofp %513 : vector<8x1xi32> to vector<8x1xf32>
    %515 = arith.mulf %510, %514 : vector<8x1xf32>
    %516 = arith.addf %493, %515 : vector<8x1xf32>
    %517 = vector.extract_strided_slice %18 {offsets = [16, 0], sizes = [8, 128], strides = [1, 1]} : vector<64x128xf32> to vector<8x128xf32>
    %518 = arith.truncf %462 : vector<8x32xf32> to vector<8x32xbf16>
    %cst_130 = arith.constant dense<0.000000e+00> : vector<8x128xf32>
    %519 = tpu.matmul %518, %2, %cst_130 {dimension_numbers = #tpu.dot_dimension_numbers<[1], [0], [0], [1], [0, 0, 1, 1], [], []>} : vector<8x32xbf16>, vector<32x128xbf16>, vector<8x128xf32> -> vector<8x128xf32>
    %520 = arith.addf %517, %519 : vector<8x128xf32>
    %521 = arith.truncf %441 : vector<8x32xf32> to vector<8x32xbf16>
    %cst_131 = arith.constant dense<0.000000e+00> : vector<8x128xf32>
    %522 = tpu.matmul %521, %3, %cst_131 {dimension_numbers = #tpu.dot_dimension_numbers<[1], [0], [0], [1], [0, 0, 1, 1], [], []>} : vector<8x32xbf16>, vector<32x128xbf16>, vector<8x128xf32> -> vector<8x128xf32>
    %523 = arith.addf %520, %522 : vector<8x128xf32>
    %524 = vector.broadcast %27 : vector<1x128xf32> to vector<8x128xf32>
    %525 = arith.mulf %523, %524 : vector<8x128xf32>
    %526 = math.tanh %525 : vector<8x128xf32>
    %cst_132 = arith.constant 5.000000e-01 : f32
    %527 = vector.broadcast %cst_132 : f32 to vector<8x128xf32>
    %528 = arith.mulf %527, %526 : vector<8x128xf32>
    %cst_133 = arith.constant 5.000000e-01 : f32
    %529 = vector.broadcast %cst_133 : f32 to vector<8x128xf32>
    %530 = arith.addf %528, %529 : vector<8x128xf32>
    %531 = vector.shape_cast %24 : vector<1x128xi1> to vector<1x128xi1>
    %532 = vector.broadcast %531 : vector<1x128xi1> to vector<8x128xi1>
    %533 = arith.select %532, %526, %530 : vector<8x128xi1>, vector<8x128xf32>
    %534 = vector.extract_strided_slice %533 {offsets = [0, 0], sizes = [8, 32], strides = [1, 1]} : vector<8x128xf32> to vector<8x32xf32>
    %535 = vector.extract_strided_slice %533 {offsets = [0, 32], sizes = [8, 32], strides = [1, 1]} : vector<8x128xf32> to vector<8x32xf32>
    %536 = vector.extract_strided_slice %533 {offsets = [0, 64], sizes = [8, 32], strides = [1, 1]} : vector<8x128xf32> to vector<8x32xf32>
    %537 = vector.extract_strided_slice %533 {offsets = [0, 96], sizes = [8, 32], strides = [1, 1]} : vector<8x128xf32> to vector<8x32xf32>
    %538 = arith.mulf %535, %439 : vector<8x32xf32>
    %539 = arith.mulf %534, %536 : vector<8x32xf32>
    %540 = arith.addf %538, %539 : vector<8x32xf32>
    %541 = math.tanh %540 : vector<8x32xf32>
    %542 = arith.mulf %537, %541 : vector<8x32xf32>
    %543 = arith.truncf %542 : vector<8x32xf32> to vector<8x32xbf16>
    %cst_134 = arith.constant dense<0.000000e+00> : vector<8x64xf32>
    %544 = tpu.matmul %543, %294, %cst_134 {dimension_numbers = #tpu.dot_dimension_numbers<[1], [1], [0], [0], [0, 0, 1, 0], [], []>} : vector<8x32xbf16>, vector<64x32xbf16>, vector<8x64xf32> -> vector<8x64xf32>
    %cst_135 = arith.constant -1.000000e+30 : f32
    %545 = vector.broadcast %cst_135 : f32 to vector<8x64xf32>
    %546 = arith.select %299, %544, %545 : vector<8x64xi1>, vector<8x64xf32>
    %cst_136 = arith.constant dense<0xFF800000> : vector<8xf32>
    %547 = vector.multi_reduction <maximumf>, %546, %cst_136 [1] : vector<8x64xf32> to vector<8xf32>
    %548 = vector.shape_cast %547 : vector<8xf32> to vector<8x1xf32>
    %549 = vector.broadcast %548 : vector<8x1xf32> to vector<8x64xf32>
    %550 = arith.subf %546, %549 : vector<8x64xf32>
    %551 = math.exp %550 : vector<8x64xf32>
    %cst_137 = arith.constant dense<0.000000e+00> : vector<8xf32>
    %552 = vector.multi_reduction <add>, %551, %cst_137 [1] : vector<8x64xf32> to vector<8xf32>
    %553 = vector.shape_cast %552 : vector<8xf32> to vector<8x1xf32>
    %554 = tpu.reciprocal %553 {approx = true} : vector<8x1xf32> -> vector<8x1xf32>
    %555 = vector.broadcast %554 : vector<8x1xf32> to vector<8x64xf32>
    %556 = arith.mulf %551, %555 : vector<8x64xf32>
    %557 = arith.truncf %556 : vector<8x64xf32> to vector<8x64xbf16>
    %cst_138 = arith.constant dense<0.000000e+00> : vector<8x64xf32>
    %558 = tpu.matmul %557, %292, %cst_138 {dimension_numbers = #tpu.dot_dimension_numbers<[1], [0], [0], [1], [0, 0, 1, 1], [], []>} : vector<8x64xbf16>, vector<64x64xbf16>, vector<8x64xf32> -> vector<8x64xf32>
    %cst_139 = arith.constant dense<0.000000e+00> : vector<8x32xf32>
    %559 = tpu.matmul %543, %8, %cst_139 {dimension_numbers = #tpu.dot_dimension_numbers<[1], [0], [0], [1], [0, 0, 1, 1], [], []>} : vector<8x32xbf16>, vector<32x32xbf16>, vector<8x32xf32> -> vector<8x32xf32>
    %560 = arith.truncf %558 : vector<8x64xf32> to vector<8x64xbf16>
    %cst_140 = arith.constant dense<0.000000e+00> : vector<8x32xf32>
    %561 = tpu.matmul %560, %9, %cst_140 {dimension_numbers = #tpu.dot_dimension_numbers<[1], [0], [0], [1], [0, 0, 1, 1], [], []>} : vector<8x64xbf16>, vector<64x32xbf16>, vector<8x32xf32> -> vector<8x32xf32>
    %562 = arith.addf %559, %561 : vector<8x32xf32>
    %563 = math.tanh %562 : vector<8x32xf32>
    %564 = arith.truncf %563 : vector<8x32xf32> to vector<8x32xbf16>
    %cst_141 = arith.constant dense<0.000000e+00> : vector<8x128xf32>
    %565 = tpu.matmul %564, %4, %cst_141 {dimension_numbers = #tpu.dot_dimension_numbers<[1], [0], [0], [1], [0, 0, 1, 1], [], []>} : vector<8x32xbf16>, vector<32x128xbf16>, vector<8x128xf32> -> vector<8x128xf32>
    %cst_142 = arith.constant -1.000000e+30 : f32
    %566 = vector.shape_cast %308 : vector<1x128xi1> to vector<1x128xi1>
    %567 = vector.broadcast %566 : vector<1x128xi1> to vector<8x128xi1>
    %568 = vector.broadcast %cst_142 : f32 to vector<8x128xf32>
    %569 = arith.select %567, %568, %565 : vector<8x128xi1>, vector<8x128xf32>
    %570 = vector.extract_strided_slice %311 {offsets = [16, 0], sizes = [8, 1], strides = [1, 1]} : vector<64x1xi32> to vector<8x1xi32>
    %571 = vector.extract_strided_slice %312 {offsets = [16, 0], sizes = [8, 1], strides = [1, 1]} : vector<64x1xi32> to vector<8x1xi32>
    %572 = vector.extract_strided_slice %569 {offsets = [0, 0], sizes = [8, 64], strides = [1, 1]} : vector<8x128xf32> to vector<8x64xf32>
    %cst_143 = arith.constant dense<0xFF800000> : vector<8xf32>
    %573 = vector.multi_reduction <maximumf>, %572, %cst_143 [1] : vector<8x64xf32> to vector<8xf32>
    %574 = vector.shape_cast %573 : vector<8xf32> to vector<8x1xf32>
    %575 = vector.broadcast %574 : vector<8x1xf32> to vector<8x64xf32>
    %576 = arith.subf %572, %575 : vector<8x64xf32>
    %577 = math.exp %576 : vector<8x64xf32>
    %cst_144 = arith.constant dense<0.000000e+00> : vector<8xf32>
    %578 = vector.multi_reduction <add>, %577, %cst_144 [1] : vector<8x64xf32> to vector<8xf32>
    %579 = vector.shape_cast %578 : vector<8xf32> to vector<8x1xf32>
    %580 = math.log %579 : vector<8x1xf32>
    %581 = arith.addf %574, %580 : vector<8x1xf32>
    %582 = vector.broadcast %570 : vector<8x1xi32> to vector<8x64xi32>
    %583 = arith.cmpi eq, %309, %582 : vector<8x64xi32>
    %cst_145 = arith.constant 0.000000e+00 : f32
    %584 = vector.broadcast %cst_145 : f32 to vector<8x64xf32>
    %585 = arith.select %583, %572, %584 : vector<8x64xi1>, vector<8x64xf32>
    %cst_146 = arith.constant dense<0.000000e+00> : vector<8xf32>
    %586 = vector.multi_reduction <add>, %585, %cst_146 [1] : vector<8x64xf32> to vector<8xf32>
    %587 = vector.shape_cast %586 : vector<8xf32> to vector<8x1xf32>
    %588 = arith.subf %587, %581 : vector<8x1xf32>
    %c0_i32_147 = arith.constant 0 : i32
    %589 = vector.broadcast %c0_i32_147 : i32 to vector<8x1xi32>
    %590 = arith.cmpi ne, %570, %589 : vector<8x1xi32>
    %591 = arith.extui %590 : vector<8x1xi1> to vector<8x1xi32>
    %592 = arith.sitofp %591 : vector<8x1xi32> to vector<8x1xf32>
    %593 = arith.mulf %588, %592 : vector<8x1xf32>
    %594 = arith.addf %516, %593 : vector<8x1xf32>
    %595 = vector.extract_strided_slice %569 {offsets = [0, 64], sizes = [8, 64], strides = [1, 1]} : vector<8x128xf32> to vector<8x64xf32>
    %cst_148 = arith.constant dense<0xFF800000> : vector<8xf32>
    %596 = vector.multi_reduction <maximumf>, %595, %cst_148 [1] : vector<8x64xf32> to vector<8xf32>
    %597 = vector.shape_cast %596 : vector<8xf32> to vector<8x1xf32>
    %598 = vector.broadcast %597 : vector<8x1xf32> to vector<8x64xf32>
    %599 = arith.subf %595, %598 : vector<8x64xf32>
    %600 = math.exp %599 : vector<8x64xf32>
    %cst_149 = arith.constant dense<0.000000e+00> : vector<8xf32>
    %601 = vector.multi_reduction <add>, %600, %cst_149 [1] : vector<8x64xf32> to vector<8xf32>
    %602 = vector.shape_cast %601 : vector<8xf32> to vector<8x1xf32>
    %603 = math.log %602 : vector<8x1xf32>
    %604 = arith.addf %597, %603 : vector<8x1xf32>
    %605 = vector.broadcast %571 : vector<8x1xi32> to vector<8x64xi32>
    %606 = arith.cmpi eq, %309, %605 : vector<8x64xi32>
    %cst_150 = arith.constant 0.000000e+00 : f32
    %607 = vector.broadcast %cst_150 : f32 to vector<8x64xf32>
    %608 = arith.select %606, %595, %607 : vector<8x64xi1>, vector<8x64xf32>
    %cst_151 = arith.constant dense<0.000000e+00> : vector<8xf32>
    %609 = vector.multi_reduction <add>, %608, %cst_151 [1] : vector<8x64xf32> to vector<8xf32>
    %610 = vector.shape_cast %609 : vector<8xf32> to vector<8x1xf32>
    %611 = arith.subf %610, %604 : vector<8x1xf32>
    %c0_i32_152 = arith.constant 0 : i32
    %612 = vector.broadcast %c0_i32_152 : i32 to vector<8x1xi32>
    %613 = arith.cmpi ne, %571, %612 : vector<8x1xi32>
    %614 = arith.extui %613 : vector<8x1xi1> to vector<8x1xi32>
    %615 = arith.sitofp %614 : vector<8x1xi32> to vector<8x1xf32>
    %616 = arith.mulf %611, %615 : vector<8x1xf32>
    %617 = arith.addf %594, %616 : vector<8x1xf32>
    %618 = vector.extract_strided_slice %18 {offsets = [24, 0], sizes = [8, 128], strides = [1, 1]} : vector<64x128xf32> to vector<8x128xf32>
    %619 = arith.truncf %563 : vector<8x32xf32> to vector<8x32xbf16>
    %cst_153 = arith.constant dense<0.000000e+00> : vector<8x128xf32>
    %620 = tpu.matmul %619, %2, %cst_153 {dimension_numbers = #tpu.dot_dimension_numbers<[1], [0], [0], [1], [0, 0, 1, 1], [], []>} : vector<8x32xbf16>, vector<32x128xbf16>, vector<8x128xf32> -> vector<8x128xf32>
    %621 = arith.addf %618, %620 : vector<8x128xf32>
    %622 = arith.truncf %542 : vector<8x32xf32> to vector<8x32xbf16>
    %cst_154 = arith.constant dense<0.000000e+00> : vector<8x128xf32>
    %623 = tpu.matmul %622, %3, %cst_154 {dimension_numbers = #tpu.dot_dimension_numbers<[1], [0], [0], [1], [0, 0, 1, 1], [], []>} : vector<8x32xbf16>, vector<32x128xbf16>, vector<8x128xf32> -> vector<8x128xf32>
    %624 = arith.addf %621, %623 : vector<8x128xf32>
    %625 = vector.broadcast %27 : vector<1x128xf32> to vector<8x128xf32>
    %626 = arith.mulf %624, %625 : vector<8x128xf32>
    %627 = math.tanh %626 : vector<8x128xf32>
    %cst_155 = arith.constant 5.000000e-01 : f32
    %628 = vector.broadcast %cst_155 : f32 to vector<8x128xf32>
    %629 = arith.mulf %628, %627 : vector<8x128xf32>
    %cst_156 = arith.constant 5.000000e-01 : f32
    %630 = vector.broadcast %cst_156 : f32 to vector<8x128xf32>
    %631 = arith.addf %629, %630 : vector<8x128xf32>
    %632 = vector.shape_cast %24 : vector<1x128xi1> to vector<1x128xi1>
    %633 = vector.broadcast %632 : vector<1x128xi1> to vector<8x128xi1>
    %634 = arith.select %633, %627, %631 : vector<8x128xi1>, vector<8x128xf32>
    %635 = vector.extract_strided_slice %634 {offsets = [0, 0], sizes = [8, 32], strides = [1, 1]} : vector<8x128xf32> to vector<8x32xf32>
    %636 = vector.extract_strided_slice %634 {offsets = [0, 32], sizes = [8, 32], strides = [1, 1]} : vector<8x128xf32> to vector<8x32xf32>
    %637 = vector.extract_strided_slice %634 {offsets = [0, 64], sizes = [8, 32], strides = [1, 1]} : vector<8x128xf32> to vector<8x32xf32>
    %638 = vector.extract_strided_slice %634 {offsets = [0, 96], sizes = [8, 32], strides = [1, 1]} : vector<8x128xf32> to vector<8x32xf32>
    %639 = arith.mulf %636, %540 : vector<8x32xf32>
    %640 = arith.mulf %635, %637 : vector<8x32xf32>
    %641 = arith.addf %639, %640 : vector<8x32xf32>
    %642 = math.tanh %641 : vector<8x32xf32>
    %643 = arith.mulf %638, %642 : vector<8x32xf32>
    %644 = arith.truncf %643 : vector<8x32xf32> to vector<8x32xbf16>
    %cst_157 = arith.constant dense<0.000000e+00> : vector<8x64xf32>
    %645 = tpu.matmul %644, %294, %cst_157 {dimension_numbers = #tpu.dot_dimension_numbers<[1], [1], [0], [0], [0, 0, 1, 0], [], []>} : vector<8x32xbf16>, vector<64x32xbf16>, vector<8x64xf32> -> vector<8x64xf32>
    %cst_158 = arith.constant -1.000000e+30 : f32
    %646 = vector.broadcast %cst_158 : f32 to vector<8x64xf32>
    %647 = arith.select %299, %645, %646 : vector<8x64xi1>, vector<8x64xf32>
    %cst_159 = arith.constant dense<0xFF800000> : vector<8xf32>
    %648 = vector.multi_reduction <maximumf>, %647, %cst_159 [1] : vector<8x64xf32> to vector<8xf32>
    %649 = vector.shape_cast %648 : vector<8xf32> to vector<8x1xf32>
    %650 = vector.broadcast %649 : vector<8x1xf32> to vector<8x64xf32>
    %651 = arith.subf %647, %650 : vector<8x64xf32>
    %652 = math.exp %651 : vector<8x64xf32>
    %cst_160 = arith.constant dense<0.000000e+00> : vector<8xf32>
    %653 = vector.multi_reduction <add>, %652, %cst_160 [1] : vector<8x64xf32> to vector<8xf32>
    %654 = vector.shape_cast %653 : vector<8xf32> to vector<8x1xf32>
    %655 = tpu.reciprocal %654 {approx = true} : vector<8x1xf32> -> vector<8x1xf32>
    %656 = vector.broadcast %655 : vector<8x1xf32> to vector<8x64xf32>
    %657 = arith.mulf %652, %656 : vector<8x64xf32>
    %658 = arith.truncf %657 : vector<8x64xf32> to vector<8x64xbf16>
    %cst_161 = arith.constant dense<0.000000e+00> : vector<8x64xf32>
    %659 = tpu.matmul %658, %292, %cst_161 {dimension_numbers = #tpu.dot_dimension_numbers<[1], [0], [0], [1], [0, 0, 1, 1], [], []>} : vector<8x64xbf16>, vector<64x64xbf16>, vector<8x64xf32> -> vector<8x64xf32>
    %cst_162 = arith.constant dense<0.000000e+00> : vector<8x32xf32>
    %660 = tpu.matmul %644, %8, %cst_162 {dimension_numbers = #tpu.dot_dimension_numbers<[1], [0], [0], [1], [0, 0, 1, 1], [], []>} : vector<8x32xbf16>, vector<32x32xbf16>, vector<8x32xf32> -> vector<8x32xf32>
    %661 = arith.truncf %659 : vector<8x64xf32> to vector<8x64xbf16>
    %cst_163 = arith.constant dense<0.000000e+00> : vector<8x32xf32>
    %662 = tpu.matmul %661, %9, %cst_163 {dimension_numbers = #tpu.dot_dimension_numbers<[1], [0], [0], [1], [0, 0, 1, 1], [], []>} : vector<8x64xbf16>, vector<64x32xbf16>, vector<8x32xf32> -> vector<8x32xf32>
    %663 = arith.addf %660, %662 : vector<8x32xf32>
    %664 = math.tanh %663 : vector<8x32xf32>
    %665 = arith.truncf %664 : vector<8x32xf32> to vector<8x32xbf16>
    %cst_164 = arith.constant dense<0.000000e+00> : vector<8x128xf32>
    %666 = tpu.matmul %665, %4, %cst_164 {dimension_numbers = #tpu.dot_dimension_numbers<[1], [0], [0], [1], [0, 0, 1, 1], [], []>} : vector<8x32xbf16>, vector<32x128xbf16>, vector<8x128xf32> -> vector<8x128xf32>
    %cst_165 = arith.constant -1.000000e+30 : f32
    %667 = vector.shape_cast %308 : vector<1x128xi1> to vector<1x128xi1>
    %668 = vector.broadcast %667 : vector<1x128xi1> to vector<8x128xi1>
    %669 = vector.broadcast %cst_165 : f32 to vector<8x128xf32>
    %670 = arith.select %668, %669, %666 : vector<8x128xi1>, vector<8x128xf32>
    %671 = vector.extract_strided_slice %311 {offsets = [24, 0], sizes = [8, 1], strides = [1, 1]} : vector<64x1xi32> to vector<8x1xi32>
    %672 = vector.extract_strided_slice %312 {offsets = [24, 0], sizes = [8, 1], strides = [1, 1]} : vector<64x1xi32> to vector<8x1xi32>
    %673 = vector.extract_strided_slice %670 {offsets = [0, 0], sizes = [8, 64], strides = [1, 1]} : vector<8x128xf32> to vector<8x64xf32>
    %cst_166 = arith.constant dense<0xFF800000> : vector<8xf32>
    %674 = vector.multi_reduction <maximumf>, %673, %cst_166 [1] : vector<8x64xf32> to vector<8xf32>
    %675 = vector.shape_cast %674 : vector<8xf32> to vector<8x1xf32>
    %676 = vector.broadcast %675 : vector<8x1xf32> to vector<8x64xf32>
    %677 = arith.subf %673, %676 : vector<8x64xf32>
    %678 = math.exp %677 : vector<8x64xf32>
    %cst_167 = arith.constant dense<0.000000e+00> : vector<8xf32>
    %679 = vector.multi_reduction <add>, %678, %cst_167 [1] : vector<8x64xf32> to vector<8xf32>
    %680 = vector.shape_cast %679 : vector<8xf32> to vector<8x1xf32>
    %681 = math.log %680 : vector<8x1xf32>
    %682 = arith.addf %675, %681 : vector<8x1xf32>
    %683 = vector.broadcast %671 : vector<8x1xi32> to vector<8x64xi32>
    %684 = arith.cmpi eq, %309, %683 : vector<8x64xi32>
    %cst_168 = arith.constant 0.000000e+00 : f32
    %685 = vector.broadcast %cst_168 : f32 to vector<8x64xf32>
    %686 = arith.select %684, %673, %685 : vector<8x64xi1>, vector<8x64xf32>
    %cst_169 = arith.constant dense<0.000000e+00> : vector<8xf32>
    %687 = vector.multi_reduction <add>, %686, %cst_169 [1] : vector<8x64xf32> to vector<8xf32>
    %688 = vector.shape_cast %687 : vector<8xf32> to vector<8x1xf32>
    %689 = arith.subf %688, %682 : vector<8x1xf32>
    %c0_i32_170 = arith.constant 0 : i32
    %690 = vector.broadcast %c0_i32_170 : i32 to vector<8x1xi32>
    %691 = arith.cmpi ne, %671, %690 : vector<8x1xi32>
    %692 = arith.extui %691 : vector<8x1xi1> to vector<8x1xi32>
    %693 = arith.sitofp %692 : vector<8x1xi32> to vector<8x1xf32>
    %694 = arith.mulf %689, %693 : vector<8x1xf32>
    %695 = arith.addf %617, %694 : vector<8x1xf32>
    %696 = vector.extract_strided_slice %670 {offsets = [0, 64], sizes = [8, 64], strides = [1, 1]} : vector<8x128xf32> to vector<8x64xf32>
    %cst_171 = arith.constant dense<0xFF800000> : vector<8xf32>
    %697 = vector.multi_reduction <maximumf>, %696, %cst_171 [1] : vector<8x64xf32> to vector<8xf32>
    %698 = vector.shape_cast %697 : vector<8xf32> to vector<8x1xf32>
    %699 = vector.broadcast %698 : vector<8x1xf32> to vector<8x64xf32>
    %700 = arith.subf %696, %699 : vector<8x64xf32>
    %701 = math.exp %700 : vector<8x64xf32>
    %cst_172 = arith.constant dense<0.000000e+00> : vector<8xf32>
    %702 = vector.multi_reduction <add>, %701, %cst_172 [1] : vector<8x64xf32> to vector<8xf32>
    %703 = vector.shape_cast %702 : vector<8xf32> to vector<8x1xf32>
    %704 = math.log %703 : vector<8x1xf32>
    %705 = arith.addf %698, %704 : vector<8x1xf32>
    %706 = vector.broadcast %672 : vector<8x1xi32> to vector<8x64xi32>
    %707 = arith.cmpi eq, %309, %706 : vector<8x64xi32>
    %cst_173 = arith.constant 0.000000e+00 : f32
    %708 = vector.broadcast %cst_173 : f32 to vector<8x64xf32>
    %709 = arith.select %707, %696, %708 : vector<8x64xi1>, vector<8x64xf32>
    %cst_174 = arith.constant dense<0.000000e+00> : vector<8xf32>
    %710 = vector.multi_reduction <add>, %709, %cst_174 [1] : vector<8x64xf32> to vector<8xf32>
    %711 = vector.shape_cast %710 : vector<8xf32> to vector<8x1xf32>
    %712 = arith.subf %711, %705 : vector<8x1xf32>
    %c0_i32_175 = arith.constant 0 : i32
    %713 = vector.broadcast %c0_i32_175 : i32 to vector<8x1xi32>
    %714 = arith.cmpi ne, %672, %713 : vector<8x1xi32>
    %715 = arith.extui %714 : vector<8x1xi1> to vector<8x1xi32>
    %716 = arith.sitofp %715 : vector<8x1xi32> to vector<8x1xf32>
    %717 = arith.mulf %712, %716 : vector<8x1xf32>
    %718 = arith.addf %695, %717 : vector<8x1xf32>
    %719 = vector.extract_strided_slice %18 {offsets = [32, 0], sizes = [8, 128], strides = [1, 1]} : vector<64x128xf32> to vector<8x128xf32>
    %720 = arith.truncf %664 : vector<8x32xf32> to vector<8x32xbf16>
    %cst_176 = arith.constant dense<0.000000e+00> : vector<8x128xf32>
    %721 = tpu.matmul %720, %2, %cst_176 {dimension_numbers = #tpu.dot_dimension_numbers<[1], [0], [0], [1], [0, 0, 1, 1], [], []>} : vector<8x32xbf16>, vector<32x128xbf16>, vector<8x128xf32> -> vector<8x128xf32>
    %722 = arith.addf %719, %721 : vector<8x128xf32>
    %723 = arith.truncf %643 : vector<8x32xf32> to vector<8x32xbf16>
    %cst_177 = arith.constant dense<0.000000e+00> : vector<8x128xf32>
    %724 = tpu.matmul %723, %3, %cst_177 {dimension_numbers = #tpu.dot_dimension_numbers<[1], [0], [0], [1], [0, 0, 1, 1], [], []>} : vector<8x32xbf16>, vector<32x128xbf16>, vector<8x128xf32> -> vector<8x128xf32>
    %725 = arith.addf %722, %724 : vector<8x128xf32>
    %726 = vector.broadcast %27 : vector<1x128xf32> to vector<8x128xf32>
    %727 = arith.mulf %725, %726 : vector<8x128xf32>
    %728 = math.tanh %727 : vector<8x128xf32>
    %cst_178 = arith.constant 5.000000e-01 : f32
    %729 = vector.broadcast %cst_178 : f32 to vector<8x128xf32>
    %730 = arith.mulf %729, %728 : vector<8x128xf32>
    %cst_179 = arith.constant 5.000000e-01 : f32
    %731 = vector.broadcast %cst_179 : f32 to vector<8x128xf32>
    %732 = arith.addf %730, %731 : vector<8x128xf32>
    %733 = vector.shape_cast %24 : vector<1x128xi1> to vector<1x128xi1>
    %734 = vector.broadcast %733 : vector<1x128xi1> to vector<8x128xi1>
    %735 = arith.select %734, %728, %732 : vector<8x128xi1>, vector<8x128xf32>
    %736 = vector.extract_strided_slice %735 {offsets = [0, 0], sizes = [8, 32], strides = [1, 1]} : vector<8x128xf32> to vector<8x32xf32>
    %737 = vector.extract_strided_slice %735 {offsets = [0, 32], sizes = [8, 32], strides = [1, 1]} : vector<8x128xf32> to vector<8x32xf32>
    %738 = vector.extract_strided_slice %735 {offsets = [0, 64], sizes = [8, 32], strides = [1, 1]} : vector<8x128xf32> to vector<8x32xf32>
    %739 = vector.extract_strided_slice %735 {offsets = [0, 96], sizes = [8, 32], strides = [1, 1]} : vector<8x128xf32> to vector<8x32xf32>
    %740 = arith.mulf %737, %641 : vector<8x32xf32>
    %741 = arith.mulf %736, %738 : vector<8x32xf32>
    %742 = arith.addf %740, %741 : vector<8x32xf32>
    %743 = math.tanh %742 : vector<8x32xf32>
    %744 = arith.mulf %739, %743 : vector<8x32xf32>
    %745 = arith.truncf %744 : vector<8x32xf32> to vector<8x32xbf16>
    %cst_180 = arith.constant dense<0.000000e+00> : vector<8x64xf32>
    %746 = tpu.matmul %745, %294, %cst_180 {dimension_numbers = #tpu.dot_dimension_numbers<[1], [1], [0], [0], [0, 0, 1, 0], [], []>} : vector<8x32xbf16>, vector<64x32xbf16>, vector<8x64xf32> -> vector<8x64xf32>
    %cst_181 = arith.constant -1.000000e+30 : f32
    %747 = vector.broadcast %cst_181 : f32 to vector<8x64xf32>
    %748 = arith.select %299, %746, %747 : vector<8x64xi1>, vector<8x64xf32>
    %cst_182 = arith.constant dense<0xFF800000> : vector<8xf32>
    %749 = vector.multi_reduction <maximumf>, %748, %cst_182 [1] : vector<8x64xf32> to vector<8xf32>
    %750 = vector.shape_cast %749 : vector<8xf32> to vector<8x1xf32>
    %751 = vector.broadcast %750 : vector<8x1xf32> to vector<8x64xf32>
    %752 = arith.subf %748, %751 : vector<8x64xf32>
    %753 = math.exp %752 : vector<8x64xf32>
    %cst_183 = arith.constant dense<0.000000e+00> : vector<8xf32>
    %754 = vector.multi_reduction <add>, %753, %cst_183 [1] : vector<8x64xf32> to vector<8xf32>
    %755 = vector.shape_cast %754 : vector<8xf32> to vector<8x1xf32>
    %756 = tpu.reciprocal %755 {approx = true} : vector<8x1xf32> -> vector<8x1xf32>
    %757 = vector.broadcast %756 : vector<8x1xf32> to vector<8x64xf32>
    %758 = arith.mulf %753, %757 : vector<8x64xf32>
    %759 = arith.truncf %758 : vector<8x64xf32> to vector<8x64xbf16>
    %cst_184 = arith.constant dense<0.000000e+00> : vector<8x64xf32>
    %760 = tpu.matmul %759, %292, %cst_184 {dimension_numbers = #tpu.dot_dimension_numbers<[1], [0], [0], [1], [0, 0, 1, 1], [], []>} : vector<8x64xbf16>, vector<64x64xbf16>, vector<8x64xf32> -> vector<8x64xf32>
    %cst_185 = arith.constant dense<0.000000e+00> : vector<8x32xf32>
    %761 = tpu.matmul %745, %8, %cst_185 {dimension_numbers = #tpu.dot_dimension_numbers<[1], [0], [0], [1], [0, 0, 1, 1], [], []>} : vector<8x32xbf16>, vector<32x32xbf16>, vector<8x32xf32> -> vector<8x32xf32>
    %762 = arith.truncf %760 : vector<8x64xf32> to vector<8x64xbf16>
    %cst_186 = arith.constant dense<0.000000e+00> : vector<8x32xf32>
    %763 = tpu.matmul %762, %9, %cst_186 {dimension_numbers = #tpu.dot_dimension_numbers<[1], [0], [0], [1], [0, 0, 1, 1], [], []>} : vector<8x64xbf16>, vector<64x32xbf16>, vector<8x32xf32> -> vector<8x32xf32>
    %764 = arith.addf %761, %763 : vector<8x32xf32>
    %765 = math.tanh %764 : vector<8x32xf32>
    %766 = arith.truncf %765 : vector<8x32xf32> to vector<8x32xbf16>
    %cst_187 = arith.constant dense<0.000000e+00> : vector<8x128xf32>
    %767 = tpu.matmul %766, %4, %cst_187 {dimension_numbers = #tpu.dot_dimension_numbers<[1], [0], [0], [1], [0, 0, 1, 1], [], []>} : vector<8x32xbf16>, vector<32x128xbf16>, vector<8x128xf32> -> vector<8x128xf32>
    %cst_188 = arith.constant -1.000000e+30 : f32
    %768 = vector.shape_cast %308 : vector<1x128xi1> to vector<1x128xi1>
    %769 = vector.broadcast %768 : vector<1x128xi1> to vector<8x128xi1>
    %770 = vector.broadcast %cst_188 : f32 to vector<8x128xf32>
    %771 = arith.select %769, %770, %767 : vector<8x128xi1>, vector<8x128xf32>
    %772 = vector.extract_strided_slice %311 {offsets = [32, 0], sizes = [8, 1], strides = [1, 1]} : vector<64x1xi32> to vector<8x1xi32>
    %773 = vector.extract_strided_slice %312 {offsets = [32, 0], sizes = [8, 1], strides = [1, 1]} : vector<64x1xi32> to vector<8x1xi32>
    %774 = vector.extract_strided_slice %771 {offsets = [0, 0], sizes = [8, 64], strides = [1, 1]} : vector<8x128xf32> to vector<8x64xf32>
    %cst_189 = arith.constant dense<0xFF800000> : vector<8xf32>
    %775 = vector.multi_reduction <maximumf>, %774, %cst_189 [1] : vector<8x64xf32> to vector<8xf32>
    %776 = vector.shape_cast %775 : vector<8xf32> to vector<8x1xf32>
    %777 = vector.broadcast %776 : vector<8x1xf32> to vector<8x64xf32>
    %778 = arith.subf %774, %777 : vector<8x64xf32>
    %779 = math.exp %778 : vector<8x64xf32>
    %cst_190 = arith.constant dense<0.000000e+00> : vector<8xf32>
    %780 = vector.multi_reduction <add>, %779, %cst_190 [1] : vector<8x64xf32> to vector<8xf32>
    %781 = vector.shape_cast %780 : vector<8xf32> to vector<8x1xf32>
    %782 = math.log %781 : vector<8x1xf32>
    %783 = arith.addf %776, %782 : vector<8x1xf32>
    %784 = vector.broadcast %772 : vector<8x1xi32> to vector<8x64xi32>
    %785 = arith.cmpi eq, %309, %784 : vector<8x64xi32>
    %cst_191 = arith.constant 0.000000e+00 : f32
    %786 = vector.broadcast %cst_191 : f32 to vector<8x64xf32>
    %787 = arith.select %785, %774, %786 : vector<8x64xi1>, vector<8x64xf32>
    %cst_192 = arith.constant dense<0.000000e+00> : vector<8xf32>
    %788 = vector.multi_reduction <add>, %787, %cst_192 [1] : vector<8x64xf32> to vector<8xf32>
    %789 = vector.shape_cast %788 : vector<8xf32> to vector<8x1xf32>
    %790 = arith.subf %789, %783 : vector<8x1xf32>
    %c0_i32_193 = arith.constant 0 : i32
    %791 = vector.broadcast %c0_i32_193 : i32 to vector<8x1xi32>
    %792 = arith.cmpi ne, %772, %791 : vector<8x1xi32>
    %793 = arith.extui %792 : vector<8x1xi1> to vector<8x1xi32>
    %794 = arith.sitofp %793 : vector<8x1xi32> to vector<8x1xf32>
    %795 = arith.mulf %790, %794 : vector<8x1xf32>
    %796 = arith.addf %718, %795 : vector<8x1xf32>
    %797 = vector.extract_strided_slice %771 {offsets = [0, 64], sizes = [8, 64], strides = [1, 1]} : vector<8x128xf32> to vector<8x64xf32>
    %cst_194 = arith.constant dense<0xFF800000> : vector<8xf32>
    %798 = vector.multi_reduction <maximumf>, %797, %cst_194 [1] : vector<8x64xf32> to vector<8xf32>
    %799 = vector.shape_cast %798 : vector<8xf32> to vector<8x1xf32>
    %800 = vector.broadcast %799 : vector<8x1xf32> to vector<8x64xf32>
    %801 = arith.subf %797, %800 : vector<8x64xf32>
    %802 = math.exp %801 : vector<8x64xf32>
    %cst_195 = arith.constant dense<0.000000e+00> : vector<8xf32>
    %803 = vector.multi_reduction <add>, %802, %cst_195 [1] : vector<8x64xf32> to vector<8xf32>
    %804 = vector.shape_cast %803 : vector<8xf32> to vector<8x1xf32>
    %805 = math.log %804 : vector<8x1xf32>
    %806 = arith.addf %799, %805 : vector<8x1xf32>
    %807 = vector.broadcast %773 : vector<8x1xi32> to vector<8x64xi32>
    %808 = arith.cmpi eq, %309, %807 : vector<8x64xi32>
    %cst_196 = arith.constant 0.000000e+00 : f32
    %809 = vector.broadcast %cst_196 : f32 to vector<8x64xf32>
    %810 = arith.select %808, %797, %809 : vector<8x64xi1>, vector<8x64xf32>
    %cst_197 = arith.constant dense<0.000000e+00> : vector<8xf32>
    %811 = vector.multi_reduction <add>, %810, %cst_197 [1] : vector<8x64xf32> to vector<8xf32>
    %812 = vector.shape_cast %811 : vector<8xf32> to vector<8x1xf32>
    %813 = arith.subf %812, %806 : vector<8x1xf32>
    %c0_i32_198 = arith.constant 0 : i32
    %814 = vector.broadcast %c0_i32_198 : i32 to vector<8x1xi32>
    %815 = arith.cmpi ne, %773, %814 : vector<8x1xi32>
    %816 = arith.extui %815 : vector<8x1xi1> to vector<8x1xi32>
    %817 = arith.sitofp %816 : vector<8x1xi32> to vector<8x1xf32>
    %818 = arith.mulf %813, %817 : vector<8x1xf32>
    %819 = arith.addf %796, %818 : vector<8x1xf32>
    %820 = vector.extract_strided_slice %18 {offsets = [40, 0], sizes = [8, 128], strides = [1, 1]} : vector<64x128xf32> to vector<8x128xf32>
    %821 = arith.truncf %765 : vector<8x32xf32> to vector<8x32xbf16>
    %cst_199 = arith.constant dense<0.000000e+00> : vector<8x128xf32>
    %822 = tpu.matmul %821, %2, %cst_199 {dimension_numbers = #tpu.dot_dimension_numbers<[1], [0], [0], [1], [0, 0, 1, 1], [], []>} : vector<8x32xbf16>, vector<32x128xbf16>, vector<8x128xf32> -> vector<8x128xf32>
    %823 = arith.addf %820, %822 : vector<8x128xf32>
    %824 = arith.truncf %744 : vector<8x32xf32> to vector<8x32xbf16>
    %cst_200 = arith.constant dense<0.000000e+00> : vector<8x128xf32>
    %825 = tpu.matmul %824, %3, %cst_200 {dimension_numbers = #tpu.dot_dimension_numbers<[1], [0], [0], [1], [0, 0, 1, 1], [], []>} : vector<8x32xbf16>, vector<32x128xbf16>, vector<8x128xf32> -> vector<8x128xf32>
    %826 = arith.addf %823, %825 : vector<8x128xf32>
    %827 = vector.broadcast %27 : vector<1x128xf32> to vector<8x128xf32>
    %828 = arith.mulf %826, %827 : vector<8x128xf32>
    %829 = math.tanh %828 : vector<8x128xf32>
    %cst_201 = arith.constant 5.000000e-01 : f32
    %830 = vector.broadcast %cst_201 : f32 to vector<8x128xf32>
    %831 = arith.mulf %830, %829 : vector<8x128xf32>
    %cst_202 = arith.constant 5.000000e-01 : f32
    %832 = vector.broadcast %cst_202 : f32 to vector<8x128xf32>
    %833 = arith.addf %831, %832 : vector<8x128xf32>
    %834 = vector.shape_cast %24 : vector<1x128xi1> to vector<1x128xi1>
    %835 = vector.broadcast %834 : vector<1x128xi1> to vector<8x128xi1>
    %836 = arith.select %835, %829, %833 : vector<8x128xi1>, vector<8x128xf32>
    %837 = vector.extract_strided_slice %836 {offsets = [0, 0], sizes = [8, 32], strides = [1, 1]} : vector<8x128xf32> to vector<8x32xf32>
    %838 = vector.extract_strided_slice %836 {offsets = [0, 32], sizes = [8, 32], strides = [1, 1]} : vector<8x128xf32> to vector<8x32xf32>
    %839 = vector.extract_strided_slice %836 {offsets = [0, 64], sizes = [8, 32], strides = [1, 1]} : vector<8x128xf32> to vector<8x32xf32>
    %840 = vector.extract_strided_slice %836 {offsets = [0, 96], sizes = [8, 32], strides = [1, 1]} : vector<8x128xf32> to vector<8x32xf32>
    %841 = arith.mulf %838, %742 : vector<8x32xf32>
    %842 = arith.mulf %837, %839 : vector<8x32xf32>
    %843 = arith.addf %841, %842 : vector<8x32xf32>
    %844 = math.tanh %843 : vector<8x32xf32>
    %845 = arith.mulf %840, %844 : vector<8x32xf32>
    %846 = arith.truncf %845 : vector<8x32xf32> to vector<8x32xbf16>
    %cst_203 = arith.constant dense<0.000000e+00> : vector<8x64xf32>
    %847 = tpu.matmul %846, %294, %cst_203 {dimension_numbers = #tpu.dot_dimension_numbers<[1], [1], [0], [0], [0, 0, 1, 0], [], []>} : vector<8x32xbf16>, vector<64x32xbf16>, vector<8x64xf32> -> vector<8x64xf32>
    %cst_204 = arith.constant -1.000000e+30 : f32
    %848 = vector.broadcast %cst_204 : f32 to vector<8x64xf32>
    %849 = arith.select %299, %847, %848 : vector<8x64xi1>, vector<8x64xf32>
    %cst_205 = arith.constant dense<0xFF800000> : vector<8xf32>
    %850 = vector.multi_reduction <maximumf>, %849, %cst_205 [1] : vector<8x64xf32> to vector<8xf32>
    %851 = vector.shape_cast %850 : vector<8xf32> to vector<8x1xf32>
    %852 = vector.broadcast %851 : vector<8x1xf32> to vector<8x64xf32>
    %853 = arith.subf %849, %852 : vector<8x64xf32>
    %854 = math.exp %853 : vector<8x64xf32>
    %cst_206 = arith.constant dense<0.000000e+00> : vector<8xf32>
    %855 = vector.multi_reduction <add>, %854, %cst_206 [1] : vector<8x64xf32> to vector<8xf32>
    %856 = vector.shape_cast %855 : vector<8xf32> to vector<8x1xf32>
    %857 = tpu.reciprocal %856 {approx = true} : vector<8x1xf32> -> vector<8x1xf32>
    %858 = vector.broadcast %857 : vector<8x1xf32> to vector<8x64xf32>
    %859 = arith.mulf %854, %858 : vector<8x64xf32>
    %860 = arith.truncf %859 : vector<8x64xf32> to vector<8x64xbf16>
    %cst_207 = arith.constant dense<0.000000e+00> : vector<8x64xf32>
    %861 = tpu.matmul %860, %292, %cst_207 {dimension_numbers = #tpu.dot_dimension_numbers<[1], [0], [0], [1], [0, 0, 1, 1], [], []>} : vector<8x64xbf16>, vector<64x64xbf16>, vector<8x64xf32> -> vector<8x64xf32>
    %cst_208 = arith.constant dense<0.000000e+00> : vector<8x32xf32>
    %862 = tpu.matmul %846, %8, %cst_208 {dimension_numbers = #tpu.dot_dimension_numbers<[1], [0], [0], [1], [0, 0, 1, 1], [], []>} : vector<8x32xbf16>, vector<32x32xbf16>, vector<8x32xf32> -> vector<8x32xf32>
    %863 = arith.truncf %861 : vector<8x64xf32> to vector<8x64xbf16>
    %cst_209 = arith.constant dense<0.000000e+00> : vector<8x32xf32>
    %864 = tpu.matmul %863, %9, %cst_209 {dimension_numbers = #tpu.dot_dimension_numbers<[1], [0], [0], [1], [0, 0, 1, 1], [], []>} : vector<8x64xbf16>, vector<64x32xbf16>, vector<8x32xf32> -> vector<8x32xf32>
    %865 = arith.addf %862, %864 : vector<8x32xf32>
    %866 = math.tanh %865 : vector<8x32xf32>
    %867 = arith.truncf %866 : vector<8x32xf32> to vector<8x32xbf16>
    %cst_210 = arith.constant dense<0.000000e+00> : vector<8x128xf32>
    %868 = tpu.matmul %867, %4, %cst_210 {dimension_numbers = #tpu.dot_dimension_numbers<[1], [0], [0], [1], [0, 0, 1, 1], [], []>} : vector<8x32xbf16>, vector<32x128xbf16>, vector<8x128xf32> -> vector<8x128xf32>
    %cst_211 = arith.constant -1.000000e+30 : f32
    %869 = vector.shape_cast %308 : vector<1x128xi1> to vector<1x128xi1>
    %870 = vector.broadcast %869 : vector<1x128xi1> to vector<8x128xi1>
    %871 = vector.broadcast %cst_211 : f32 to vector<8x128xf32>
    %872 = arith.select %870, %871, %868 : vector<8x128xi1>, vector<8x128xf32>
    %873 = vector.extract_strided_slice %311 {offsets = [40, 0], sizes = [8, 1], strides = [1, 1]} : vector<64x1xi32> to vector<8x1xi32>
    %874 = vector.extract_strided_slice %312 {offsets = [40, 0], sizes = [8, 1], strides = [1, 1]} : vector<64x1xi32> to vector<8x1xi32>
    %875 = vector.extract_strided_slice %872 {offsets = [0, 0], sizes = [8, 64], strides = [1, 1]} : vector<8x128xf32> to vector<8x64xf32>
    %cst_212 = arith.constant dense<0xFF800000> : vector<8xf32>
    %876 = vector.multi_reduction <maximumf>, %875, %cst_212 [1] : vector<8x64xf32> to vector<8xf32>
    %877 = vector.shape_cast %876 : vector<8xf32> to vector<8x1xf32>
    %878 = vector.broadcast %877 : vector<8x1xf32> to vector<8x64xf32>
    %879 = arith.subf %875, %878 : vector<8x64xf32>
    %880 = math.exp %879 : vector<8x64xf32>
    %cst_213 = arith.constant dense<0.000000e+00> : vector<8xf32>
    %881 = vector.multi_reduction <add>, %880, %cst_213 [1] : vector<8x64xf32> to vector<8xf32>
    %882 = vector.shape_cast %881 : vector<8xf32> to vector<8x1xf32>
    %883 = math.log %882 : vector<8x1xf32>
    %884 = arith.addf %877, %883 : vector<8x1xf32>
    %885 = vector.broadcast %873 : vector<8x1xi32> to vector<8x64xi32>
    %886 = arith.cmpi eq, %309, %885 : vector<8x64xi32>
    %cst_214 = arith.constant 0.000000e+00 : f32
    %887 = vector.broadcast %cst_214 : f32 to vector<8x64xf32>
    %888 = arith.select %886, %875, %887 : vector<8x64xi1>, vector<8x64xf32>
    %cst_215 = arith.constant dense<0.000000e+00> : vector<8xf32>
    %889 = vector.multi_reduction <add>, %888, %cst_215 [1] : vector<8x64xf32> to vector<8xf32>
    %890 = vector.shape_cast %889 : vector<8xf32> to vector<8x1xf32>
    %891 = arith.subf %890, %884 : vector<8x1xf32>
    %c0_i32_216 = arith.constant 0 : i32
    %892 = vector.broadcast %c0_i32_216 : i32 to vector<8x1xi32>
    %893 = arith.cmpi ne, %873, %892 : vector<8x1xi32>
    %894 = arith.extui %893 : vector<8x1xi1> to vector<8x1xi32>
    %895 = arith.sitofp %894 : vector<8x1xi32> to vector<8x1xf32>
    %896 = arith.mulf %891, %895 : vector<8x1xf32>
    %897 = arith.addf %819, %896 : vector<8x1xf32>
    %898 = vector.extract_strided_slice %872 {offsets = [0, 64], sizes = [8, 64], strides = [1, 1]} : vector<8x128xf32> to vector<8x64xf32>
    %cst_217 = arith.constant dense<0xFF800000> : vector<8xf32>
    %899 = vector.multi_reduction <maximumf>, %898, %cst_217 [1] : vector<8x64xf32> to vector<8xf32>
    %900 = vector.shape_cast %899 : vector<8xf32> to vector<8x1xf32>
    %901 = vector.broadcast %900 : vector<8x1xf32> to vector<8x64xf32>
    %902 = arith.subf %898, %901 : vector<8x64xf32>
    %903 = math.exp %902 : vector<8x64xf32>
    %cst_218 = arith.constant dense<0.000000e+00> : vector<8xf32>
    %904 = vector.multi_reduction <add>, %903, %cst_218 [1] : vector<8x64xf32> to vector<8xf32>
    %905 = vector.shape_cast %904 : vector<8xf32> to vector<8x1xf32>
    %906 = math.log %905 : vector<8x1xf32>
    %907 = arith.addf %900, %906 : vector<8x1xf32>
    %908 = vector.broadcast %874 : vector<8x1xi32> to vector<8x64xi32>
    %909 = arith.cmpi eq, %309, %908 : vector<8x64xi32>
    %cst_219 = arith.constant 0.000000e+00 : f32
    %910 = vector.broadcast %cst_219 : f32 to vector<8x64xf32>
    %911 = arith.select %909, %898, %910 : vector<8x64xi1>, vector<8x64xf32>
    %cst_220 = arith.constant dense<0.000000e+00> : vector<8xf32>
    %912 = vector.multi_reduction <add>, %911, %cst_220 [1] : vector<8x64xf32> to vector<8xf32>
    %913 = vector.shape_cast %912 : vector<8xf32> to vector<8x1xf32>
    %914 = arith.subf %913, %907 : vector<8x1xf32>
    %c0_i32_221 = arith.constant 0 : i32
    %915 = vector.broadcast %c0_i32_221 : i32 to vector<8x1xi32>
    %916 = arith.cmpi ne, %874, %915 : vector<8x1xi32>
    %917 = arith.extui %916 : vector<8x1xi1> to vector<8x1xi32>
    %918 = arith.sitofp %917 : vector<8x1xi32> to vector<8x1xf32>
    %919 = arith.mulf %914, %918 : vector<8x1xf32>
    %920 = arith.addf %897, %919 : vector<8x1xf32>
    %921 = vector.extract_strided_slice %18 {offsets = [48, 0], sizes = [8, 128], strides = [1, 1]} : vector<64x128xf32> to vector<8x128xf32>
    %922 = arith.truncf %866 : vector<8x32xf32> to vector<8x32xbf16>
    %cst_222 = arith.constant dense<0.000000e+00> : vector<8x128xf32>
    %923 = tpu.matmul %922, %2, %cst_222 {dimension_numbers = #tpu.dot_dimension_numbers<[1], [0], [0], [1], [0, 0, 1, 1], [], []>} : vector<8x32xbf16>, vector<32x128xbf16>, vector<8x128xf32> -> vector<8x128xf32>
    %924 = arith.addf %921, %923 : vector<8x128xf32>
    %925 = arith.truncf %845 : vector<8x32xf32> to vector<8x32xbf16>
    %cst_223 = arith.constant dense<0.000000e+00> : vector<8x128xf32>
    %926 = tpu.matmul %925, %3, %cst_223 {dimension_numbers = #tpu.dot_dimension_numbers<[1], [0], [0], [1], [0, 0, 1, 1], [], []>} : vector<8x32xbf16>, vector<32x128xbf16>, vector<8x128xf32> -> vector<8x128xf32>
    %927 = arith.addf %924, %926 : vector<8x128xf32>
    %928 = vector.broadcast %27 : vector<1x128xf32> to vector<8x128xf32>
    %929 = arith.mulf %927, %928 : vector<8x128xf32>
    %930 = math.tanh %929 : vector<8x128xf32>
    %cst_224 = arith.constant 5.000000e-01 : f32
    %931 = vector.broadcast %cst_224 : f32 to vector<8x128xf32>
    %932 = arith.mulf %931, %930 : vector<8x128xf32>
    %cst_225 = arith.constant 5.000000e-01 : f32
    %933 = vector.broadcast %cst_225 : f32 to vector<8x128xf32>
    %934 = arith.addf %932, %933 : vector<8x128xf32>
    %935 = vector.shape_cast %24 : vector<1x128xi1> to vector<1x128xi1>
    %936 = vector.broadcast %935 : vector<1x128xi1> to vector<8x128xi1>
    %937 = arith.select %936, %930, %934 : vector<8x128xi1>, vector<8x128xf32>
    %938 = vector.extract_strided_slice %937 {offsets = [0, 0], sizes = [8, 32], strides = [1, 1]} : vector<8x128xf32> to vector<8x32xf32>
    %939 = vector.extract_strided_slice %937 {offsets = [0, 32], sizes = [8, 32], strides = [1, 1]} : vector<8x128xf32> to vector<8x32xf32>
    %940 = vector.extract_strided_slice %937 {offsets = [0, 64], sizes = [8, 32], strides = [1, 1]} : vector<8x128xf32> to vector<8x32xf32>
    %941 = vector.extract_strided_slice %937 {offsets = [0, 96], sizes = [8, 32], strides = [1, 1]} : vector<8x128xf32> to vector<8x32xf32>
    %942 = arith.mulf %939, %843 : vector<8x32xf32>
    %943 = arith.mulf %938, %940 : vector<8x32xf32>
    %944 = arith.addf %942, %943 : vector<8x32xf32>
    %945 = math.tanh %944 : vector<8x32xf32>
    %946 = arith.mulf %941, %945 : vector<8x32xf32>
    %947 = arith.truncf %946 : vector<8x32xf32> to vector<8x32xbf16>
    %cst_226 = arith.constant dense<0.000000e+00> : vector<8x64xf32>
    %948 = tpu.matmul %947, %294, %cst_226 {dimension_numbers = #tpu.dot_dimension_numbers<[1], [1], [0], [0], [0, 0, 1, 0], [], []>} : vector<8x32xbf16>, vector<64x32xbf16>, vector<8x64xf32> -> vector<8x64xf32>
    %cst_227 = arith.constant -1.000000e+30 : f32
    %949 = vector.broadcast %cst_227 : f32 to vector<8x64xf32>
    %950 = arith.select %299, %948, %949 : vector<8x64xi1>, vector<8x64xf32>
    %cst_228 = arith.constant dense<0xFF800000> : vector<8xf32>
    %951 = vector.multi_reduction <maximumf>, %950, %cst_228 [1] : vector<8x64xf32> to vector<8xf32>
    %952 = vector.shape_cast %951 : vector<8xf32> to vector<8x1xf32>
    %953 = vector.broadcast %952 : vector<8x1xf32> to vector<8x64xf32>
    %954 = arith.subf %950, %953 : vector<8x64xf32>
    %955 = math.exp %954 : vector<8x64xf32>
    %cst_229 = arith.constant dense<0.000000e+00> : vector<8xf32>
    %956 = vector.multi_reduction <add>, %955, %cst_229 [1] : vector<8x64xf32> to vector<8xf32>
    %957 = vector.shape_cast %956 : vector<8xf32> to vector<8x1xf32>
    %958 = tpu.reciprocal %957 {approx = true} : vector<8x1xf32> -> vector<8x1xf32>
    %959 = vector.broadcast %958 : vector<8x1xf32> to vector<8x64xf32>
    %960 = arith.mulf %955, %959 : vector<8x64xf32>
    %961 = arith.truncf %960 : vector<8x64xf32> to vector<8x64xbf16>
    %cst_230 = arith.constant dense<0.000000e+00> : vector<8x64xf32>
    %962 = tpu.matmul %961, %292, %cst_230 {dimension_numbers = #tpu.dot_dimension_numbers<[1], [0], [0], [1], [0, 0, 1, 1], [], []>} : vector<8x64xbf16>, vector<64x64xbf16>, vector<8x64xf32> -> vector<8x64xf32>
    %cst_231 = arith.constant dense<0.000000e+00> : vector<8x32xf32>
    %963 = tpu.matmul %947, %8, %cst_231 {dimension_numbers = #tpu.dot_dimension_numbers<[1], [0], [0], [1], [0, 0, 1, 1], [], []>} : vector<8x32xbf16>, vector<32x32xbf16>, vector<8x32xf32> -> vector<8x32xf32>
    %964 = arith.truncf %962 : vector<8x64xf32> to vector<8x64xbf16>
    %cst_232 = arith.constant dense<0.000000e+00> : vector<8x32xf32>
    %965 = tpu.matmul %964, %9, %cst_232 {dimension_numbers = #tpu.dot_dimension_numbers<[1], [0], [0], [1], [0, 0, 1, 1], [], []>} : vector<8x64xbf16>, vector<64x32xbf16>, vector<8x32xf32> -> vector<8x32xf32>
    %966 = arith.addf %963, %965 : vector<8x32xf32>
    %967 = math.tanh %966 : vector<8x32xf32>
    %968 = arith.truncf %967 : vector<8x32xf32> to vector<8x32xbf16>
    %cst_233 = arith.constant dense<0.000000e+00> : vector<8x128xf32>
    %969 = tpu.matmul %968, %4, %cst_233 {dimension_numbers = #tpu.dot_dimension_numbers<[1], [0], [0], [1], [0, 0, 1, 1], [], []>} : vector<8x32xbf16>, vector<32x128xbf16>, vector<8x128xf32> -> vector<8x128xf32>
    %cst_234 = arith.constant -1.000000e+30 : f32
    %970 = vector.shape_cast %308 : vector<1x128xi1> to vector<1x128xi1>
    %971 = vector.broadcast %970 : vector<1x128xi1> to vector<8x128xi1>
    %972 = vector.broadcast %cst_234 : f32 to vector<8x128xf32>
    %973 = arith.select %971, %972, %969 : vector<8x128xi1>, vector<8x128xf32>
    %974 = vector.extract_strided_slice %311 {offsets = [48, 0], sizes = [8, 1], strides = [1, 1]} : vector<64x1xi32> to vector<8x1xi32>
    %975 = vector.extract_strided_slice %312 {offsets = [48, 0], sizes = [8, 1], strides = [1, 1]} : vector<64x1xi32> to vector<8x1xi32>
    %976 = vector.extract_strided_slice %973 {offsets = [0, 0], sizes = [8, 64], strides = [1, 1]} : vector<8x128xf32> to vector<8x64xf32>
    %cst_235 = arith.constant dense<0xFF800000> : vector<8xf32>
    %977 = vector.multi_reduction <maximumf>, %976, %cst_235 [1] : vector<8x64xf32> to vector<8xf32>
    %978 = vector.shape_cast %977 : vector<8xf32> to vector<8x1xf32>
    %979 = vector.broadcast %978 : vector<8x1xf32> to vector<8x64xf32>
    %980 = arith.subf %976, %979 : vector<8x64xf32>
    %981 = math.exp %980 : vector<8x64xf32>
    %cst_236 = arith.constant dense<0.000000e+00> : vector<8xf32>
    %982 = vector.multi_reduction <add>, %981, %cst_236 [1] : vector<8x64xf32> to vector<8xf32>
    %983 = vector.shape_cast %982 : vector<8xf32> to vector<8x1xf32>
    %984 = math.log %983 : vector<8x1xf32>
    %985 = arith.addf %978, %984 : vector<8x1xf32>
    %986 = vector.broadcast %974 : vector<8x1xi32> to vector<8x64xi32>
    %987 = arith.cmpi eq, %309, %986 : vector<8x64xi32>
    %cst_237 = arith.constant 0.000000e+00 : f32
    %988 = vector.broadcast %cst_237 : f32 to vector<8x64xf32>
    %989 = arith.select %987, %976, %988 : vector<8x64xi1>, vector<8x64xf32>
    %cst_238 = arith.constant dense<0.000000e+00> : vector<8xf32>
    %990 = vector.multi_reduction <add>, %989, %cst_238 [1] : vector<8x64xf32> to vector<8xf32>
    %991 = vector.shape_cast %990 : vector<8xf32> to vector<8x1xf32>
    %992 = arith.subf %991, %985 : vector<8x1xf32>
    %c0_i32_239 = arith.constant 0 : i32
    %993 = vector.broadcast %c0_i32_239 : i32 to vector<8x1xi32>
    %994 = arith.cmpi ne, %974, %993 : vector<8x1xi32>
    %995 = arith.extui %994 : vector<8x1xi1> to vector<8x1xi32>
    %996 = arith.sitofp %995 : vector<8x1xi32> to vector<8x1xf32>
    %997 = arith.mulf %992, %996 : vector<8x1xf32>
    %998 = arith.addf %920, %997 : vector<8x1xf32>
    %999 = vector.extract_strided_slice %973 {offsets = [0, 64], sizes = [8, 64], strides = [1, 1]} : vector<8x128xf32> to vector<8x64xf32>
    %cst_240 = arith.constant dense<0xFF800000> : vector<8xf32>
    %1000 = vector.multi_reduction <maximumf>, %999, %cst_240 [1] : vector<8x64xf32> to vector<8xf32>
    %1001 = vector.shape_cast %1000 : vector<8xf32> to vector<8x1xf32>
    %1002 = vector.broadcast %1001 : vector<8x1xf32> to vector<8x64xf32>
    %1003 = arith.subf %999, %1002 : vector<8x64xf32>
    %1004 = math.exp %1003 : vector<8x64xf32>
    %cst_241 = arith.constant dense<0.000000e+00> : vector<8xf32>
    %1005 = vector.multi_reduction <add>, %1004, %cst_241 [1] : vector<8x64xf32> to vector<8xf32>
    %1006 = vector.shape_cast %1005 : vector<8xf32> to vector<8x1xf32>
    %1007 = math.log %1006 : vector<8x1xf32>
    %1008 = arith.addf %1001, %1007 : vector<8x1xf32>
    %1009 = vector.broadcast %975 : vector<8x1xi32> to vector<8x64xi32>
    %1010 = arith.cmpi eq, %309, %1009 : vector<8x64xi32>
    %cst_242 = arith.constant 0.000000e+00 : f32
    %1011 = vector.broadcast %cst_242 : f32 to vector<8x64xf32>
    %1012 = arith.select %1010, %999, %1011 : vector<8x64xi1>, vector<8x64xf32>
    %cst_243 = arith.constant dense<0.000000e+00> : vector<8xf32>
    %1013 = vector.multi_reduction <add>, %1012, %cst_243 [1] : vector<8x64xf32> to vector<8xf32>
    %1014 = vector.shape_cast %1013 : vector<8xf32> to vector<8x1xf32>
    %1015 = arith.subf %1014, %1008 : vector<8x1xf32>
    %c0_i32_244 = arith.constant 0 : i32
    %1016 = vector.broadcast %c0_i32_244 : i32 to vector<8x1xi32>
    %1017 = arith.cmpi ne, %975, %1016 : vector<8x1xi32>
    %1018 = arith.extui %1017 : vector<8x1xi1> to vector<8x1xi32>
    %1019 = arith.sitofp %1018 : vector<8x1xi32> to vector<8x1xf32>
    %1020 = arith.mulf %1015, %1019 : vector<8x1xf32>
    %1021 = arith.addf %998, %1020 : vector<8x1xf32>
    %1022 = vector.extract_strided_slice %18 {offsets = [56, 0], sizes = [8, 128], strides = [1, 1]} : vector<64x128xf32> to vector<8x128xf32>
    %1023 = arith.truncf %967 : vector<8x32xf32> to vector<8x32xbf16>
    %cst_245 = arith.constant dense<0.000000e+00> : vector<8x128xf32>
    %1024 = tpu.matmul %1023, %2, %cst_245 {dimension_numbers = #tpu.dot_dimension_numbers<[1], [0], [0], [1], [0, 0, 1, 1], [], []>} : vector<8x32xbf16>, vector<32x128xbf16>, vector<8x128xf32> -> vector<8x128xf32>
    %1025 = arith.addf %1022, %1024 : vector<8x128xf32>
    %1026 = arith.truncf %946 : vector<8x32xf32> to vector<8x32xbf16>
    %cst_246 = arith.constant dense<0.000000e+00> : vector<8x128xf32>
    %1027 = tpu.matmul %1026, %3, %cst_246 {dimension_numbers = #tpu.dot_dimension_numbers<[1], [0], [0], [1], [0, 0, 1, 1], [], []>} : vector<8x32xbf16>, vector<32x128xbf16>, vector<8x128xf32> -> vector<8x128xf32>
    %1028 = arith.addf %1025, %1027 : vector<8x128xf32>
    %1029 = vector.broadcast %27 : vector<1x128xf32> to vector<8x128xf32>
    %1030 = arith.mulf %1028, %1029 : vector<8x128xf32>
    %1031 = math.tanh %1030 : vector<8x128xf32>
    %cst_247 = arith.constant 5.000000e-01 : f32
    %1032 = vector.broadcast %cst_247 : f32 to vector<8x128xf32>
    %1033 = arith.mulf %1032, %1031 : vector<8x128xf32>
    %cst_248 = arith.constant 5.000000e-01 : f32
    %1034 = vector.broadcast %cst_248 : f32 to vector<8x128xf32>
    %1035 = arith.addf %1033, %1034 : vector<8x128xf32>
    %1036 = vector.shape_cast %24 : vector<1x128xi1> to vector<1x128xi1>
    %1037 = vector.broadcast %1036 : vector<1x128xi1> to vector<8x128xi1>
    %1038 = arith.select %1037, %1031, %1035 : vector<8x128xi1>, vector<8x128xf32>
    %1039 = vector.extract_strided_slice %1038 {offsets = [0, 0], sizes = [8, 32], strides = [1, 1]} : vector<8x128xf32> to vector<8x32xf32>
    %1040 = vector.extract_strided_slice %1038 {offsets = [0, 32], sizes = [8, 32], strides = [1, 1]} : vector<8x128xf32> to vector<8x32xf32>
    %1041 = vector.extract_strided_slice %1038 {offsets = [0, 64], sizes = [8, 32], strides = [1, 1]} : vector<8x128xf32> to vector<8x32xf32>
    %1042 = vector.extract_strided_slice %1038 {offsets = [0, 96], sizes = [8, 32], strides = [1, 1]} : vector<8x128xf32> to vector<8x32xf32>
    %1043 = arith.mulf %1040, %944 : vector<8x32xf32>
    %1044 = arith.mulf %1039, %1041 : vector<8x32xf32>
    %1045 = arith.addf %1043, %1044 : vector<8x32xf32>
    %1046 = math.tanh %1045 : vector<8x32xf32>
    %1047 = arith.mulf %1042, %1046 : vector<8x32xf32>
    %1048 = arith.truncf %1047 : vector<8x32xf32> to vector<8x32xbf16>
    %cst_249 = arith.constant dense<0.000000e+00> : vector<8x64xf32>
    %1049 = tpu.matmul %1048, %294, %cst_249 {dimension_numbers = #tpu.dot_dimension_numbers<[1], [1], [0], [0], [0, 0, 1, 0], [], []>} : vector<8x32xbf16>, vector<64x32xbf16>, vector<8x64xf32> -> vector<8x64xf32>
    %cst_250 = arith.constant -1.000000e+30 : f32
    %1050 = vector.broadcast %cst_250 : f32 to vector<8x64xf32>
    %1051 = arith.select %299, %1049, %1050 : vector<8x64xi1>, vector<8x64xf32>
    %cst_251 = arith.constant dense<0xFF800000> : vector<8xf32>
    %1052 = vector.multi_reduction <maximumf>, %1051, %cst_251 [1] : vector<8x64xf32> to vector<8xf32>
    %1053 = vector.shape_cast %1052 : vector<8xf32> to vector<8x1xf32>
    %1054 = vector.broadcast %1053 : vector<8x1xf32> to vector<8x64xf32>
    %1055 = arith.subf %1051, %1054 : vector<8x64xf32>
    %1056 = math.exp %1055 : vector<8x64xf32>
    %cst_252 = arith.constant dense<0.000000e+00> : vector<8xf32>
    %1057 = vector.multi_reduction <add>, %1056, %cst_252 [1] : vector<8x64xf32> to vector<8xf32>
    %1058 = vector.shape_cast %1057 : vector<8xf32> to vector<8x1xf32>
    %1059 = tpu.reciprocal %1058 {approx = true} : vector<8x1xf32> -> vector<8x1xf32>
    %1060 = vector.broadcast %1059 : vector<8x1xf32> to vector<8x64xf32>
    %1061 = arith.mulf %1056, %1060 : vector<8x64xf32>
    %1062 = arith.truncf %1061 : vector<8x64xf32> to vector<8x64xbf16>
    %cst_253 = arith.constant dense<0.000000e+00> : vector<8x64xf32>
    %1063 = tpu.matmul %1062, %292, %cst_253 {dimension_numbers = #tpu.dot_dimension_numbers<[1], [0], [0], [1], [0, 0, 1, 1], [], []>} : vector<8x64xbf16>, vector<64x64xbf16>, vector<8x64xf32> -> vector<8x64xf32>
    %cst_254 = arith.constant dense<0.000000e+00> : vector<8x32xf32>
    %1064 = tpu.matmul %1048, %8, %cst_254 {dimension_numbers = #tpu.dot_dimension_numbers<[1], [0], [0], [1], [0, 0, 1, 1], [], []>} : vector<8x32xbf16>, vector<32x32xbf16>, vector<8x32xf32> -> vector<8x32xf32>
    %1065 = arith.truncf %1063 : vector<8x64xf32> to vector<8x64xbf16>
    %cst_255 = arith.constant dense<0.000000e+00> : vector<8x32xf32>
    %1066 = tpu.matmul %1065, %9, %cst_255 {dimension_numbers = #tpu.dot_dimension_numbers<[1], [0], [0], [1], [0, 0, 1, 1], [], []>} : vector<8x64xbf16>, vector<64x32xbf16>, vector<8x32xf32> -> vector<8x32xf32>
    %1067 = arith.addf %1064, %1066 : vector<8x32xf32>
    %1068 = math.tanh %1067 : vector<8x32xf32>
    %1069 = arith.truncf %1068 : vector<8x32xf32> to vector<8x32xbf16>
    %cst_256 = arith.constant dense<0.000000e+00> : vector<8x128xf32>
    %1070 = tpu.matmul %1069, %4, %cst_256 {dimension_numbers = #tpu.dot_dimension_numbers<[1], [0], [0], [1], [0, 0, 1, 1], [], []>} : vector<8x32xbf16>, vector<32x128xbf16>, vector<8x128xf32> -> vector<8x128xf32>
    %cst_257 = arith.constant -1.000000e+30 : f32
    %1071 = vector.shape_cast %308 : vector<1x128xi1> to vector<1x128xi1>
    %1072 = vector.broadcast %1071 : vector<1x128xi1> to vector<8x128xi1>
    %1073 = vector.broadcast %cst_257 : f32 to vector<8x128xf32>
    %1074 = arith.select %1072, %1073, %1070 : vector<8x128xi1>, vector<8x128xf32>
    %1075 = vector.extract_strided_slice %311 {offsets = [56, 0], sizes = [8, 1], strides = [1, 1]} : vector<64x1xi32> to vector<8x1xi32>
    %1076 = vector.extract_strided_slice %312 {offsets = [56, 0], sizes = [8, 1], strides = [1, 1]} : vector<64x1xi32> to vector<8x1xi32>
    %1077 = vector.extract_strided_slice %1074 {offsets = [0, 0], sizes = [8, 64], strides = [1, 1]} : vector<8x128xf32> to vector<8x64xf32>
    %cst_258 = arith.constant dense<0xFF800000> : vector<8xf32>
    %1078 = vector.multi_reduction <maximumf>, %1077, %cst_258 [1] : vector<8x64xf32> to vector<8xf32>
    %1079 = vector.shape_cast %1078 : vector<8xf32> to vector<8x1xf32>
    %1080 = vector.broadcast %1079 : vector<8x1xf32> to vector<8x64xf32>
    %1081 = arith.subf %1077, %1080 : vector<8x64xf32>
    %1082 = math.exp %1081 : vector<8x64xf32>
    %cst_259 = arith.constant dense<0.000000e+00> : vector<8xf32>
    %1083 = vector.multi_reduction <add>, %1082, %cst_259 [1] : vector<8x64xf32> to vector<8xf32>
    %1084 = vector.shape_cast %1083 : vector<8xf32> to vector<8x1xf32>
    %1085 = math.log %1084 : vector<8x1xf32>
    %1086 = arith.addf %1079, %1085 : vector<8x1xf32>
    %1087 = vector.broadcast %1075 : vector<8x1xi32> to vector<8x64xi32>
    %1088 = arith.cmpi eq, %309, %1087 : vector<8x64xi32>
    %cst_260 = arith.constant 0.000000e+00 : f32
    %1089 = vector.broadcast %cst_260 : f32 to vector<8x64xf32>
    %1090 = arith.select %1088, %1077, %1089 : vector<8x64xi1>, vector<8x64xf32>
    %cst_261 = arith.constant dense<0.000000e+00> : vector<8xf32>
    %1091 = vector.multi_reduction <add>, %1090, %cst_261 [1] : vector<8x64xf32> to vector<8xf32>
    %1092 = vector.shape_cast %1091 : vector<8xf32> to vector<8x1xf32>
    %1093 = arith.subf %1092, %1086 : vector<8x1xf32>
    %c0_i32_262 = arith.constant 0 : i32
    %1094 = vector.broadcast %c0_i32_262 : i32 to vector<8x1xi32>
    %1095 = arith.cmpi ne, %1075, %1094 : vector<8x1xi32>
    %1096 = arith.extui %1095 : vector<8x1xi1> to vector<8x1xi32>
    %1097 = arith.sitofp %1096 : vector<8x1xi32> to vector<8x1xf32>
    %1098 = arith.mulf %1093, %1097 : vector<8x1xf32>
    %1099 = arith.addf %1021, %1098 : vector<8x1xf32>
    %1100 = vector.extract_strided_slice %1074 {offsets = [0, 64], sizes = [8, 64], strides = [1, 1]} : vector<8x128xf32> to vector<8x64xf32>
    %cst_263 = arith.constant dense<0xFF800000> : vector<8xf32>
    %1101 = vector.multi_reduction <maximumf>, %1100, %cst_263 [1] : vector<8x64xf32> to vector<8xf32>
    %1102 = vector.shape_cast %1101 : vector<8xf32> to vector<8x1xf32>
    %1103 = vector.broadcast %1102 : vector<8x1xf32> to vector<8x64xf32>
    %1104 = arith.subf %1100, %1103 : vector<8x64xf32>
    %1105 = math.exp %1104 : vector<8x64xf32>
    %cst_264 = arith.constant dense<0.000000e+00> : vector<8xf32>
    %1106 = vector.multi_reduction <add>, %1105, %cst_264 [1] : vector<8x64xf32> to vector<8xf32>
    %1107 = vector.shape_cast %1106 : vector<8xf32> to vector<8x1xf32>
    %1108 = math.log %1107 : vector<8x1xf32>
    %1109 = arith.addf %1102, %1108 : vector<8x1xf32>
    %1110 = vector.broadcast %1076 : vector<8x1xi32> to vector<8x64xi32>
    %1111 = arith.cmpi eq, %309, %1110 : vector<8x64xi32>
    %cst_265 = arith.constant 0.000000e+00 : f32
    %1112 = vector.broadcast %cst_265 : f32 to vector<8x64xf32>
    %1113 = arith.select %1111, %1100, %1112 : vector<8x64xi1>, vector<8x64xf32>
    %cst_266 = arith.constant dense<0.000000e+00> : vector<8xf32>
    %1114 = vector.multi_reduction <add>, %1113, %cst_266 [1] : vector<8x64xf32> to vector<8xf32>
    %1115 = vector.shape_cast %1114 : vector<8xf32> to vector<8x1xf32>
    %1116 = arith.subf %1115, %1109 : vector<8x1xf32>
    %c0_i32_267 = arith.constant 0 : i32
    %1117 = vector.broadcast %c0_i32_267 : i32 to vector<8x1xi32>
    %1118 = arith.cmpi ne, %1076, %1117 : vector<8x1xi32>
    %1119 = arith.extui %1118 : vector<8x1xi1> to vector<8x1xi32>
    %1120 = arith.sitofp %1119 : vector<8x1xi32> to vector<8x1xf32>
    %1121 = arith.mulf %1116, %1120 : vector<8x1xf32>
    %1122 = arith.addf %1099, %1121 : vector<8x1xf32>
    %c0_268 = arith.constant 0 : index
    %c0_269 = arith.constant 0 : index
    %1123 = vector.load %arg6[%c0_268, %c0_269] : memref<8x1xf32, #tpu.memory_space<vmem>>, vector<8x1xf32>
    tpu.vector_store %arg6[%c0_268, %c0_269], %1122 {strides = array<i32>} : memref<8x1xf32, #tpu.memory_space<vmem>>, vector<8x1xf32>,
    return
  }
}

</mosaic_0001>

<bundles_post_ra>
// kernel: seq2ast_forward.1
= control target key start
LH: loop header
LB: loop body
LE: loop exit
PB: predicated region body
PF: predicated region fallthrough
CT: control target
= control target key end

     0   :  { %v6188_v1 = vmov 0   ;;  %vm155_vm0 = vcmask 261120   ;;  %v398_v21 = vlaneseq  ;;  %v6189_v42 = vmov 0.5   ;;  %s6191_s29 = smov 32   ;;  %s6194_s10 = smov 96   ;;  %s7751_s3 = inlined_call_operand.vmem [shape: bf16[448,128], index: 3, kind: input, shape index: {}]   ;;  %s7752_s1 = inlined_call_operand.vmem [shape: bf16[64,32], index: 1, kind: input, shape index: {}]   ;;  %s7753_s4 = inlined_call_operand.vmem [shape: bf16[32,256], index: 4, kind: input, shape index: {}]   ;;  %s7754_s0 = inlined_call_operand.vmem [shape: bf16[128,32], index: 0, kind: input, shape index: {}]   ;;  %s7755_s5 = inlined_call_operand.vmem [shape: f32[17,128], index: 5, kind: input, shape index: {}]   ;;  %s7756_s2 = inlined_call_operand.vmem [shape: s32[64,2], index: 2, kind: input, shape index: {}]   ;;  %s7757_s6 = inlined_call_operand.vmem [shape: f32[8,1], index: 6, kind: output, shape index: {}]  }
   0x1   :  { %v5922_v0 = vld [vmem:[%s7751_s3 + $0x10] sm:$0xff]   ;;  %5908 = vset.pattern.permute.xlu0 %v6188_v1  ;;  %v5923_v2 = vld [vmem:[%s7751_s3 + $0x18] sm:$0xff]   ;;  %v5924_v3 = vld [vmem:[%s7752_s1] sm:$0xff]   ;;  %vm6193_vm4 = vmmov 0   ;;  %vm1340_vm5 = vcmask 523264   ;;  %vm536_vm6 = vcmask 523520  }
   0x2   :  { %5271 = vmatprep.subr.bf16.mxu1 %v5922_v0  ;;  %5275 = vmatprep.mubr.msk.bf16.mxu1 %vm155_vm0, %v5924_v3  ;;  %v5925_v4 = vld [vmem:[%s7752_s1 + $0x8] sm:$0xff]   ;;  %v5929_v7 = vld [vmem:[%s7751_s3] sm:$0xff]   ;;  %v5931_v9 = vld [vmem:[%s7752_s1 + $0x10] sm:$0xff]   ;;  %v6320_v26 = vand.u32 127, %v398_v21  ;;  %vm2040_vm15 = vcmask 1048064   ;;  %s6196_s13 = smov 127  }
   0x3   :  { %5272 = vmatpush3.bf16.msra.mxu1 %v5922_v0  ;;  %v6249_v5 = vld [vmem:[%s7753_s4 + $0x4] ss:$8 sps:$4 sm:$0xff]   ;;  %v6254_v6 = vld [vmem:[%s7753_s4] ss:$8 sps:$4 sm:$0xff]   ;;  %5251 = vmatprep.subr.bf16.mxu0 %v5929_v7  ;;  %v6270_v10 = vld [vmem:[%s7753_s4 + $0x14] ss:$8 sps:$4 sm:$0xff]  }
   0x4   :  { %5273 = vmatprep.subr.bf16.mxu1 %v5923_v2  ;;  %v5930_v8 = vld [vmem:[%s7751_s3 + $0x8] sm:$0xff]   ;;  %5252 = vmatpush3.bf16.msra.mxu0 %v5929_v7  ;;  %v6275_v11 = vld [vmem:[%s7753_s4 + $0x10] ss:$8 sps:$4 sm:$0xff]   ;;  %v5936_v12 = vld [vmem:[%s7754_s0] sm:$0xff]   ;;  %vm400_vm1 = vcmp.ge.s32.totalorder %v6320_v26, 64  ;;  %vm401_vm2 = vcmp.lt.s32.totalorder %v6320_v26, 96 }
   0x5   :  { %5253 = vmatprep.subr.bf16.mxu0 %v5930_v8  ;;  %v5932_v13 = vld [vmem:[%s7752_s1 + $0x18] sm:$0xff]   ;;  %v5937_v14 = vld [vmem:[%s7754_s0 + $0x8] sm:$0xff]   ;;  %5255 = vmatprep.mubr.msk.bf16.mxu0 %vm155_vm0, %v5936_v12  ;;  %v4886_v15 = vld [vmem:[%s7755_s5 + $0x10] ss:$0 sm:$0xff]  ;;  %vm1570_vm8 = vcmp.ge.s32.totalorder %v6320_v26, 56  ;;  %vm1571_vm9 = vcmp.lt.s32.totalorder %v6320_v26, 64 }
   0x6   :  { %v6331_v35 = vld [vmem:[%s7755_s5] sm:$0xff]  ;;  %vm6340_vm3 = vmand %vm400_vm1, %vm401_vm2  ;;  %v6347_v41 = vld [vmem:[%s7755_s5 + $0x8] sm:$0xff]  ;;  %s6190_s5 = smov 64   ;;  %vm1573_vm11 = vcmp.ge.s32.totalorder %v6320_v26, 112 }
   0x7   :  { %5274 = vmatpush3.bf16.msra.mxu1 %v5923_v2  ;;  %v6351_v43 = vsel %vm6340_vm3, 1.0, %v6189_v42  ;;  %vm1572_vm10 = vmand %vm1570_vm8, %vm1571_vm9 }
   0x8   :  { %432 = vmatprep.subr.bf16.mxu1 %v6249_v5  ;;  %5254 = vmatpush3.bf16.msra.mxu0 %v5930_v8  ;;  %vm7478_vm12 = vmor %vm1572_vm10, %vm1573_vm11 }
   0x9   :  { %655 = vmatprep.subr.bf16.mxu0 %v6249_v5 }
   0xa   :  { %5276 = vmatmul.mubr.msk.bf16.vlgmr.msra.gmra.mrb[0].mxu1 %vm155_vm0, %v5925_v4 }
   0xb   :  { %433 = vmatpush1.bf16.msra.mxu1 %v6254_v6  ;;  %5279 = vmatprep.mubr.msk.bf16.mxu1 %vm155_vm0, %v5931_v9 }
   0xc   :  { %434 = vmatprep.subr.bf16.mxu1 %v6270_v10  ;;  %5256 = vmatmul.mubr.msk.bf16.vlgmr.msra.gmra.mrb[0].mxu0 %vm155_vm0, %v5937_v14 }
   0xd   :  { %656 = vmatpush1.bf16.msra.mxu0 %v6254_v6 }
   0xe   :  { %657 = vmatprep.subr.bf16.mxu0 %v6270_v10 }
   0xf   :  { %435 = vmatpush1.bf16.msra.mxu1 %v6275_v11 }
  0x10   :  { %545 = vmatprep.subr.bf16.mxu1 %v6249_v5 }
  0x11   :  { %658 = vmatpush1.bf16.msra.mxu0 %v6275_v11 }
  0x12   :  { %5280 = vmatmul.mubr.msk.bf16.gmra.mrb[4].mxu1 %vm155_vm0, %v5932_v13  ;;  %875 = vmatprep.subr.bf16.mxu0 %v6249_v5 }
  0x13   :  { %464 = vmatprep.mubr.bf16.mxu1 %v6188_v1 }
  0x1a   :  { %465 = vmatmul.mubr.bf16.vlgmr.msra.gmra.mrb[8].mxu1 %v6188_v1 }
  0x1b   :  { %546 = vmatpush1.bf16.msra.mxu1 %v6254_v6  ;;  %577 = vmatprep.mubr.bf16.mxu1 %v6188_v1 }
  0x1c   :  { %547 = vmatprep.subr.bf16.mxu1 %v6270_v10 }
  0x1f   :  { %548 = vmatpush1.bf16.msra.mxu1 %v6275_v11 }
  0x20   :  { %765 = vmatprep.subr.bf16.mxu1 %v6249_v5 }
  0xdd   :  { %v5277_v16 = vpop.f32.mrb[0].mxu1 }
  0xde   :  { %v6309_v17 = vadd.f32 %v5277_v16, %v4886_v15  ;;  %v367_v18 = vpop.f32.mrb[1].mxu1 }
  0xdf   :  { %v6311_v19 = vadd.f32 %v4886_v15, %v367_v18  ;;  %v5278_v20 = vpop.f32.mrb[2].mxu1  ;;  %v6317_v25 = vpop.f32.mrb[0].mxu0 }
  0xe0   :  { %v6313_v22 = vadd.f32 %v5278_v20, %v4886_v15  ;;  %v370_v23 = vpop.f32.mrb[3].mxu1  ;;  %v214_v27 = vpop.f32.mrb[1].mxu0 }
  0xe1   :  { %v6315_v24 = vadd.f32 %v4886_v15, %v370_v23  ;;  %v6322_v29 = vpop.f32.mrb[2].mxu0  ;;  %v477_v39 = vadd.f32 %v214_v27, %v6331_v35  ;;  %v590_v27 = vadd.f32 %v6317_v25, %v6331_v35 }
  0xe2   :  { %v217_v32 = vpop.f32.mrb[3].mxu0 }
  0xe3   :  { %v478_v47 = vadd.f32 %v217_v32, %v6347_v41 }
  0xe5   :  { %v5281_v28 = vpop.f32.mrb[4].mxu1 }
  0xe6   :  { %v6324_v30 = vadd.f32 %v5281_v28, %v4886_v15  ;;  %v383_v31 = vpop.f32.mrb[5].mxu1 }
  0xe7   :  { %v6326_v33 = vadd.f32 %v4886_v15, %v383_v31  ;;  %v5282_v34 = vpop.f32.mrb[6].mxu1 }
  0xe8   :  { %v6335_v36 = vadd.f32 %v5282_v34, %v4886_v15  ;;  %v386_v37 = vpop.f32.mrb[7].mxu1  ;;  %v591_v34 = vadd.f32 %v6322_v29, %v6347_v41 }
  0xe9   :  { %v6337_v38 = vadd.f32 %v4886_v15, %v386_v37 }
  0xed   :  { %v466_v44 = vpop.f32.mrb[8].mxu1 }
  0xee   :  { %v479_v45 = vadd.f32 %v477_v39, %v466_v44  ;;  %v468_v46 = vpop.f32.mrb[9].mxu1 }
  0xef   :  { %v470_v48 = vpop.f32.mrb[10].mxu1 }
  0xf0   :  { %v481_v49 = vmul.f32 %v479_v45, %v6351_v43  ;;  %v472_v50 = vpop.f32.mrb[11].mxu1 }
  0xf1   :  { %v480_v51 = vadd.f32 %v478_v47, %v472_v50 }
  0xf2   :  { %5968 = vtanh.f32 %v481_v49 }
  0xf3   :  { %v482_v52 = vmul.f32 %v480_v51, %v6351_v43 }
  0xf5   :  { %5970 = vtanh.f32 %v482_v52 }
  0xfc   :  { %v5969_v53 = vpop.eup %5968 }
  0xfd   :  { %v485_v54 = vmul.f32 0.5, %v5969_v53 }
  0xff   :  { %v5971_v55 = vpop.eup %5970  ;;  %v487_v56 = vadd.f32 0.5, %v485_v54 }
 0x100   :  { %v486_v57 = vmul.f32 0.5, %v5971_v55 }
 0x101   :  { %v491_v58 = vsel %vm6340_vm3, %v5969_v53, %v487_v56 }
 0x102   :  { %497 = vrot.lane.b32.xlu0 %v491_v58, %s6190_s5  ;;  %v488_v59 = vadd.f32 0.5, %v486_v57  ;;  %v493_v2 = vmul.f32 0.0, %v491_v58 }
 0x104   :  { %v492_v60 = vsel %vm6340_vm3, %v5971_v55, %v488_v59 }
 0x105   :  { %v494_v7 = vmul.f32 0.0, %v492_v60 }
 0x106   :  { %499 = vrot.lane.b32.xlu0 %v492_v60, %s6190_s5 }
 0x174   :  { %v498_v61 = vpop.permute.xlu0 %497 }
 0x175   :  { %v503_v62 = vmul.f32 %v498_v61, %v491_v58 }
 0x177   :  { %507 = vrot.lane.b32.xlu1 %v503_v62, %s6191_s29  ;;  %v5938_v62 = vld [vmem:[%s7754_s0 + $0x10] sm:$0xff]  }
 0x178   :  { %v500_v63 = vpop.permute.xlu0 %499  ;;  %5259 = vmatprep.mubr.msk.bf16.mxu0 %vm155_vm0, %v5938_v62 }
 0x179   :  { %v504_v0 = vmul.f32 %v500_v63, %v492_v60  ;;  %v5939_v63 = vld [vmem:[%s7754_s0 + $0x18] sm:$0xff]  }
 0x17a   :  { %5260 = vmatmul.mubr.msk.bf16.gmra.mrb[4].mxu0 %vm155_vm0, %v5939_v63 }
 0x17b   :  { %509 = vrot.lane.b32.xlu1 %v504_v0, %s6191_s29  ;;  %v5940_v0 = vld [vmem:[%s7754_s0 + $0x20] sm:$0xff]  }
 0x17c   :  { %5263 = vmatprep.mubr.msk.bf16.mxu0 %vm155_vm0, %v5940_v0 }
 0x1e9   :  { %v508_v3 = vpop.permute.xlu1 %507 }
 0x1ea   :  { %v513_v4 = vadd.f32 %v508_v3, %v493_v2  ;;  %v5941_v3 = vld [vmem:[%s7754_s0 + $0x28] sm:$0xff]  }
 0x1eb   :  { %5264 = vmatmul.mubr.msk.bf16.gmra.mrb[8].mxu0 %vm155_vm0, %v5941_v3 }
 0x1ec   :  { %5972 = vtanh.f32 %v513_v4 }
 0x1ed   :  { %v510_v8 = vpop.permute.xlu1 %509 }
 0x1ee   :  { %v514_v9 = vadd.f32 %v510_v8, %v494_v7  ;;  %v5942_v7 = vld [vmem:[%s7754_s0 + $0x30] sm:$0xff]   ;;  %v5943_v8 = vld [vmem:[%s7754_s0 + $0x38] sm:$0xff]  }
 0x1ef   :  { %5267 = vmatprep.mubr.msk.bf16.mxu0 %vm155_vm0, %v5942_v7 }
 0x1f0   :  { %5974 = vtanh.f32 %v514_v9 }
 0x1f3   :  { %5268 = vmatmul.mubr.msk.bf16.gmra.mrb[12].mxu0 %vm155_vm0, %v5943_v8 }
 0x1f4   :  { %687 = vmatprep.mubr.bf16.mxu0 %v6188_v1 }
 0x1f6   :  { %v5973_v12 = vpop.eup %5972 }
 0x1f7   :  { %519 = vrot.lane.b32.xlu0 %v5973_v12, %s6190_s5 }
 0x1fa   :  { %v5975_v13 = vpop.eup %5974 }
 0x1fb   :  { %521 = vrot.lane.b32.xlu1 %v5975_v13, %s6190_s5 }
 0x269   :  { %v520_v14 = vpop.permute.xlu0 %519 }
 0x26a   :  { %v6366_v16 = vmul.f32 %v520_v14, %v491_v58 }
 0x26d   :  { %v522_v15 = vpop.permute.xlu1 %521 }
 0x26e   :  { %v6368_v18 = vmul.f32 %v522_v15, %v492_v60 }
 0x270   :  { %v538_v20 = vpack.c.bf16 %v6368_v18, %v6366_v16 }
 0x272   :  { %540 = vrot.lane.b32.xlu0 %v538_v20, %s6191_s29  ;;  %v6433_v20 = vpop.f32.mrb[4].mxu0 }
 0x2e4   :  { %v541_v23 = vpop.permute.xlu0 %540 }
 0x2e5   :  { %4901 = vmatmul.mubr.msk.bf16.vlgmr.msra.gmra.mrb[12].mxu1 %vm155_vm0, %v541_v23  ;;  %v230_v23 = vpop.f32.mrb[5].mxu0 }
 0x2e6   :  { %766 = vmatpush1.bf16.msra.mxu1 %v6254_v6  ;;  %797 = vmatprep.mubr.bf16.mxu1 %v6188_v1 }
 0x2e7   :  { %767 = vmatprep.subr.bf16.mxu1 %v6270_v10 }
 0x2ea   :  { %768 = vmatpush1.bf16.msra.mxu1 %v6275_v11 }
 0x2eb   :  { %985 = vmatprep.subr.bf16.mxu1 %v6249_v5 }
 0x3b8   :  { %v579_v28 = vpop.f32.mrb[12].mxu1 }
 0x3b9   :  { %v592_v31 = vadd.f32 %v590_v27, %v579_v28  ;;  %v581_v32 = vpop.f32.mrb[13].mxu1  ;;  %v6435_v27 = vpop.f32.mrb[6].mxu0 }
 0x3ba   :  { %v583_v37 = vpop.f32.mrb[14].mxu1  ;;  %v233_v28 = vpop.f32.mrb[7].mxu0 }
 0x3bb   :  { %v594_v39 = vmul.f32 %v592_v31, %v6351_v43  ;;  %v585_v42 = vpop.f32.mrb[15].mxu1  ;;  %v6437_v31 = vpop.f32.mrb[8].mxu0 }
 0x3bc   :  { %v593_v44 = vadd.f32 %v591_v34, %v585_v42  ;;  %v6439_v32 = vpop.f32.mrb[9].mxu0 }
 0x3bd   :  { %5976 = vtanh.f32 %v594_v39  ;;  %v6441_v34 = vpop.f32.mrb[10].mxu0 }
 0x3be   :  { %v595_v45 = vmul.f32 %v593_v44, %v6351_v43  ;;  %v6443_v37 = vpop.f32.mrb[11].mxu0 }
 0x3bf   :  { %v6445_v39 = vpop.f32.mrb[12].mxu0 }
 0x3c0   :  { %5978 = vtanh.f32 %v595_v45  ;;  %v6447_v42 = vpop.f32.mrb[13].mxu0 }
 0x3c1   :  { %v6449_v44 = vpop.f32.mrb[14].mxu0 }
 0x3c2   :  { %v6451_v45 = vpop.f32.mrb[15].mxu0 }
 0x3c7   :  { %v5977_v46 = vpop.eup %5976 }
 0x3c8   :  { %v598_v47 = vmul.f32 0.5, %v5977_v46 }
 0x3ca   :  { %v5979_v48 = vpop.eup %5978  ;;  %v600_v49 = vadd.f32 0.5, %v598_v47  ;;  %v700_v47 = vadd.f32 %v230_v23, %v6331_v35 }
 0x3cb   :  { %v599_v25 = vmul.f32 0.5, %v5979_v48 }
 0x3cc   :  { %v602_v50 = vsel %vm6340_vm3, %v5977_v46, %v600_v49 }
 0x3cd   :  { %608 = vrot.lane.b32.xlu1 %v602_v50, %s6190_s5  ;;  %v601_v29 = vadd.f32 0.5, %v599_v25  ;;  %v604_v56 = vmul.f32 %v602_v50, %v513_v4 }
 0x3cf   :  { %v603_v51 = vsel %vm6340_vm3, %v5979_v48, %v601_v29 }
 0x3d0   :  { %610 = vrot.lane.b32.xlu0 %v603_v51, %s6190_s5  ;;  %v605_v59 = vmul.f32 %v603_v51, %v514_v9 }
 0x43f   :  { %v609_v52 = vpop.permute.xlu1 %608 }
 0x440   :  { %v614_v53 = vmul.f32 %v609_v52, %v602_v50 }
 0x442   :  { %618 = vrot.lane.b32.xlu1 %v614_v53, %s6191_s29  ;;  %v611_v54 = vpop.permute.xlu0 %610 }
 0x443   :  { %v615_v55 = vmul.f32 %v611_v54, %v603_v51 }
 0x445   :  { %620 = vrot.lane.b32.xlu0 %v615_v55, %s6191_s29 }
 0x4b4   :  { %v619_v57 = vpop.permute.xlu1 %618 }
 0x4b5   :  { %v6393_v58 = vadd.f32 %v619_v57, %v604_v56 }
 0x4b7   :  { %5980 = vtanh.f32 %v6393_v58  ;;  %v621_v60 = vpop.permute.xlu0 %620 }
 0x4b8   :  { %v6396_v61 = vadd.f32 %v621_v60, %v605_v59 }
 0x4ba   :  { %5982 = vtanh.f32 %v6396_v61 }
 0x4c1   :  { %v5981_v2 = vpop.eup %5980 }
 0x4c2   :  { %630 = vrot.lane.b32.xlu1 %v5981_v2, %s6190_s5 }
 0x4c4   :  { %v5983_v4 = vpop.eup %5982 }
 0x4c5   :  { %632 = vrot.lane.b32.xlu0 %v5983_v4, %s6190_s5 }
 0x534   :  { %v631_v9 = vpop.permute.xlu1 %630 }
 0x535   :  { %v6426_v13 = vmul.f32 %v631_v9, %v602_v50  ;;  %v701_v50 = vadd.f32 %v233_v28, %v6347_v41 }
 0x537   :  { %v633_v12 = vpop.permute.xlu0 %632 }
 0x538   :  { %v6428_v14 = vmul.f32 %v633_v12, %v603_v51 }
 0x53a   :  { %v648_v15 = vpack.c.bf16 %v6428_v14, %v6426_v13 }
 0x53c   :  { %650 = vrot.lane.b32.xlu1 %v648_v15, %s6191_s29 }
 0x5ae   :  { %v651_v46 = vpop.permute.xlu1 %650 }
 0x5af   :  { %4902 = vmatmul.mubr.msk.bf16.vlgmr.msra.gmra.mrb[16].mxu0 %vm155_vm0, %v651_v46 }
 0x5b0   :  { %876 = vmatpush1.bf16.msra.mxu0 %v6254_v6  ;;  %907 = vmatprep.mubr.bf16.mxu0 %v6188_v1 }
 0x5b1   :  { %877 = vmatprep.subr.bf16.mxu0 %v6270_v10 }
 0x5b4   :  { %878 = vmatpush1.bf16.msra.mxu0 %v6275_v11 }
 0x5b5   :  { %1095 = vmatprep.subr.bf16.mxu0 %v6249_v5 }
 0x682   :  { %v689_v48 = vpop.f32.mrb[16].mxu0 }
 0x683   :  { %v702_v49 = vadd.f32 %v700_v47, %v689_v48  ;;  %v691_v25 = vpop.f32.mrb[17].mxu0 }
 0x684   :  { %v693_v29 = vpop.f32.mrb[18].mxu0 }
 0x685   :  { %v704_v51 = vmul.f32 %v702_v49, %v6351_v43  ;;  %v695_v52 = vpop.f32.mrb[19].mxu0  ;;  %v810_v29 = vadd.f32 %v6433_v20, %v6331_v35 }
 0x686   :  { %v703_v53 = vadd.f32 %v701_v50, %v695_v52 }
 0x687   :  { %5984 = vtanh.f32 %v704_v51 }
 0x688   :  { %v705_v54 = vmul.f32 %v703_v53, %v6351_v43 }
 0x68a   :  { %5986 = vtanh.f32 %v705_v54  ;;  %v811_v54 = vadd.f32 %v6435_v27, %v6347_v41 }
 0x691   :  { %v5985_v55 = vpop.eup %5984 }
 0x692   :  { %v708_v56 = vmul.f32 0.5, %v5985_v55 }
 0x694   :  { %v5987_v57 = vpop.eup %5986  ;;  %v710_v59 = vadd.f32 0.5, %v708_v56 }
 0x695   :  { %v709_v60 = vmul.f32 0.5, %v5987_v57 }
 0x696   :  { %v712_v62 = vsel %vm6340_vm3, %v5985_v55, %v710_v59 }
 0x697   :  { %718 = vrot.lane.b32.xlu0 %v712_v62, %s6190_s5  ;;  %v711_v63 = vadd.f32 0.5, %v709_v60  ;;  %v714_v8 = vmul.f32 %v712_v62, %v6393_v58 }
 0x699   :  { %v713_v0 = vsel %vm6340_vm3, %v5987_v57, %v711_v63 }
 0x69a   :  { %720 = vrot.lane.b32.xlu1 %v713_v0, %s6190_s5  ;;  %v715_v15 = vmul.f32 %v713_v0, %v6396_v61 }
 0x709   :  { %v719_v2 = vpop.permute.xlu0 %718 }
 0x70a   :  { %v724_v3 = vmul.f32 %v719_v2, %v712_v62 }
 0x70c   :  { %728 = vrot.lane.b32.xlu0 %v724_v3, %s6191_s29  ;;  %v721_v4 = vpop.permute.xlu1 %720 }
 0x70d   :  { %v725_v7 = vmul.f32 %v721_v4, %v713_v0 }
 0x70f   :  { %730 = vrot.lane.b32.xlu1 %v725_v7, %s6191_s29 }
 0x77e   :  { %v729_v9 = vpop.permute.xlu0 %728 }
 0x77f   :  { %v734_v12 = vadd.f32 %v729_v9, %v714_v8 }
 0x781   :  { %5988 = vtanh.f32 %v734_v12  ;;  %v731_v23 = vpop.permute.xlu1 %730 }
 0x782   :  { %v735_v28 = vadd.f32 %v731_v23, %v715_v15 }
 0x784   :  { %5990 = vtanh.f32 %v735_v28 }
 0x78b   :  { %v5989_v46 = vpop.eup %5988 }
 0x78c   :  { %740 = vrot.lane.b32.xlu0 %v5989_v46, %s6190_s5 }
 0x78e   :  { %v5991_v47 = vpop.eup %5990 }
 0x78f   :  { %742 = vrot.lane.b32.xlu1 %v5991_v47, %s6190_s5 }
 0x7fe   :  { %v741_v48 = vpop.permute.xlu0 %740 }
 0x7ff   :  { %v6475_v25 = vmul.f32 %v741_v48, %v712_v62 }
 0x801   :  { %v743_v49 = vpop.permute.xlu1 %742 }
 0x802   :  { %v6477_v50 = vmul.f32 %v743_v49, %v713_v0 }
 0x804   :  { %v758_v58 = vpack.c.bf16 %v6477_v50, %v6475_v25 }
 0x806   :  { %760 = vrot.lane.b32.xlu0 %v758_v58, %s6191_s29 }
 0x878   :  { %v761_v61 = vpop.permute.xlu0 %760 }
 0x879   :  { %4903 = vmatmul.mubr.msk.bf16.vlgmr.msra.gmra.mrb[16].mxu1 %vm155_vm0, %v761_v61 }
 0x87a   :  { %986 = vmatpush1.bf16.msra.mxu1 %v6254_v6  ;;  %1017 = vmatprep.mubr.bf16.mxu1 %v6188_v1 }
 0x87b   :  { %987 = vmatprep.subr.bf16.mxu1 %v6270_v10 }
 0x87e   :  { %988 = vmatpush1.bf16.msra.mxu1 %v6275_v11 }
 0x87f   :  { %1205 = vmatprep.subr.bf16.mxu1 %v6249_v5 }
 0x94c   :  { %v799_v51 = vpop.f32.mrb[16].mxu1 }
 0x94d   :  { %v812_v52 = vadd.f32 %v810_v29, %v799_v51  ;;  %v801_v53 = vpop.f32.mrb[17].mxu1 }
 0x94e   :  { %v803_v55 = vpop.f32.mrb[18].mxu1 }
 0x94f   :  { %v814_v56 = vmul.f32 %v812_v52, %v6351_v43  ;;  %v805_v57 = vpop.f32.mrb[19].mxu1 }
 0x950   :  { %v813_v59 = vadd.f32 %v811_v54, %v805_v57  ;;  %v920_v54 = vadd.f32 %v6439_v32, %v6331_v35 }
 0x951   :  { %5992 = vtanh.f32 %v814_v56 }
 0x952   :  { %v815_v60 = vmul.f32 %v813_v59, %v6351_v43  ;;  %v921_v59 = vadd.f32 %v6443_v37, %v6347_v41 }
 0x954   :  { %5994 = vtanh.f32 %v815_v60 }
 0x95b   :  { %v5993_v62 = vpop.eup %5992 }
 0x95c   :  { %v818_v5 = vmul.f32 0.5, %v5993_v62 }
 0x95e   :  { %v5995_v63 = vpop.eup %5994  ;;  %v820_v0 = vadd.f32 0.5, %v818_v5 }
 0x95f   :  { %v819_v20 = vmul.f32 0.5, %v5995_v63 }
 0x960   :  { %v822_v2 = vsel %vm6340_vm3, %v5993_v62, %v820_v0 }
 0x961   :  { %828 = vrot.lane.b32.xlu1 %v822_v2, %s6190_s5  ;;  %v821_v27 = vadd.f32 0.5, %v819_v20  ;;  %v824_v15 = vmul.f32 %v822_v2, %v734_v12 }
 0x963   :  { %v823_v3 = vsel %vm6340_vm3, %v5995_v63, %v821_v27 }
 0x964   :  { %830 = vrot.lane.b32.xlu0 %v823_v3, %s6190_s5  ;;  %v825_v47 = vmul.f32 %v823_v3, %v735_v28 }
 0x9d3   :  { %v829_v4 = vpop.permute.xlu1 %828 }
 0x9d4   :  { %v834_v7 = vmul.f32 %v829_v4, %v822_v2 }
 0x9d6   :  { %838 = vrot.lane.b32.xlu1 %v834_v7, %s6191_s29  ;;  %v831_v8 = vpop.permute.xlu0 %830 }
 0x9d7   :  { %v835_v9 = vmul.f32 %v831_v8, %v823_v3 }
 0x9d9   :  { %840 = vrot.lane.b32.xlu0 %v835_v9, %s6191_s29 }
 0xa48   :  { %v839_v23 = vpop.permute.xlu1 %838 }
 0xa49   :  { %v844_v46 = vadd.f32 %v839_v23, %v824_v15 }
 0xa4b   :  { %5996 = vtanh.f32 %v844_v46  ;;  %v841_v48 = vpop.permute.xlu0 %840 }
 0xa4c   :  { %v845_v49 = vadd.f32 %v841_v48, %v825_v47 }
 0xa4e   :  { %5998 = vtanh.f32 %v845_v49 }
 0xa55   :  { %v5997_v58 = vpop.eup %5996 }
 0xa56   :  { %850 = vrot.lane.b32.xlu1 %v5997_v58, %s6190_s5 }
 0xa58   :  { %v5999_v61 = vpop.eup %5998 }
 0xa59   :  { %852 = vrot.lane.b32.xlu0 %v5999_v61, %s6190_s5 }
 0xac8   :  { %v851_v29 = vpop.permute.xlu1 %850 }
 0xac9   :  { %v6504_v52 = vmul.f32 %v851_v29, %v822_v2 }
 0xacb   :  { %v853_v51 = vpop.permute.xlu0 %852 }
 0xacc   :  { %v6506_v53 = vmul.f32 %v853_v51, %v823_v3 }
 0xace   :  { %v868_v12 = vpack.c.bf16 %v6506_v53, %v6504_v52 }
 0xad0   :  { %870 = vrot.lane.b32.xlu1 %v868_v12, %s6191_s29 }
 0xb42   :  { %v871_v28 = vpop.permute.xlu1 %870 }
 0xb43   :  { %4904 = vmatmul.mubr.msk.bf16.vlgmr.msra.gmra.mrb[20].mxu0 %vm155_vm0, %v871_v28 }
 0xb44   :  { %1096 = vmatpush1.bf16.msra.mxu0 %v6254_v6  ;;  %1127 = vmatprep.mubr.bf16.mxu0 %v6188_v1 }
 0xb45   :  { %1097 = vmatprep.subr.bf16.mxu0 %v6270_v10 }
 0xb48   :  { %1098 = vmatpush1.bf16.msra.mxu0 %v6275_v11 }
 0xc16   :  { %v909_v55 = vpop.f32.mrb[20].mxu0 }
 0xc17   :  { %v922_v56 = vadd.f32 %v920_v54, %v909_v55  ;;  %v911_v57 = vpop.f32.mrb[21].mxu0 }
 0xc18   :  { %v913_v60 = vpop.f32.mrb[22].mxu0 }
 0xc19   :  { %v924_v62 = vmul.f32 %v922_v56, %v6351_v43  ;;  %v915_v5 = vpop.f32.mrb[23].mxu0 }
 0xc1a   :  { %v923_v63 = vadd.f32 %v921_v59, %v915_v5  ;;  %v1030_v59 = vadd.f32 %v6437_v31, %v6331_v35 }
 0xc1b   :  { %6000 = vtanh.f32 %v924_v62 }
 0xc1c   :  { %v925_v0 = vmul.f32 %v923_v63, %v6351_v43  ;;  %v1031_v63 = vadd.f32 %v6441_v34, %v6347_v41 }
 0xc1e   :  { %6002 = vtanh.f32 %v925_v0 }
 0xc25   :  { %v6001_v20 = vpop.eup %6000 }
 0xc26   :  { %v928_v2 = vmul.f32 0.5, %v6001_v20 }
 0xc28   :  { %v6003_v27 = vpop.eup %6002  ;;  %v930_v3 = vadd.f32 0.5, %v928_v2 }
 0xc29   :  { %v929_v32 = vmul.f32 0.5, %v6003_v27 }
 0xc2a   :  { %v932_v4 = vsel %vm6340_vm3, %v6001_v20, %v930_v3 }
 0xc2b   :  { %938 = vrot.lane.b32.xlu0 %v932_v4, %s6190_s5  ;;  %v931_v37 = vadd.f32 0.5, %v929_v32  ;;  %v934_v47 = vmul.f32 %v932_v4, %v844_v46 }
 0xc2d   :  { %v933_v7 = vsel %vm6340_vm3, %v6003_v27, %v931_v37 }
 0xc2e   :  { %940 = vrot.lane.b32.xlu1 %v933_v7, %s6190_s5  ;;  %v935_v61 = vmul.f32 %v933_v7, %v845_v49 }
 0xc9d   :  { %v939_v8 = vpop.permute.xlu0 %938 }
 0xc9e   :  { %v944_v9 = vmul.f32 %v939_v8, %v932_v4 }
 0xca0   :  { %948 = vrot.lane.b32.xlu0 %v944_v9, %s6191_s29  ;;  %v941_v15 = vpop.permute.xlu1 %940 }
 0xca1   :  { %v945_v23 = vmul.f32 %v941_v15, %v933_v7 }
 0xca3   :  { %950 = vrot.lane.b32.xlu1 %v945_v23, %s6191_s29 }
 0xd12   :  { %v949_v48 = vpop.permute.xlu0 %948 }
 0xd13   :  { %v954_v58 = vadd.f32 %v949_v48, %v934_v47 }
 0xd15   :  { %6004 = vtanh.f32 %v954_v58  ;;  %v951_v29 = vpop.permute.xlu1 %950 }
 0xd16   :  { %v955_v51 = vadd.f32 %v951_v29, %v935_v61 }
 0xd18   :  { %6006 = vtanh.f32 %v955_v51 }
 0xd1f   :  { %v6005_v12 = vpop.eup %6004 }
 0xd20   :  { %960 = vrot.lane.b32.xlu0 %v6005_v12, %s6190_s5 }
 0xd22   :  { %v6007_v28 = vpop.eup %6006 }
 0xd23   :  { %962 = vrot.lane.b32.xlu1 %v6007_v28, %s6190_s5 }
 0xd92   :  { %v961_v54 = vpop.permute.xlu0 %960 }
 0xd93   :  { %v6532_v56 = vmul.f32 %v961_v54, %v932_v4 }
 0xd95   :  { %v963_v55 = vpop.permute.xlu1 %962 }
 0xd96   :  { %v6534_v57 = vmul.f32 %v963_v55, %v933_v7 }
 0xd98   :  { %v978_v46 = vpack.c.bf16 %v6534_v57, %v6532_v56 }
 0xd9a   :  { %980 = vrot.lane.b32.xlu0 %v978_v46, %s6191_s29 }
 0xe0c   :  { %v981_v49 = vpop.permute.xlu0 %980 }
 0xe0d   :  { %4905 = vmatmul.mubr.msk.bf16.vlgmr.msra.gmra.mrb[20].mxu1 %vm155_vm0, %v981_v49 }
 0xe0e   :  { %1206 = vmatpush1.bf16.msra.mxu1 %v6254_v6  ;;  %1237 = vmatprep.mubr.bf16.mxu1 %v6188_v1 }
 0xe0f   :  { %1207 = vmatprep.subr.bf16.mxu1 %v6270_v10 }
 0xe12   :  { %1208 = vmatpush1.bf16.msra.mxu1 %v6275_v11 }
 0xee0   :  { %v1019_v60 = vpop.f32.mrb[20].mxu1 }
 0xee1   :  { %v1032_v62 = vadd.f32 %v1030_v59, %v1019_v60  ;;  %v1021_v5 = vpop.f32.mrb[21].mxu1  ;;  %v1140_v60 = vadd.f32 %v6447_v42, %v6331_v35 }
 0xee2   :  { %v1023_v0 = vpop.f32.mrb[22].mxu1 }
 0xee3   :  { %v1034_v20 = vmul.f32 %v1032_v62, %v6351_v43  ;;  %v1025_v2 = vpop.f32.mrb[23].mxu1  ;;  %v1141_v0 = vadd.f32 %v6451_v45, %v6347_v41 }
 0xee4   :  { %v1033_v6 = vadd.f32 %v1031_v63, %v1025_v2 }
 0xee5   :  { %6008 = vtanh.f32 %v1034_v20 }
 0xee6   :  { %v1035_v27 = vmul.f32 %v1033_v6, %v6351_v43 }
 0xee8   :  { %6010 = vtanh.f32 %v1035_v27 }
 0xeef   :  { %v6009_v10 = vpop.eup %6008 }
 0xef0   :  { %v1038_v11 = vmul.f32 0.5, %v6009_v10 }
 0xef2   :  { %v6011_v3 = vpop.eup %6010  ;;  %v1040_v32 = vadd.f32 0.5, %v1038_v11 }
 0xef3   :  { %v1039_v31 = vmul.f32 0.5, %v6011_v3 }
 0xef4   :  { %v1042_v4 = vsel %vm6340_vm3, %v6009_v10, %v1040_v32 }
 0xef5   :  { %1048 = vrot.lane.b32.xlu1 %v1042_v4, %s6190_s5  ;;  %v1041_v34 = vadd.f32 0.5, %v1039_v31  ;;  %v1044_v23 = vmul.f32 %v1042_v4, %v954_v58 }
 0xef7   :  { %v1043_v37 = vsel %vm6340_vm3, %v6011_v3, %v1041_v34 }
 0xef8   :  { %1050 = vrot.lane.b32.xlu0 %v1043_v37, %s6190_s5  ;;  %v1045_v61 = vmul.f32 %v1043_v37, %v955_v51 }
 0xf67   :  { %v1049_v7 = vpop.permute.xlu1 %1048 }
 0xf68   :  { %v1054_v8 = vmul.f32 %v1049_v7, %v1042_v4 }
 0xf6a   :  { %1058 = vrot.lane.b32.xlu1 %v1054_v8, %s6191_s29  ;;  %v1051_v9 = vpop.permute.xlu0 %1050 }
 0xf6b   :  { %v1055_v15 = vmul.f32 %v1051_v9, %v1043_v37 }
 0xf6d   :  { %1060 = vrot.lane.b32.xlu0 %v1055_v15, %s6191_s29 }
 0xfdc   :  { %v1059_v47 = vpop.permute.xlu1 %1058 }
 0xfdd   :  { %v1064_v48 = vadd.f32 %v1059_v47, %v1044_v23 }
 0xfdf   :  { %6012 = vtanh.f32 %v1064_v48  ;;  %v1061_v29 = vpop.permute.xlu0 %1060 }
 0xfe0   :  { %v1065_v12 = vadd.f32 %v1061_v29, %v1045_v61 }
 0xfe2   :  { %6014 = vtanh.f32 %v1065_v12 }
 0xfe9   :  { %v6013_v28 = vpop.eup %6012 }
 0xfea   :  { %1070 = vrot.lane.b32.xlu1 %v6013_v28, %s6190_s5 }
 0xfec   :  { %v6015_v54 = vpop.eup %6014 }
 0xfed   :  { %1072 = vrot.lane.b32.xlu0 %v6015_v54, %s6190_s5 }
0x105c   :  { %v1071_v55 = vpop.permute.xlu1 %1070 }
0x105d   :  { %v6560_v49 = vmul.f32 %v1071_v55, %v1042_v4 }
0x105f   :  { %v1073_v46 = vpop.permute.xlu0 %1072 }
0x1060   :  { %v6562_v59 = vmul.f32 %v1073_v46, %v1043_v37 }
0x1062   :  { %v1088_v58 = vpack.c.bf16 %v6562_v59, %v6560_v49 }
0x1064   :  { %1090 = vrot.lane.b32.xlu1 %v1088_v58, %s6191_s29 }
0x10d6   :  { %v1091_v51 = vpop.permute.xlu1 %1090 }
0x10d7   :  { %4906 = vmatmul.mubr.msk.bf16.vlgmr.msra.gmra.mrb[24].mxu0 %vm155_vm0, %v1091_v51 }
0x11aa   :  { %v1129_v62 = vpop.f32.mrb[24].mxu0 }
0x11ab   :  { %v1142_v5 = vadd.f32 %v1140_v60, %v1129_v62  ;;  %v1131_v63 = vpop.f32.mrb[25].mxu0  ;;  %v1250_v62 = vadd.f32 %v6445_v39, %v6331_v35 }
0x11ac   :  { %v1133_v20 = vpop.f32.mrb[26].mxu0 }
0x11ad   :  { %v1144_v2 = vmul.f32 %v1142_v5, %v6351_v43  ;;  %v1135_v6 = vpop.f32.mrb[27].mxu0  ;;  %v1251_v20 = vadd.f32 %v6449_v44, %v6347_v41 }
0x11ae   :  { %v1143_v27 = vadd.f32 %v1141_v0, %v1135_v6 }
0x11af   :  { %6016 = vtanh.f32 %v1144_v2 }
0x11b0   :  { %v1145_v10 = vmul.f32 %v1143_v27, %v6351_v43 }
0x11b2   :  { %6018 = vtanh.f32 %v1145_v10 }
0x11b9   :  { %v6017_v11 = vpop.eup %6016 }
0x11ba   :  { %v1148_v3 = vmul.f32 0.5, %v6017_v11 }
0x11bc   :  { %v6019_v32 = vpop.eup %6018  ;;  %v1150_v31 = vadd.f32 0.5, %v1148_v3 }
0x11bd   :  { %v1149_v42 = vmul.f32 0.5, %v6019_v32 }
0x11be   :  { %v1152_v4 = vsel %vm6340_vm3, %v6017_v11, %v1150_v31 }
0x11bf   :  { %1158 = vrot.lane.b32.xlu0 %v1152_v4, %s6190_s5  ;;  %v1151_v45 = vadd.f32 0.5, %v1149_v42  ;;  %v1154_v15 = vmul.f32 %v1152_v4, %v1064_v48 }
0x11c1   :  { %v1153_v34 = vsel %vm6340_vm3, %v6019_v32, %v1151_v45 }
0x11c2   :  { %1160 = vrot.lane.b32.xlu1 %v1153_v34, %s6190_s5  ;;  %v1155_v61 = vmul.f32 %v1153_v34, %v1065_v12 }
0x1231   :  { %v1159_v37 = vpop.permute.xlu0 %1158 }
0x1232   :  { %v1164_v7 = vmul.f32 %v1159_v37, %v1152_v4 }
0x1234   :  { %1168 = vrot.lane.b32.xlu0 %v1164_v7, %s6191_s29  ;;  %v1161_v8 = vpop.permute.xlu1 %1160 }
0x1235   :  { %v1165_v9 = vmul.f32 %v1161_v8, %v1153_v34 }
0x1237   :  { %1170 = vrot.lane.b32.xlu1 %v1165_v9, %s6191_s29 }
0x12a6   :  { %v1169_v23 = vpop.permute.xlu0 %1168 }
0x12a7   :  { %v1174_v47 = vadd.f32 %v1169_v23, %v1154_v15 }
0x12a9   :  { %6020 = vtanh.f32 %v1174_v47  ;;  %v1171_v29 = vpop.permute.xlu1 %1170 }
0x12aa   :  { %v1175_v28 = vadd.f32 %v1171_v29, %v1155_v61 }
0x12ac   :  { %6022 = vtanh.f32 %v1175_v28 }
0x12b3   :  { %v6021_v54 = vpop.eup %6020 }
0x12b4   :  { %1180 = vrot.lane.b32.xlu0 %v6021_v54, %s6190_s5 }
0x12b6   :  { %v6023_v55 = vpop.eup %6022 }
0x12b7   :  { %1182 = vrot.lane.b32.xlu1 %v6023_v55, %s6190_s5  ;;  %v5944_v55 = vld [vmem:[%s7751_s3 + $0x50] sm:$0xff]  }
0x1326   :  { %v1181_v46 = vpop.permute.xlu0 %1180 }
0x1327   :  { %v6584_v51 = vmul.f32 %v1181_v46, %v1152_v4  ;;  %v5946_v46 = vld [vmem:[%s7751_s3 + $0x58] sm:$0xff]  }
0x1329   :  { %v1183_v58 = vpop.permute.xlu1 %1182 }
0x132a   :  { %v6586_v60 = vmul.f32 %v1183_v58, %v1153_v34  ;;  %v5947_v58 = vld [vmem:[%s7751_s3 + $0x78] sm:$0xff]  }
0x132c   :  { %v1198_v48 = vpack.c.bf16 %v6586_v60, %v6584_v51 }
0x132e   :  { %1200 = vrot.lane.b32.xlu0 %v1198_v48, %s6191_s29  ;;  %v5948_v48 = vld [vmem:[%s7751_s3 + $0x60] sm:$0xff]  }
0x13a0   :  { %v1201_v12 = vpop.permute.xlu0 %1200 }
0x13a1   :  { %4907 = vmatmul.mubr.msk.bf16.vlgmr.msra.gmra.mrb[24].mxu1 %vm155_vm0, %v1201_v12  ;;  %v5949_v12 = vld [vmem:[%s7751_s3 + $0x80] sm:$0xff]  }
0x1474   :  { %v1239_v5 = vpop.f32.mrb[24].mxu1 }
0x1475   :  { %v1252_v63 = vadd.f32 %v1250_v62, %v1239_v5  ;;  %v1241_v0 = vpop.f32.mrb[25].mxu1  ;;  %v5950_v62 = vld [vmem:[%s7751_s3 + $0x68] sm:$0xff]  }
0x1476   :  { %v1243_v2 = vpop.f32.mrb[26].mxu1  ;;  %v5951_v5 = vld [vmem:[%s7751_s3 + $0x88] sm:$0xff]  }
0x1477   :  { %v1254_v6 = vmul.f32 %v1252_v63, %v6351_v43  ;;  %v1245_v27 = vpop.f32.mrb[27].mxu1 }
0x1478   :  { %v1253_v10 = vadd.f32 %v1251_v20, %v1245_v27  ;;  %v5954_v20 = vld [vmem:[%s7751_s3 + $0x90] sm:$0xff]  }
0x1479   :  { %6024 = vtanh.f32 %v1254_v6 }
0x147a   :  { %v1255_v11 = vmul.f32 %v1253_v10, %v6351_v43  ;;  %v5957_v10 = vld [vmem:[%s7751_s3 + $0xa8] sm:$0xff]  }
0x147c   :  { %6026 = vtanh.f32 %v1255_v11  ;;  %v6718_v11 = vld [vmem:[%s7751_s3 + $0x30] sm:$0xff]  }
0x1483   :  { %v6025_v3 = vpop.eup %6024 }
0x1484   :  { %v1258_v32 = vmul.f32 0.5, %v6025_v3 }
0x1486   :  { %v6027_v31 = vpop.eup %6026  ;;  %v1260_v42 = vadd.f32 0.5, %v1258_v32 }
0x1487   :  { %v1259_v35 = vmul.f32 0.5, %v6027_v31 }
0x1488   :  { %v1262_v39 = vsel %vm6340_vm3, %v6025_v3, %v1260_v42 }
0x1489   :  { %1268 = vrot.lane.b32.xlu1 %v1262_v39, %s6190_s5  ;;  %v1261_v41 = vadd.f32 0.5, %v1259_v35  ;;  %v1264_v7 = vmul.f32 %v1262_v39, %v1174_v47  ;;  %v5945_v47 = vld [vmem:[%s7751_s3 + $0x70] sm:$0xff]  }
0x148b   :  { %v1263_v44 = vsel %vm6340_vm3, %v6027_v31, %v1261_v41  ;;  %v6728_v31 = vld [vmem:[%s7751_s3 + $0x38] sm:$0xff]  }
0x148c   :  { %1270 = vrot.lane.b32.xlu0 %v1263_v44, %s6190_s5  ;;  %v1265_v15 = vmul.f32 %v1263_v44, %v1175_v28  ;;  %v6192_v28 = vmov 0.0  }
0x148d   :  { %5283 = vmatprep.subr.bf16.mxu0 %v6192_v28  ;;  %5295 = vmatprep.subr.bf16.mxu1 %v6192_v28 }
0x148e   :  { %5284 = vmatpush3.bf16.msra.mxu0 %v5944_v55  ;;  %5296 = vmatpush3.bf16.msra.mxu1 %v5945_v47 }
0x148f   :  { %5285 = vmatprep.subr.bf16.mxu0 %v6192_v28  ;;  %5297 = vmatprep.subr.bf16.mxu1 %v6192_v28 }
0x1490   :  { %5291 = vmatprep.mubr.msk.bf16.mxu0 %vm6193_vm4, %v6192_v28  ;;  %5303 = vmatprep.mubr.msk.bf16.mxu1 %vm6193_vm4, %v6192_v28 }
0x1492   :  { %5286 = vmatpush3.bf16.msra.mxu0 %v5946_v46  ;;  %5298 = vmatpush3.bf16.msra.mxu1 %v5947_v58 }
0x1493   :  { %5287 = vmatprep.subr.bf16.mxu0 %v6192_v28  ;;  %5299 = vmatprep.subr.bf16.mxu1 %v6192_v28 }
0x1496   :  { %5288 = vmatpush3.bf16.msra.mxu0 %v5948_v48  ;;  %5300 = vmatpush3.bf16.msra.mxu1 %v5949_v12 }
0x1497   :  { %5289 = vmatprep.subr.bf16.mxu0 %v6192_v28  ;;  %5301 = vmatprep.subr.bf16.mxu1 %v6192_v28 }
0x149a   :  { %5290 = vmatpush3.bf16.msra.mxu0 %v5950_v62  ;;  %5302 = vmatpush3.bf16.msra.mxu1 %v5951_v5 }
0x149b   :  { %5323 = vmatprep.subr.bf16.mxu1 %v6192_v28  ;;  %5307 = vmatprep.subr.bf16.mxu0 %v5954_v20 }
0x14fb   :  { %v1269_v4 = vpop.permute.xlu1 %1268 }
0x14fc   :  { %v1274_v45 = vmul.f32 %v1269_v4, %v1262_v39 }
0x14fe   :  { %1278 = vrot.lane.b32.xlu1 %v1274_v45, %s6191_s29  ;;  %v1271_v34 = vpop.permute.xlu0 %1270 }
0x14ff   :  { %v1275_v37 = vmul.f32 %v1271_v34, %v1263_v44 }
0x1501   :  { %1280 = vrot.lane.b32.xlu0 %v1275_v37, %s6191_s29 }
0x1570   :  { %v1279_v8 = vpop.permute.xlu1 %1278 }
0x1571   :  { %v1284_v9 = vadd.f32 %v1279_v8, %v1264_v7 }
0x1573   :  { %6028 = vtanh.f32 %v1284_v9  ;;  %v1281_v23 = vpop.permute.xlu0 %1280 }
0x1574   :  { %v6606_v61 = vadd.f32 %v1281_v23, %v1265_v15 }
0x1576   :  { %6030 = vtanh.f32 %v6606_v61 }
0x157d   :  { %v6029_v29 = vpop.eup %6028 }
0x157e   :  { %1290 = vrot.lane.b32.xlu1 %v6029_v29, %s6190_s5 }
0x1580   :  { %v6031_v54 = vpop.eup %6030 }
0x1581   :  { %1292 = vrot.lane.b32.xlu0 %v6031_v54, %s6190_s5 }
0x15f0   :  { %v1291_v63 = vpop.permute.xlu1 %1290 }
0x15f1   :  { %v1296_v0 = vmul.f32 %v1291_v63, %v1262_v39 }
0x15f3   :  { %1299 = vrot.lane.b32.xlu1 %v1296_v0, %s6191_s29  ;;  %v1293_v2 = vpop.permute.xlu0 %1292 }
0x15f4   :  { %v1297_v6 = vmul.f32 %v1293_v2, %v1263_v44 }
0x15f6   :  { %1304 = vrot.lane.b32.xlu0 %v1297_v6, %s6190_s5 }
0x15f7   :  { %1311 = vrot.lane.b32.xlu1 %v1284_v9, %s6194_s10 }
0x15fa   :  { %528 = vrot.lane.b32.xlu0 %v6366_v16, %s6191_s29 }
0x15fb   :  { %639 = vrot.lane.b32.xlu1 %v6426_v13, %s6191_s29 }
0x15fe   :  { %749 = vrot.lane.b32.xlu0 %v6475_v25, %s6191_s29 }
0x15ff   :  { %859 = vrot.lane.b32.xlu1 %v6504_v52, %s6191_s29 }
0x1602   :  { %1194 = vrot.lane.b32.xlu0 %v6586_v60, %s6190_s5 }
0x1603   :  { %974 = vrot.lane.b32.xlu1 %v6534_v57, %s6190_s5 }
0x1606   :  { %1084 = vrot.lane.b32.xlu0 %v6562_v59, %s6190_s5  ;;  %v6701_v59 = vld [vmem:[%s7751_s3 + $0x28] sm:$0xff]  }
0x1607   :  { %754 = vrot.lane.b32.xlu1 %v6477_v50, %s6190_s5 }
0x160a   :  { %864 = vrot.lane.b32.xlu0 %v6506_v53, %s6190_s5 }
0x160b   :  { %533 = vrot.lane.b32.xlu1 %v6368_v18, %s6190_s5 }
0x160e   :  { %644 = vrot.lane.b32.xlu0 %v6428_v14, %s6190_s5  ;;  %v6687_v14 = vld [vmem:[%s7751_s3 + $0x20] sm:$0xff]  }
0x160f   :  { %969 = vrot.lane.b32.xlu1 %v6532_v56, %s6191_s29  ;;  %v5955_v56 = vld [vmem:[%s7751_s3 + $0x98] sm:$0xff]  }
0x1612   :  { %1079 = vrot.lane.b32.xlu0 %v6560_v49, %s6191_s29 }
0x1613   :  { %1189 = vrot.lane.b32.xlu1 %v6584_v51, %s6191_s29  ;;  %v5956_v51 = vld [vmem:[%s7751_s3 + $0xa0] sm:$0xff]  }
0x1665   :  { %v1300_v16 = vpop.permute.xlu1 %1299 }
0x1668   :  { %v1305_v13 = vpop.permute.xlu0 %1304 }
0x1669   :  { %v1308_v25 = vsel %vm155_vm0, %v1300_v16, %v1305_v13  ;;  %v1312_v50 = vpop.permute.xlu1 %1311 }
0x166a   :  { %v1309_v52 = vpack.c.bf16 %v1308_v25, %v1308_v25  ;;  %v1314_v18 = vsel %vm155_vm0, %v1312_v50, %v6606_v61 }
0x166b   :  { %v1315_v53 = vpack.c.bf16 %v1314_v18, %v1314_v18 }
0x166c   :  { %5292 = vmatmul.mubr.msk.bf16.vlgmr.msra.gmra.mrb[28].mxu0 %vm1340_vm5, %v1309_v52  ;;  %v529_v57 = vpop.permute.xlu0 %528 }
0x166d   :  { %531 = vst.msk [vmem:[#allocation2] sm:$0xff] %vm155_vm0, %v529_v57  ;;  %v640_v49 = vpop.permute.xlu1 %639  ;;  %5304 = vmatmul.mubr.msk.bf16.vlgmr.msra.gmra.mrb[28].mxu1 %vm1340_vm5, %v1315_v53  ;;  %5308 = vmatpush3.bf16.msra.mxu0 %v5954_v20 }
0x166e   :  { %1307 = vst.msk [vmem:[#allocation2] sm:$0xff] %vm536_vm6, %v1305_v13  ;;  %5324 = vmatpush3.bf16.msra.mxu1 %v6687_v14  ;;  %5327 = vmatprep.mubr.msk.bf16.mxu1 %vm6193_vm4, %v6192_v28 }
0x166f   :  { %642 = vst.msk [vmem:[#allocation2 + $0x8] sm:$0xff] %vm155_vm0, %v640_v49  ;;  %5325 = vmatprep.subr.bf16.mxu1 %v6192_v28  ;;  %5309 = vmatprep.subr.bf16.mxu0 %v5955_v56 }
0x1670   :  { %v750_v60 = vpop.permute.xlu0 %749 }
0x1671   :  { %752 = vst.msk [vmem:[#allocation2 + $0x10] sm:$0xff] %vm155_vm0, %v750_v60  ;;  %v860_v27 = vpop.permute.xlu1 %859  ;;  %5310 = vmatpush3.bf16.msra.mxu0 %v5955_v56 }
0x1672   :  { %862 = vst.msk [vmem:[#allocation2 + $0x18] sm:$0xff] %vm155_vm0, %v860_v27  ;;  %5326 = vmatpush3.bf16.msra.mxu1 %v6701_v59  ;;  %5311 = vmatprep.subr.bf16.mxu0 %v5956_v51 }
0x1673   :  { %5331 = vmatprep.subr.bf16.mxu1 %v6192_v28 }
0x1674   :  { %v1195_v3 = vpop.permute.xlu0 %1194 }
0x1675   :  { %1197 = vst.msk [vmem:[#allocation2 + $0x8] sm:$0xff] %vm536_vm6, %v1195_v3  ;;  %v975_v32 = vpop.permute.xlu1 %974  ;;  %5328 = vmatmul.mubr.bf16.vlgmr.msra.gmra.mrb[32].mxu1 %v6188_v1  ;;  %5312 = vmatpush3.bf16.msra.mxu0 %v5956_v51  ;;  %v1451_v39 = vld [vmem:[#allocation2] sm:$0xff] }
0x1676   :  { %977 = vst.msk [vmem:[#allocation2 + $0x18] sm:$0xff] %vm536_vm6, %v975_v32  ;;  %5313 = vmatprep.subr.bf16.mxu0 %v5957_v10  ;;  %5332 = vmatpush3.bf16.msra.mxu1 %v6718_v11 }
0x1677   :  { %5333 = vmatprep.subr.bf16.mxu1 %v6192_v28  ;;  %5335 = vmatprep.mubr.msk.bf16.mxu1 %vm6193_vm4, %v6192_v28 }
0x1678   :  { %v1085_v42 = vpop.permute.xlu0 %1084 }
0x1679   :  { %1087 = vst.msk [vmem:[#allocation2 + $0x10] sm:$0xff] %vm536_vm6, %v1085_v42  ;;  %v755_v35 = vpop.permute.xlu1 %754  ;;  %5314 = vmatpush3.bf16.msra.mxu0 %v5957_v10 }
0x167a   :  { %757 = vst.msk [vmem:[#allocation2 + $0x28] sm:$0xff] %vm536_vm6, %v755_v35  ;;  %5334 = vmatpush3.bf16.msra.mxu1 %v6728_v31  ;;  %5339 = vmatprep.subr.bf16.mxu0 %v6192_v28 }
0x167b   :  { %5351 = vmatprep.subr.bf16.mxu1 %v6192_v28 }
0x167c   :  { %v1452_v41 = vld [vmem:[#allocation2 + $0x8] sm:$0xff]  ;;  %v865_v44 = vpop.permute.xlu0 %864 }
0x167d   :  { %v6738_v4 = vpack.c.bf16 %v1452_v41, %v1451_v39  ;;  %867 = vst.msk [vmem:[#allocation2 + $0x20] sm:$0xff] %vm536_vm6, %v865_v44  ;;  %v534_v45 = vpop.permute.xlu1 %533  ;;  %v1454_v34 = vld [vmem:[#allocation2 + $0x18] sm:$0xff] }
0x167e   :  { %537 = vst.msk [vmem:[#allocation2 + $0x38] sm:$0xff] %vm536_vm6, %v534_v45 }
0x167f   :  { %1302 = vst.msk [vmem:[#allocation2 + $0x38] sm:$0xff] %vm155_vm0, %v1300_v16  ;;  %5315 = vmatprep.mubr.msk.bf16.mxu0 %vm1340_vm5, %v6738_v4 }
0x1680   :  { %v1453_v37 = vld [vmem:[#allocation2 + $0x10] sm:$0xff]  ;;  %v645_v7 = vpop.permute.xlu0 %644 }
0x1681   :  { %v6745_v8 = vpack.c.bf16 %v1454_v34, %v1453_v37  ;;  %647 = vst.msk [vmem:[#allocation2 + $0x30] sm:$0xff] %vm536_vm6, %v645_v7  ;;  %v970_v9 = vpop.permute.xlu1 %969 }
0x1682   :  { %972 = vst.msk [vmem:[#allocation2 + $0x20] sm:$0xff] %vm155_vm0, %v970_v9 }
0x1683   :  { %5316 = vmatmul.mubr.msk.bf16.vlgmr.msra.gmra.mrb[32].mxu0 %vm1340_vm5, %v6745_v8 }
0x1684   :  { %v1080_v15 = vpop.permute.xlu0 %1079 }
0x1685   :  { %1082 = vst.msk [vmem:[#allocation2 + $0x28] sm:$0xff] %vm155_vm0, %v1080_v15  ;;  %v1190_v23 = vpop.permute.xlu1 %1189 }
0x1686   :  { %1192 = vst.msk [vmem:[#allocation2 + $0x30] sm:$0xff] %vm155_vm0, %v1190_v23  ;;  %v1458_v55 = vld [vmem:[#allocation2 + $0x38] sm:$0xff] }
0x1689   :  { %v1455_v61 = vld [vmem:[#allocation2 + $0x20] sm:$0xff] }
0x168c   :  { %v1456_v29 = vld [vmem:[#allocation2 + $0x28] sm:$0xff] }
0x168d   :  { %v6753_v54 = vpack.c.bf16 %v1456_v29, %v1455_v61  ;;  %v1457_v47 = vld [vmem:[#allocation2 + $0x30] sm:$0xff] }
0x168e   :  { %v6755_v46 = vpack.c.bf16 %v1458_v55, %v1457_v47 }
0x168f   :  { %5319 = vmatprep.mubr.msk.bf16.mxu0 %vm1340_vm5, %v6753_v54 }
0x1690   :  { %5320 = vmatmul.mubr.msk.bf16.gmra.mrb[36].mxu0 %vm1340_vm5, %v6755_v46 }
0x1691   :  { %5347 = vmatprep.mubr.msk.bf16.mxu0 %vm6193_vm4, %v6192_v28 }
0x173f   :  { %v1378_v58 = vpop.f32.mrb[28].mxu0 }
0x1740   :  { %v1636_v48 = vpack.c.bf16 %v1378_v58, %v1378_v58  ;;  %v5293_v12 = vpop.f32.mrb[29].mxu0  ;;  %v1445_v62 = vpop.f32.mrb[28].mxu1 }
0x1741   :  { %1699 = vrot.lane.b32.xlu1 %v1445_v62, %s6191_s29  ;;  %v1381_v5 = vpop.f32.mrb[30].mxu0  ;;  %v5305_v63 = vpop.f32.mrb[29].mxu1 }
0x1742   :  { %v5294_v0 = vpop.f32.mrb[31].mxu0  ;;  %v1448_v20 = vpop.f32.mrb[30].mxu1  ;;  %5336 = vmatmul.mubr.msk.bf16.vlgmr.msra.gmra.mrb[36].mxu1 %vm155_vm0, %v1636_v48 }
0x1743   :  { %5352 = vmatpush3.bf16.msra.mxu1 %v6738_v4  ;;  %v5306_v2 = vpop.f32.mrb[31].mxu1  ;;  %5359 = vmatprep.mubr.msk.bf16.mxu1 %vm6193_vm4, %v6192_v28 }
0x1744   :  { %5353 = vmatprep.subr.bf16.mxu1 %v6192_v28  ;;  %v405_v2 = vshrl.u32 %v398_v21, 7 }
0x1747   :  { %5354 = vmatpush3.bf16.msra.mxu1 %v6745_v8 }
0x1748   :  { %v1629_v6 = vpop.f32.mrb[32].mxu1  ;;  %5355 = vmatprep.subr.bf16.mxu1 %v6192_v28 }
0x1749   :  { %v1635_v16 = vadd.f32 %v1629_v6, %v6311_v19  ;;  %v5329_v13 = vpop.f32.mrb[33].mxu1  ;;  %v1568_v6 = vand.u32 7, %v6320_v26 }
0x174a   :  { %v1632_v25 = vpop.f32.mrb[34].mxu1 }
0x174b   :  { %5356 = vmatpush3.bf16.msra.mxu1 %v6753_v54  ;;  %v5330_v50 = vpop.f32.mrb[35].mxu1  ;;  %vm6811_vm7 = vcmp.eq.s32.totalorder %v1568_v6, %v405_v2 }
0x174c   :  { %5357 = vmatprep.subr.bf16.mxu1 %v6192_v28 }
0x174f   :  { %5358 = vmatpush3.bf16.msra.mxu1 %v6755_v46 }
0x1750   :  { %5363 = vmatprep.subr.bf16.mxu1 %v6192_v28 }
0x1756   :  { %v5317_v52 = vpop.f32.mrb[32].mxu0 }
0x1757   :  { %v1533_v18 = vpop.f32.mrb[33].mxu0 }
0x1758   :  { %v5318_v53 = vpop.f32.mrb[34].mxu0 }
0x1759   :  { %v1565_v56 = vpack.c.bf16 %v5318_v53, %v5317_v52  ;;  %v1536_v57 = vpop.f32.mrb[35].mxu0 }
0x175a   :  { %v1564_v49 = vpack.c.bf16 %v1536_v57, %v1533_v18 }
0x175b   :  { %v6782_v60 = vsel %vm155_vm0, %v1565_v56, 0 }
0x175c   :  { %v6777_v51 = vsel %vm155_vm0, %v1564_v49, 0 }
0x175d   :  { %5340 = vmatpush3.bf16.xpose.msra.mxu0 %v6777_v51 }
0x175e   :  { %5341 = vmatprep.subr.bf16.mxu0 %v6192_v28 }
0x1763   :  { %v5321_v19 = vpop.f32.mrb[36].mxu0 }
0x1764   :  { %v1549_v27 = vpop.f32.mrb[37].mxu0 }
0x1765   :  { %v5322_v10 = vpop.f32.mrb[38].mxu0  ;;  %5342 = vmatpush3.bf16.xpose.msra.mxu0 %v6782_v60 }
0x1766   :  { %v1567_v3 = vpack.c.bf16 %v5322_v10, %v5321_v19  ;;  %v1552_v32 = vpop.f32.mrb[39].mxu0  ;;  %5343 = vmatprep.subr.bf16.mxu0 %v6192_v28 }
0x1767   :  { %v1566_v42 = vpack.c.bf16 %v1552_v32, %v1549_v27  ;;  %v6822_v32 = vld [vmem:[%s7751_s3 + $0xc0] sm:$0xff]  }
0x1768   :  { %v6792_v39 = vsel %vm155_vm0, %v1567_v3, 0 }
0x1769   :  { %v6787_v35 = vsel %vm155_vm0, %v1566_v42, 0 }
0x176d   :  { %5344 = vmatpush3.bf16.xpose.msra.mxu0 %v6787_v35 }
0x176e   :  { %5345 = vmatprep.subr.bf16.mxu0 %v6192_v28 }
0x1775   :  { %5346 = vmatpush3.bf16.xpose.msra.mxu0 %v6792_v39 }
0x1776   :  { %5383 = vmatprep.subr.bf16.mxu0 %v6192_v28 }
0x17b3   :  { %v1700_v47 = vpop.permute.xlu1 %1699 }
0x1815   :  { %v1686_v41 = vpop.f32.mrb[36].mxu1 }
0x1816   :  { %v1692_v44 = vadd.f32 %v1686_v41, %v1635_v16  ;;  %v5337_v45 = vpop.f32.mrb[37].mxu1  ;;  %v6829_v41 = vld [vmem:[%s7751_s3 + $0xc8] sm:$0xff]  }
0x1817   :  { %v1689_v34 = vpop.f32.mrb[38].mxu1  ;;  %v6846_v45 = vld [vmem:[%s7751_s3 + $0xd8] sm:$0xff]  }
0x1818   :  { %v1693_v37 = vmul.f32 %v1692_v44, %v6351_v43  ;;  %v5338_v7 = vpop.f32.mrb[39].mxu1  ;;  %v6838_v44 = vld [vmem:[%s7751_s3 + $0xd0] sm:$0xff]  }
0x181a   :  { %6032 = vtanh.f32 %v1693_v37  ;;  %v6853_v37 = vld [vmem:[%s7751_s3 + $0xb0] sm:$0xff]  }
0x1824   :  { %v6033_v9 = vpop.eup %6032 }
0x1825   :  { %v1695_v15 = vmul.f32 0.5, %v6033_v9 }
0x1827   :  { %v1696_v23 = vadd.f32 0.5, %v1695_v15 }
0x1829   :  { %v1697_v61 = vsel %vm6340_vm3, %v6033_v9, %v1696_v23 }
0x182a   :  { %1704 = vrot.lane.b32.xlu0 %v1697_v61, %s6190_s5  ;;  %v1702_v58 = vmul.f32 %v1700_v47, %v1697_v61 }
0x189c   :  { %v1705_v29 = vpop.permute.xlu0 %1704 }
0x189d   :  { %v1707_v55 = vmul.f32 %v1705_v29, %v1697_v61  ;;  %v6888_v29 = vld [vmem:[%s7751_s3 + $0x40] sm:$0xff]  }
0x189f   :  { %1709 = vrot.lane.b32.xlu0 %v1707_v55, %s6191_s29  ;;  %v6895_v55 = vld [vmem:[%s7751_s3 + $0x48] sm:$0xff]  }
0x1911   :  { %v1710_v48 = vpop.permute.xlu0 %1709 }
0x1912   :  { %v6801_v12 = vadd.f32 %v1710_v48, %v1702_v58 }
0x1914   :  { %6034 = vtanh.f32 %v6801_v12 }
0x191e   :  { %v6035_v62 = vpop.eup %6034 }
0x191f   :  { %1715 = vrot.lane.b32.xlu1 %v6035_v62, %s6190_s5 }
0x1991   :  { %v1716_v5 = vpop.permute.xlu1 %1715 }
0x1992   :  { %v1718_v63 = vmul.f32 %v1716_v5, %v1697_v61  ;;  %v6860_v61 = vld [vmem:[%s7751_s3 + $0xb8] sm:$0xff]  }
0x1994   :  { %v1719_v0 = vpack.c.bf16 %v1718_v63, %v1718_v63 }
0x1996   :  { %1721 = vrot.lane.b32.xlu0 %v1719_v0, %s6191_s29 }
0x1a08   :  { %v1722_v20 = vpop.permute.xlu0 %1721 }
0x1a09   :  { %5348 = vmatmul.mubr.msk.bf16.vlgmr.msra.gmra.mrb[40].mxu0 %vm155_vm0, %v1722_v20 }
0x1a0a   :  { %5387 = vmatprep.mubr.msk.bf16.mxu0 %vm6193_vm4, %v6192_v28  ;;  %5384 = vmatpush3.bf16.msra.mxu0 %v6888_v29 }
0x1a0b   :  { %5385 = vmatprep.subr.bf16.mxu0 %v6192_v28 }
0x1a0e   :  { %5386 = vmatpush3.bf16.msra.mxu0 %v6895_v55 }
0x1a0f   :  { %5391 = vmatprep.subr.bf16.mxu0 %v6192_v28 }
0x1adc   :  { %v1772_v13 = vpop.f32.mrb[40].mxu0 }
0x1add   :  { %v1778_v25 = vsel %vm6811_vm7, %v1772_v13, -1e+30  ;;  %v5349_v50 = vpop.f32.mrb[41].mxu0 }
0x1ade   :  { %v1775_v52 = vpop.f32.mrb[42].mxu0  ;;  %v1779_v18 = vsel %vm1340_vm5, %v1778_v25, -inf }
0x1adf   :  { %1780 = vmax.xlane.f32.xlu1 %v1779_v18  ;;  %v5350_v53 = vpop.f32.mrb[43].mxu0 }
0x1b6c   :  { %v1781_v56 = vpop.xlane.xlu1 %1780 }
0x1b6d   :  { %v1782_v57 = vsub.f32 %v1778_v25, %v1781_v56 }
0x1b6f   :  { %v1783_v49 = vmul.f32 1.442695, %v1782_v57 }
0x1b71   :  { %6036 = vpow2.f32 %v1783_v49 }
0x1b7b   :  { %v6037_v21 = vpop.eup %6036 }
0x1b7c   :  { %v1785_v19 = vsel %vm1340_vm5, %v6037_v21, 0.0 }
0x1b7d   :  { %1786 = vadd.xlane.f32.xlu0 %v1785_v19 }
0x1c0a   :  { %v1787_v27 = vpop.xlane.xlu0 %1786 }
0x1c0b   :  { %6038 = vrcp.f32 %v1787_v27 }
0x1c15   :  { %v6039_v10 = vpop.eup %6038 }
0x1c16   :  { %v1789_v3 = vmul.f32 %v6039_v10, %v6037_v21 }
0x1c18   :  { %v1790_v42 = vpack.c.bf16 %v1789_v3, %v1789_v3 }
0x1c1a   :  { %5360 = vmatmul.mubr.msk.bf16.vlgmr.msra.gmra.mrb[40].mxu1 %vm1340_vm5, %v1790_v42 }
0x1c1b   :  { %5364 = vmatpush3.bf16.msra.mxu1 %v6822_v32  ;;  %5371 = vmatprep.mubr.msk.bf16.mxu1 %vm6193_vm4, %v6192_v28 }
0x1c1c   :  { %5365 = vmatprep.subr.bf16.mxu1 %v6192_v28 }
0x1c1f   :  { %5366 = vmatpush3.bf16.msra.mxu1 %v6829_v41 }
0x1c20   :  { %5367 = vmatprep.subr.bf16.mxu1 %v6192_v28 }
0x1c23   :  { %5368 = vmatpush3.bf16.msra.mxu1 %v6838_v44 }
0x1c24   :  { %5369 = vmatprep.subr.bf16.mxu1 %v6192_v28 }
0x1c27   :  { %5370 = vmatpush3.bf16.msra.mxu1 %v6846_v45 }
0x1c28   :  { %5375 = vmatprep.subr.bf16.mxu1 %v6192_v28 }
0x1ced   :  { %v1828_v34 = vpop.f32.mrb[40].mxu1 }
0x1cee   :  { %v1834_v7 = vpack.c.bf16 %v1828_v34, %v1828_v34  ;;  %v5361_v9 = vpop.f32.mrb[41].mxu1 }
0x1cef   :  { %v1831_v15 = vpop.f32.mrb[42].mxu1 }
0x1cf0   :  { %v5362_v23 = vpop.f32.mrb[43].mxu1  ;;  %5372 = vmatmul.mubr.msk.bf16.vlgmr.msra.gmra.mrb[44].mxu1 %vm1340_vm5, %v1834_v7 }
0x1cf1   :  { %5376 = vmatpush3.bf16.msra.mxu1 %v6853_v37  ;;  %5379 = vmatprep.mubr.msk.bf16.mxu1 %vm6193_vm4, %v6192_v28 }
0x1cf2   :  { %5377 = vmatprep.subr.bf16.mxu1 %v6192_v28 }
0x1cf5   :  { %5378 = vmatpush3.bf16.msra.mxu1 %v6860_v61 }
0x1cf6   :  { %5399 = vmatprep.subr.bf16.mxu1 %v6192_v28 }
0x1cfc   :  { %5380 = vmatmul.mubr.msk.bf16.vlgmr.msra.gmra.mrb[44].mxu1 %vm155_vm0, %v1722_v20 }
0x1cfd   :  { %5400 = vmatpush3.bf16.msra.mxu1 %v6718_v11  ;;  %5403 = vmatprep.mubr.msk.bf16.mxu1 %vm6193_vm4, %v6192_v28 }
0x1cfe   :  { %5401 = vmatprep.subr.bf16.mxu1 %v6192_v28 }
0x1d01   :  { %5402 = vmatpush3.bf16.msra.mxu1 %v6728_v31 }
0x1d02   :  { %5419 = vmatprep.subr.bf16.mxu1 %v6192_v28 }
0x1d04   :  { %5404 = vmatmul.mubr.msk.bf16.vlgmr.msra.gmra.mrb[48].mxu1 %vm155_vm0, %v1722_v20 }
0x1d05   :  { %5420 = vmatpush3.bf16.msra.mxu1 %v6738_v4  ;;  %5427 = vmatprep.mubr.msk.bf16.mxu1 %vm6193_vm4, %v6192_v28 }
0x1d06   :  { %5421 = vmatprep.subr.bf16.mxu1 %v6192_v28 }
0x1d09   :  { %5422 = vmatpush3.bf16.msra.mxu1 %v6745_v8 }
0x1d0a   :  { %5423 = vmatprep.subr.bf16.mxu1 %v6192_v28 }
0x1d0d   :  { %5424 = vmatpush3.bf16.msra.mxu1 %v6753_v54 }
0x1d0e   :  { %5425 = vmatprep.subr.bf16.mxu1 %v6192_v28 }
0x1d11   :  { %5426 = vmatpush3.bf16.msra.mxu1 %v6755_v46 }
0x1d12   :  { %5431 = vmatprep.subr.bf16.mxu1 %v6192_v28 }
0x1dcf   :  { %v1948_v47 = vpop.f32.mrb[44].mxu1 }
0x1dd0   :  { %6040 = vtanh.f32 %v1948_v47  ;;  %v5381_v58 = vpop.f32.mrb[45].mxu1 }
0x1dd1   :  { %v1951_v48 = vpop.f32.mrb[46].mxu1 }
0x1dd2   :  { %v5382_v62 = vpop.f32.mrb[47].mxu1 }
0x1dd7   :  { %v2151_v5 = vpop.f32.mrb[48].mxu1 }
0x1dd8   :  { %v5405_v63 = vpop.f32.mrb[49].mxu1 }
0x1dd9   :  { %v2154_v0 = vpop.f32.mrb[50].mxu1 }
0x1dda   :  { %v6041_v20 = vpop.eup %6040  ;;  %v5406_v2 = vpop.f32.mrb[51].mxu1 }
0x1ddb   :  { %v1955_v6 = vpack.c.bf16 %v6041_v20, %v6041_v20 }
0x1ddd   :  { %5388 = vmatmul.mubr.msk.bf16.vlgmr.msra.gmra.mrb[44].mxu0 %vm155_vm0, %v1955_v6 }
0x1dde   :  { %5392 = vmatpush3.bf16.msra.mxu0 %v6687_v14  ;;  %5395 = vmatprep.mubr.msk.bf16.mxu0 %vm6193_vm4, %v6192_v28 }
0x1ddf   :  { %5393 = vmatprep.subr.bf16.mxu0 %v6192_v28 }
0x1de2   :  { %5394 = vmatpush3.bf16.msra.mxu0 %v6701_v59 }
0x1de3   :  { %5407 = vmatprep.subr.bf16.mxu0 %v6192_v28 }
0x1de5   :  { %5396 = vmatmul.mubr.msk.bf16.vlgmr.msra.gmra.mrb[48].mxu0 %vm155_vm0, %v1955_v6 }
0x1de6   :  { %5415 = vmatprep.mubr.msk.bf16.mxu0 %vm6193_vm4, %v6192_v28 }
0x1deb   :  { %5408 = vmatpush3.bf16.xpose.msra.mxu0 %v6777_v51 }
0x1dec   :  { %5409 = vmatprep.subr.bf16.mxu0 %v6192_v28 }
0x1df3   :  { %5410 = vmatpush3.bf16.xpose.msra.mxu0 %v6782_v60 }
0x1df4   :  { %5411 = vmatprep.subr.bf16.mxu0 %v6192_v28 }
0x1dfb   :  { %5412 = vmatpush3.bf16.xpose.msra.mxu0 %v6787_v35 }
0x1dfc   :  { %5413 = vmatprep.subr.bf16.mxu0 %v6192_v28 }
0x1e03   :  { %5414 = vmatpush3.bf16.xpose.msra.mxu0 %v6792_v39 }
0x1e04   :  { %5451 = vmatprep.subr.bf16.mxu0 %v6192_v28 }
0x1eb0   :  { %v6917_v13 = vpop.f32.mrb[44].mxu0 }
0x1eb1   :  { %v5389_v25 = vpop.f32.mrb[45].mxu0 }
0x1eb2   :  { %v2008_v50 = vpop.f32.mrb[46].mxu0 }
0x1eb3   :  { %v5390_v52 = vpop.f32.mrb[47].mxu0 }
0x1eb8   :  { %v2110_v18 = vpop.f32.mrb[48].mxu0 }
0x1eb9   :  { %v2116_v53 = vadd.f32 %v2110_v18, %v6315_v24  ;;  %v5397_v56 = vpop.f32.mrb[49].mxu0 }
0x1eba   :  { %v2113_v57 = vpop.f32.mrb[50].mxu0 }
0x1ebb   :  { %v2157_v49 = vadd.f32 %v2151_v5, %v2116_v53  ;;  %v5398_v21 = vpop.f32.mrb[51].mxu0 }
0x1ebd   :  { %v2158_v19 = vmul.f32 %v2157_v49, %v6351_v43 }
0x1ebf   :  { %6042 = vtanh.f32 %v2158_v19 }
0x1ec9   :  { %v6043_v27 = vpop.eup %6042 }
0x1eca   :  { %v2160_v10 = vmul.f32 0.5, %v6043_v27 }
0x1ecc   :  { %v2161_v3 = vadd.f32 0.5, %v2160_v10 }
0x1ece   :  { %v2162_v42 = vsel %vm6340_vm3, %v6043_v27, %v2161_v3 }
0x1ecf   :  { %2165 = vrot.lane.b32.xlu0 %v2162_v42, %s6190_s5  ;;  %v2163_v24 = vmul.f32 %v2162_v42, %v6801_v12 }
0x1f41   :  { %v2166_v34 = vpop.permute.xlu0 %2165 }
0x1f42   :  { %v2168_v7 = vmul.f32 %v2166_v34, %v2162_v42 }
0x1f44   :  { %2170 = vrot.lane.b32.xlu1 %v2168_v7, %s6191_s29 }
0x1fb6   :  { %v2171_v9 = vpop.permute.xlu1 %2170 }
0x1fb7   :  { %v6926_v15 = vadd.f32 %v2171_v9, %v2163_v24 }
0x1fb9   :  { %6044 = vtanh.f32 %v6926_v15 }
0x1fc3   :  { %v6045_v23 = vpop.eup %6044 }
0x1fc4   :  { %2176 = vrot.lane.b32.xlu1 %v6045_v23, %s6190_s5 }
0x2036   :  { %v2177_v47 = vpop.permute.xlu1 %2176 }
0x2037   :  { %v2179_v58 = vmul.f32 %v2177_v47, %v2162_v42 }
0x2039   :  { %v2180_v48 = vpack.c.bf16 %v2179_v58, %v2179_v58 }
0x203b   :  { %2182 = vrot.lane.b32.xlu0 %v2180_v48, %s6191_s29 }
0x20ad   :  { %v2183_v62 = vpop.permute.xlu0 %2182 }
0x20ae   :  { %5416 = vmatmul.mubr.msk.bf16.vlgmr.msra.gmra.mrb[52].mxu0 %vm155_vm0, %v2183_v62 }
0x20af   :  { %5452 = vmatpush3.bf16.msra.mxu0 %v6888_v29  ;;  %5455 = vmatprep.mubr.msk.bf16.mxu0 %vm6193_vm4, %v6192_v28 }
0x20b0   :  { %5453 = vmatprep.subr.bf16.mxu0 %v6192_v28 }
0x20b3   :  { %5454 = vmatpush3.bf16.msra.mxu0 %v6895_v55 }
0x20b4   :  { %5459 = vmatprep.subr.bf16.mxu0 %v6192_v28 }
0x2181   :  { %v2221_v12 = vpop.f32.mrb[52].mxu0 }
0x2182   :  { %v2227_v5 = vsel %vm6811_vm7, %v2221_v12, -1e+30  ;;  %v5417_v63 = vpop.f32.mrb[53].mxu0 }
0x2183   :  { %v2224_v0 = vpop.f32.mrb[54].mxu0  ;;  %v2228_v20 = vsel %vm1340_vm5, %v2227_v5, -inf }
0x2184   :  { %2229 = vmax.xlane.f32.xlu1 %v2228_v20  ;;  %v5418_v2 = vpop.f32.mrb[55].mxu0 }
0x2211   :  { %v2230_v6 = vpop.xlane.xlu1 %2229 }
0x2212   :  { %v2231_v25 = vsub.f32 %v2227_v5, %v2230_v6 }
0x2214   :  { %v2232_v50 = vmul.f32 1.442695, %v2231_v25 }
0x2216   :  { %6046 = vpow2.f32 %v2232_v50 }
0x2220   :  { %v6047_v52 = vpop.eup %6046 }
0x2221   :  { %v2234_v18 = vsel %vm1340_vm5, %v6047_v52, 0.0 }
0x2222   :  { %2235 = vadd.xlane.f32.xlu0 %v2234_v18 }
0x22af   :  { %v2236_v53 = vpop.xlane.xlu0 %2235 }
0x22b0   :  { %6048 = vrcp.f32 %v2236_v53 }
0x22ba   :  { %v6049_v56 = vpop.eup %6048 }
0x22bb   :  { %v2238_v57 = vmul.f32 %v6049_v56, %v6047_v52 }
0x22bd   :  { %v2239_v49 = vpack.c.bf16 %v2238_v57, %v2238_v57 }
0x22bf   :  { %5428 = vmatmul.mubr.msk.bf16.vlgmr.msra.gmra.mrb[52].mxu1 %vm1340_vm5, %v2239_v49 }
0x22c0   :  { %5432 = vmatpush3.bf16.msra.mxu1 %v6822_v32  ;;  %5439 = vmatprep.mubr.msk.bf16.mxu1 %vm6193_vm4, %v6192_v28 }
0x22c1   :  { %5433 = vmatprep.subr.bf16.mxu1 %v6192_v28 }
0x22c4   :  { %5434 = vmatpush3.bf16.msra.mxu1 %v6829_v41 }
0x22c5   :  { %5435 = vmatprep.subr.bf16.mxu1 %v6192_v28 }
0x22c8   :  { %5436 = vmatpush3.bf16.msra.mxu1 %v6838_v44 }
0x22c9   :  { %5437 = vmatprep.subr.bf16.mxu1 %v6192_v28 }
0x22cc   :  { %5438 = vmatpush3.bf16.msra.mxu1 %v6846_v45 }
0x22cd   :  { %5443 = vmatprep.subr.bf16.mxu1 %v6192_v28 }
0x2392   :  { %v2277_v21 = vpop.f32.mrb[52].mxu1 }
0x2393   :  { %v2283_v19 = vpack.c.bf16 %v2277_v21, %v2277_v21  ;;  %v5429_v27 = vpop.f32.mrb[53].mxu1 }
0x2394   :  { %v2280_v10 = vpop.f32.mrb[54].mxu1 }
0x2395   :  { %v5430_v3 = vpop.f32.mrb[55].mxu1  ;;  %5440 = vmatmul.mubr.msk.bf16.vlgmr.msra.gmra.mrb[56].mxu1 %vm1340_vm5, %v2283_v19 }
0x2396   :  { %5444 = vmatpush3.bf16.msra.mxu1 %v6853_v37  ;;  %5447 = vmatprep.mubr.msk.bf16.mxu1 %vm6193_vm4, %v6192_v28 }
0x2397   :  { %5445 = vmatprep.subr.bf16.mxu1 %v6192_v28 }
0x239a   :  { %5446 = vmatpush3.bf16.msra.mxu1 %v6860_v61 }
0x239b   :  { %5467 = vmatprep.subr.bf16.mxu1 %v6192_v28 }
0x23a1   :  { %5448 = vmatmul.mubr.msk.bf16.vlgmr.msra.gmra.mrb[56].mxu1 %vm155_vm0, %v2183_v62 }
0x23a2   :  { %5468 = vmatpush3.bf16.msra.mxu1 %v6718_v11  ;;  %5471 = vmatprep.mubr.msk.bf16.mxu1 %vm6193_vm4, %v6192_v28 }
0x23a3   :  { %5469 = vmatprep.subr.bf16.mxu1 %v6192_v28 }
0x23a6   :  { %5470 = vmatpush3.bf16.msra.mxu1 %v6728_v31 }
0x23a7   :  { %5487 = vmatprep.subr.bf16.mxu1 %v6192_v28 }
0x23a9   :  { %5472 = vmatmul.mubr.msk.bf16.vlgmr.msra.gmra.mrb[60].mxu1 %vm155_vm0, %v2183_v62 }
0x23aa   :  { %5488 = vmatpush3.bf16.msra.mxu1 %v6738_v4  ;;  %5495 = vmatprep.mubr.msk.bf16.mxu1 %vm6193_vm4, %v6192_v28 }
0x23ab   :  { %5489 = vmatprep.subr.bf16.mxu1 %v6192_v28 }
0x23ae   :  { %5490 = vmatpush3.bf16.msra.mxu1 %v6745_v8 }
0x23af   :  { %5491 = vmatprep.subr.bf16.mxu1 %v6192_v28 }
0x23b2   :  { %5492 = vmatpush3.bf16.msra.mxu1 %v6753_v54 }
0x23b3   :  { %5493 = vmatprep.subr.bf16.mxu1 %v6192_v28 }
0x23b6   :  { %5494 = vmatpush3.bf16.msra.mxu1 %v6755_v46 }
0x23b7   :  { %5499 = vmatprep.subr.bf16.mxu1 %v6192_v28 }
0x2474   :  { %v2361_v42 = vpop.f32.mrb[56].mxu1 }
0x2475   :  { %6050 = vtanh.f32 %v2361_v42  ;;  %v5449_v34 = vpop.f32.mrb[57].mxu1 }
0x2476   :  { %v2364_v7 = vpop.f32.mrb[58].mxu1 }
0x2477   :  { %v5450_v24 = vpop.f32.mrb[59].mxu1 }
0x247c   :  { %v2549_v9 = vpop.f32.mrb[60].mxu1 }
0x247d   :  { %v5473_v23 = vpop.f32.mrb[61].mxu1 }
0x247e   :  { %v2552_v47 = vpop.f32.mrb[62].mxu1 }
0x247f   :  { %v6051_v58 = vpop.eup %6050  ;;  %v5474_v48 = vpop.f32.mrb[63].mxu1 }
0x2480   :  { %v2368_v62 = vpack.c.bf16 %v6051_v58, %v6051_v58 }
0x2482   :  { %5456 = vmatmul.mubr.msk.bf16.vlgmr.msra.gmra.mrb[56].mxu0 %vm155_vm0, %v2368_v62 }
0x2483   :  { %5460 = vmatpush3.bf16.msra.mxu0 %v6687_v14  ;;  %5463 = vmatprep.mubr.msk.bf16.mxu0 %vm6193_vm4, %v6192_v28 }
0x2484   :  { %5461 = vmatprep.subr.bf16.mxu0 %v6192_v28 }
0x2487   :  { %5462 = vmatpush3.bf16.msra.mxu0 %v6701_v59 }
0x2488   :  { %5475 = vmatprep.subr.bf16.mxu0 %v6192_v28 }
0x248a   :  { %5464 = vmatmul.mubr.msk.bf16.vlgmr.msra.gmra.mrb[60].mxu0 %vm155_vm0, %v2368_v62 }
0x248b   :  { %5483 = vmatprep.mubr.msk.bf16.mxu0 %vm6193_vm4, %v6192_v28 }
0x2490   :  { %5476 = vmatpush3.bf16.xpose.msra.mxu0 %v6777_v51 }
0x2491   :  { %5477 = vmatprep.subr.bf16.mxu0 %v6192_v28 }
0x2498   :  { %5478 = vmatpush3.bf16.xpose.msra.mxu0 %v6782_v60 }
0x2499   :  { %5479 = vmatprep.subr.bf16.mxu0 %v6192_v28 }
0x24a0   :  { %5480 = vmatpush3.bf16.xpose.msra.mxu0 %v6787_v35 }
0x24a1   :  { %5481 = vmatprep.subr.bf16.mxu0 %v6192_v28 }
0x24a8   :  { %5482 = vmatpush3.bf16.xpose.msra.mxu0 %v6792_v39 }
0x24a9   :  { %5519 = vmatprep.subr.bf16.mxu0 %v6192_v28 }
0x2555   :  { %v6996_v12 = vpop.f32.mrb[56].mxu0 }
0x2556   :  { %v5457_v5 = vpop.f32.mrb[57].mxu0 }
0x2557   :  { %v2409_v63 = vpop.f32.mrb[58].mxu0 }
0x2558   :  { %v5458_v0 = vpop.f32.mrb[59].mxu0 }
0x255d   :  { %v2508_v20 = vpop.f32.mrb[60].mxu0 }
0x255e   :  { %v2514_v2 = vadd.f32 %v2508_v20, %v6309_v17  ;;  %v5465_v6 = vpop.f32.mrb[61].mxu0 }
0x255f   :  { %v2511_v25 = vpop.f32.mrb[62].mxu0 }
0x2560   :  { %v2555_v50 = vadd.f32 %v2549_v9, %v2514_v2  ;;  %v5466_v52 = vpop.f32.mrb[63].mxu0 }
0x2562   :  { %v2556_v18 = vmul.f32 %v2555_v50, %v6351_v43 }
0x2564   :  { %6052 = vtanh.f32 %v2556_v18 }
0x256e   :  { %v6053_v53 = vpop.eup %6052 }
0x256f   :  { %v2558_v56 = vmul.f32 0.5, %v6053_v53 }
0x2571   :  { %v2559_v57 = vadd.f32 0.5, %v2558_v56 }
0x2573   :  { %v2560_v49 = vsel %vm6340_vm3, %v6053_v53, %v2559_v57 }
0x2574   :  { %2563 = vrot.lane.b32.xlu0 %v2560_v49, %s6190_s5  ;;  %v2561_v17 = vmul.f32 %v2560_v49, %v6926_v15 }
0x25e6   :  { %v2564_v21 = vpop.permute.xlu0 %2563 }
0x25e7   :  { %v2566_v19 = vmul.f32 %v2564_v21, %v2560_v49 }
0x25e9   :  { %2568 = vrot.lane.b32.xlu1 %v2566_v19, %s6191_s29 }
0x265b   :  { %v2569_v27 = vpop.permute.xlu1 %2568 }
0x265c   :  { %v7005_v10 = vadd.f32 %v2569_v27, %v2561_v17 }
0x265e   :  { %6054 = vtanh.f32 %v7005_v10 }
0x2668   :  { %v6055_v3 = vpop.eup %6054 }
0x2669   :  { %2574 = vrot.lane.b32.xlu1 %v6055_v3, %s6190_s5 }
0x26db   :  { %v2575_v42 = vpop.permute.xlu1 %2574 }
0x26dc   :  { %v2577_v34 = vmul.f32 %v2575_v42, %v2560_v49 }
0x26de   :  { %v2578_v7 = vpack.c.bf16 %v2577_v34, %v2577_v34 }
0x26e0   :  { %2580 = vrot.lane.b32.xlu0 %v2578_v7, %s6191_s29 }
0x2752   :  { %v2581_v24 = vpop.permute.xlu0 %2580 }
0x2753   :  { %5484 = vmatmul.mubr.msk.bf16.vlgmr.msra.gmra.mrb[64].mxu0 %vm155_vm0, %v2581_v24 }
0x2754   :  { %5520 = vmatpush3.bf16.msra.mxu0 %v6888_v29  ;;  %5523 = vmatprep.mubr.msk.bf16.mxu0 %vm6193_vm4, %v6192_v28 }
0x2755   :  { %5521 = vmatprep.subr.bf16.mxu0 %v6192_v28 }
0x2758   :  { %5522 = vmatpush3.bf16.msra.mxu0 %v6895_v55 }
0x2759   :  { %5527 = vmatprep.subr.bf16.mxu0 %v6192_v28 }
0x2826   :  { %v2619_v15 = vpop.f32.mrb[64].mxu0 }
0x2827   :  { %v2625_v9 = vsel %vm6811_vm7, %v2619_v15, -1e+30  ;;  %v5485_v23 = vpop.f32.mrb[65].mxu0 }
0x2828   :  { %v2622_v47 = vpop.f32.mrb[66].mxu0  ;;  %v2626_v58 = vsel %vm1340_vm5, %v2625_v9, -inf }
0x2829   :  { %2627 = vmax.xlane.f32.xlu1 %v2626_v58  ;;  %v5486_v48 = vpop.f32.mrb[67].mxu0 }
0x28b6   :  { %v2628_v62 = vpop.xlane.xlu1 %2627 }
0x28b7   :  { %v2629_v5 = vsub.f32 %v2625_v9, %v2628_v62 }
0x28b9   :  { %v2630_v63 = vmul.f32 1.442695, %v2629_v5 }
0x28bb   :  { %6056 = vpow2.f32 %v2630_v63 }
0x28c5   :  { %v6057_v0 = vpop.eup %6056 }
0x28c6   :  { %v2632_v20 = vsel %vm1340_vm5, %v6057_v0, 0.0 }
0x28c7   :  { %2633 = vadd.xlane.f32.xlu0 %v2632_v20 }
0x2954   :  { %v2634_v2 = vpop.xlane.xlu0 %2633 }
0x2955   :  { %6058 = vrcp.f32 %v2634_v2 }
0x295f   :  { %v6059_v6 = vpop.eup %6058 }
0x2960   :  { %v2636_v25 = vmul.f32 %v6059_v6, %v6057_v0 }
0x2962   :  { %v2637_v50 = vpack.c.bf16 %v2636_v25, %v2636_v25 }
0x2964   :  { %5496 = vmatmul.mubr.msk.bf16.vlgmr.msra.gmra.mrb[64].mxu1 %vm1340_vm5, %v2637_v50 }
0x2965   :  { %5500 = vmatpush3.bf16.msra.mxu1 %v6822_v32  ;;  %5507 = vmatprep.mubr.msk.bf16.mxu1 %vm6193_vm4, %v6192_v28 }
0x2966   :  { %5501 = vmatprep.subr.bf16.mxu1 %v6192_v28 }
0x2969   :  { %5502 = vmatpush3.bf16.msra.mxu1 %v6829_v41 }
0x296a   :  { %5503 = vmatprep.subr.bf16.mxu1 %v6192_v28 }
0x296d   :  { %5504 = vmatpush3.bf16.msra.mxu1 %v6838_v44 }
0x296e   :  { %5505 = vmatprep.subr.bf16.mxu1 %v6192_v28 }
0x2971   :  { %5506 = vmatpush3.bf16.msra.mxu1 %v6846_v45 }
0x2972   :  { %5511 = vmatprep.subr.bf16.mxu1 %v6192_v28 }
0x2a37   :  { %v2675_v52 = vpop.f32.mrb[64].mxu1 }
0x2a38   :  { %v2681_v18 = vpack.c.bf16 %v2675_v52, %v2675_v52  ;;  %v5497_v53 = vpop.f32.mrb[65].mxu1 }
0x2a39   :  { %v2678_v56 = vpop.f32.mrb[66].mxu1 }
0x2a3a   :  { %v5498_v57 = vpop.f32.mrb[67].mxu1  ;;  %5508 = vmatmul.mubr.msk.bf16.vlgmr.msra.gmra.mrb[68].mxu1 %vm1340_vm5, %v2681_v18 }
0x2a3b   :  { %5512 = vmatpush3.bf16.msra.mxu1 %v6853_v37  ;;  %5515 = vmatprep.mubr.msk.bf16.mxu1 %vm6193_vm4, %v6192_v28 }
0x2a3c   :  { %5513 = vmatprep.subr.bf16.mxu1 %v6192_v28 }
0x2a3f   :  { %5514 = vmatpush3.bf16.msra.mxu1 %v6860_v61 }
0x2a40   :  { %5535 = vmatprep.subr.bf16.mxu1 %v6192_v28 }
0x2a46   :  { %5516 = vmatmul.mubr.msk.bf16.vlgmr.msra.gmra.mrb[68].mxu1 %vm155_vm0, %v2581_v24 }
0x2a47   :  { %5536 = vmatpush3.bf16.msra.mxu1 %v6718_v11  ;;  %5539 = vmatprep.mubr.msk.bf16.mxu1 %vm6193_vm4, %v6192_v28 }
0x2a48   :  { %5537 = vmatprep.subr.bf16.mxu1 %v6192_v28 }
0x2a4b   :  { %5538 = vmatpush3.bf16.msra.mxu1 %v6728_v31 }
0x2a4c   :  { %5555 = vmatprep.subr.bf16.mxu1 %v6192_v28 }
0x2a4e   :  { %5540 = vmatmul.mubr.msk.bf16.vlgmr.msra.gmra.mrb[72].mxu1 %vm155_vm0, %v2581_v24 }
0x2a4f   :  { %5556 = vmatpush3.bf16.msra.mxu1 %v6738_v4  ;;  %5563 = vmatprep.mubr.msk.bf16.mxu1 %vm6193_vm4, %v6192_v28 }
0x2a50   :  { %5557 = vmatprep.subr.bf16.mxu1 %v6192_v28 }
0x2a53   :  { %5558 = vmatpush3.bf16.msra.mxu1 %v6745_v8 }
0x2a54   :  { %5559 = vmatprep.subr.bf16.mxu1 %v6192_v28 }
0x2a57   :  { %5560 = vmatpush3.bf16.msra.mxu1 %v6753_v54 }
0x2a58   :  { %5561 = vmatprep.subr.bf16.mxu1 %v6192_v28 }
0x2a5b   :  { %5562 = vmatpush3.bf16.msra.mxu1 %v6755_v46 }
0x2a5c   :  { %5567 = vmatprep.subr.bf16.mxu1 %v6192_v28 }
0x2b19   :  { %v2759_v11 = vpop.f32.mrb[68].mxu1 }
0x2b1a   :  { %6060 = vtanh.f32 %v2759_v11  ;;  %v5517_v31 = vpop.f32.mrb[69].mxu1 }
0x2b1b   :  { %v2762_v49 = vpop.f32.mrb[70].mxu1 }
0x2b1c   :  { %v5518_v21 = vpop.f32.mrb[71].mxu1 }
0x2b21   :  { %v2947_v19 = vpop.f32.mrb[72].mxu1 }
0x2b22   :  { %v5541_v17 = vpop.f32.mrb[73].mxu1 }
0x2b23   :  { %v2950_v27 = vpop.f32.mrb[74].mxu1 }
0x2b24   :  { %v6061_v3 = vpop.eup %6060  ;;  %v5542_v42 = vpop.f32.mrb[75].mxu1 }
0x2b25   :  { %v2766_v34 = vpack.c.bf16 %v6061_v3, %v6061_v3 }
0x2b27   :  { %5524 = vmatmul.mubr.msk.bf16.vlgmr.msra.gmra.mrb[68].mxu0 %vm155_vm0, %v2766_v34 }
0x2b28   :  { %5528 = vmatpush3.bf16.msra.mxu0 %v6687_v14  ;;  %5531 = vmatprep.mubr.msk.bf16.mxu0 %vm6193_vm4, %v6192_v28 }
0x2b29   :  { %5529 = vmatprep.subr.bf16.mxu0 %v6192_v28 }
0x2b2c   :  { %5530 = vmatpush3.bf16.msra.mxu0 %v6701_v59 }
0x2b2d   :  { %5543 = vmatprep.subr.bf16.mxu0 %v6192_v28 }
0x2b2f   :  { %5532 = vmatmul.mubr.msk.bf16.vlgmr.msra.gmra.mrb[72].mxu0 %vm155_vm0, %v2766_v34 }
0x2b30   :  { %5551 = vmatprep.mubr.msk.bf16.mxu0 %vm6193_vm4, %v6192_v28 }
0x2b35   :  { %5544 = vmatpush3.bf16.xpose.msra.mxu0 %v6777_v51 }
0x2b36   :  { %5545 = vmatprep.subr.bf16.mxu0 %v6192_v28 }
0x2b3d   :  { %5546 = vmatpush3.bf16.xpose.msra.mxu0 %v6782_v60 }
0x2b3e   :  { %5547 = vmatprep.subr.bf16.mxu0 %v6192_v28 }
0x2b45   :  { %5548 = vmatpush3.bf16.xpose.msra.mxu0 %v6787_v35 }
0x2b46   :  { %5549 = vmatprep.subr.bf16.mxu0 %v6192_v28 }
0x2b4d   :  { %5550 = vmatpush3.bf16.xpose.msra.mxu0 %v6792_v39 }
0x2b4e   :  { %5587 = vmatprep.subr.bf16.mxu0 %v6192_v28 }
0x2bfa   :  { %v7075_v14 = vpop.f32.mrb[68].mxu0 }
0x2bfb   :  { %v5525_v59 = vpop.f32.mrb[69].mxu0 }
0x2bfc   :  { %v2807_v7 = vpop.f32.mrb[70].mxu0 }
0x2bfd   :  { %v5526_v24 = vpop.f32.mrb[71].mxu0 }
0x2c02   :  { %v2906_v15 = vpop.f32.mrb[72].mxu0 }
0x2c03   :  { %v2912_v9 = vadd.f32 %v2906_v15, %v6313_v22  ;;  %v5533_v23 = vpop.f32.mrb[73].mxu0 }
0x2c04   :  { %v2909_v47 = vpop.f32.mrb[74].mxu0 }
0x2c05   :  { %v2953_v58 = vadd.f32 %v2947_v19, %v2912_v9  ;;  %v5534_v48 = vpop.f32.mrb[75].mxu0 }
0x2c07   :  { %v2954_v62 = vmul.f32 %v2953_v58, %v6351_v43 }
0x2c09   :  { %6062 = vtanh.f32 %v2954_v62  ;;  %v7122_v62 = vld [vmem:[%s7751_s3 + $0x30] sm:$0xff]  }
0x2c13   :  { %v6063_v5 = vpop.eup %6062 }
0x2c14   :  { %v2956_v63 = vmul.f32 0.5, %v6063_v5 }
0x2c16   :  { %v2957_v0 = vadd.f32 0.5, %v2956_v63 }
0x2c18   :  { %v2958_v20 = vsel %vm6340_vm3, %v6063_v5, %v2957_v0  ;;  %v7131_v5 = vld [vmem:[%s7751_s3 + $0x38] sm:$0xff]  }
0x2c19   :  { %2961 = vrot.lane.b32.xlu0 %v2958_v20, %s6190_s5  ;;  %v2959_v22 = vmul.f32 %v2958_v20, %v7005_v10 }
0x2c8b   :  { %v2962_v2 = vpop.permute.xlu0 %2961 }
0x2c8c   :  { %v2964_v6 = vmul.f32 %v2962_v2, %v2958_v20 }
0x2c8e   :  { %2966 = vrot.lane.b32.xlu1 %v2964_v6, %s6191_s29 }
0x2d00   :  { %v2967_v25 = vpop.permute.xlu1 %2966 }
0x2d01   :  { %v7084_v50 = vadd.f32 %v2967_v25, %v2959_v22 }
0x2d03   :  { %6064 = vtanh.f32 %v7084_v50 }
0x2d0d   :  { %v6065_v52 = vpop.eup %6064 }
0x2d0e   :  { %2972 = vrot.lane.b32.xlu1 %v6065_v52, %s6190_s5 }
0x2d80   :  { %v2973_v18 = vpop.permute.xlu1 %2972 }
0x2d81   :  { %v2975_v53 = vmul.f32 %v2973_v18, %v2958_v20 }
0x2d83   :  { %v2976_v56 = vpack.c.bf16 %v2975_v53, %v2975_v53 }
0x2d85   :  { %2978 = vrot.lane.b32.xlu0 %v2976_v56, %s6191_s29  ;;  %v7150_v56 = vld [vmem:[%s7751_s3 + $0x20] sm:$0xff]  }
0x2df7   :  { %v2979_v57 = vpop.permute.xlu0 %2978 }
0x2df8   :  { %5552 = vmatmul.mubr.msk.bf16.vlgmr.msra.gmra.mrb[76].mxu0 %vm155_vm0, %v2979_v57 }
0x2df9   :  { %5588 = vmatpush3.bf16.msra.mxu0 %v6888_v29  ;;  %5591 = vmatprep.mubr.msk.bf16.mxu0 %vm6193_vm4, %v6192_v28 }
0x2dfa   :  { %5589 = vmatprep.subr.bf16.mxu0 %v6192_v28 }
0x2dfd   :  { %5590 = vmatpush3.bf16.msra.mxu0 %v6895_v55 }
0x2dfe   :  { %5595 = vmatprep.subr.bf16.mxu0 %v6192_v28 }
0x2ecb   :  { %v3017_v10 = vpop.f32.mrb[76].mxu0 }
0x2ecc   :  { %v3023_v11 = vsel %vm6811_vm7, %v3017_v10, -1e+30  ;;  %v5553_v31 = vpop.f32.mrb[77].mxu0 }
0x2ecd   :  { %v3020_v49 = vpop.f32.mrb[78].mxu0  ;;  %v3024_v21 = vsel %vm1340_vm5, %v3023_v11, -inf }
0x2ece   :  { %3025 = vmax.xlane.f32.xlu1 %v3024_v21  ;;  %v5554_v19 = vpop.f32.mrb[79].mxu0 }
0x2f5b   :  { %v3026_v17 = vpop.xlane.xlu1 %3025 }
0x2f5c   :  { %v3027_v27 = vsub.f32 %v3023_v11, %v3026_v17 }
0x2f5e   :  { %v3028_v3 = vmul.f32 1.442695, %v3027_v27 }
0x2f60   :  { %6066 = vpow2.f32 %v3028_v3 }
0x2f6a   :  { %v6067_v42 = vpop.eup %6066 }
0x2f6b   :  { %v3030_v34 = vsel %vm1340_vm5, %v6067_v42, 0.0 }
0x2f6c   :  { %3031 = vadd.xlane.f32.xlu0 %v3030_v34 }
0x2ff9   :  { %v3032_v59 = vpop.xlane.xlu0 %3031 }
0x2ffa   :  { %6068 = vrcp.f32 %v3032_v59 }
0x3004   :  { %v6069_v7 = vpop.eup %6068 }
0x3005   :  { %v3034_v24 = vmul.f32 %v6069_v7, %v6067_v42 }
0x3007   :  { %v3035_v15 = vpack.c.bf16 %v3034_v24, %v3034_v24 }
0x3009   :  { %5564 = vmatmul.mubr.msk.bf16.vlgmr.msra.gmra.mrb[76].mxu1 %vm1340_vm5, %v3035_v15 }
0x300a   :  { %5568 = vmatpush3.bf16.msra.mxu1 %v6822_v32  ;;  %5575 = vmatprep.mubr.msk.bf16.mxu1 %vm6193_vm4, %v6192_v28 }
0x300b   :  { %5569 = vmatprep.subr.bf16.mxu1 %v6192_v28 }
0x300e   :  { %5570 = vmatpush3.bf16.msra.mxu1 %v6829_v41 }
0x300f   :  { %5571 = vmatprep.subr.bf16.mxu1 %v6192_v28 }
0x3012   :  { %5572 = vmatpush3.bf16.msra.mxu1 %v6838_v44 }
0x3013   :  { %5573 = vmatprep.subr.bf16.mxu1 %v6192_v28 }
0x3016   :  { %5574 = vmatpush3.bf16.msra.mxu1 %v6846_v45 }
0x3017   :  { %5579 = vmatprep.subr.bf16.mxu1 %v6192_v28 }
0x30dc   :  { %v3073_v9 = vpop.f32.mrb[76].mxu1 }
0x30dd   :  { %v3079_v23 = vpack.c.bf16 %v3073_v9, %v3073_v9  ;;  %v5565_v47 = vpop.f32.mrb[77].mxu1 }
0x30de   :  { %v3076_v58 = vpop.f32.mrb[78].mxu1 }
0x30df   :  { %v5566_v48 = vpop.f32.mrb[79].mxu1  ;;  %5576 = vmatmul.mubr.msk.bf16.vlgmr.msra.gmra.mrb[80].mxu1 %vm1340_vm5, %v3079_v23 }
0x30e0   :  { %5580 = vmatpush3.bf16.msra.mxu1 %v6853_v37  ;;  %5583 = vmatprep.mubr.msk.bf16.mxu1 %vm6193_vm4, %v6192_v28 }
0x30e1   :  { %5581 = vmatprep.subr.bf16.mxu1 %v6192_v28 }
0x30e4   :  { %5582 = vmatpush3.bf16.msra.mxu1 %v6860_v61 }
0x30e5   :  { %5603 = vmatprep.subr.bf16.mxu1 %v6192_v28 }
0x30eb   :  { %5584 = vmatmul.mubr.msk.bf16.vlgmr.msra.gmra.mrb[80].mxu1 %vm155_vm0, %v2979_v57 }
0x30ec   :  { %5604 = vmatpush3.bf16.msra.mxu1 %v7122_v62  ;;  %5607 = vmatprep.mubr.msk.bf16.mxu1 %vm6193_vm4, %v6192_v28 }
0x30ed   :  { %5605 = vmatprep.subr.bf16.mxu1 %v6192_v28 }
0x30f0   :  { %5606 = vmatpush3.bf16.msra.mxu1 %v7131_v5 }
0x30f1   :  { %5623 = vmatprep.subr.bf16.mxu1 %v6192_v28 }
0x30f3   :  { %5608 = vmatmul.mubr.msk.bf16.vlgmr.msra.gmra.mrb[84].mxu1 %vm155_vm0, %v2979_v57  ;;  %v7159_v57 = vld [vmem:[%s7751_s3 + $0x28] sm:$0xff]  }
0x30f4   :  { %5624 = vmatpush3.bf16.msra.mxu1 %v6738_v4  ;;  %5631 = vmatprep.mubr.msk.bf16.mxu1 %vm6193_vm4, %v6192_v28 }
0x30f5   :  { %5625 = vmatprep.subr.bf16.mxu1 %v6192_v28 }
0x30f8   :  { %5626 = vmatpush3.bf16.msra.mxu1 %v6745_v8 }
0x30f9   :  { %5627 = vmatprep.subr.bf16.mxu1 %v6192_v28 }
0x30fc   :  { %5628 = vmatpush3.bf16.msra.mxu1 %v6753_v54 }
0x30fd   :  { %5629 = vmatprep.subr.bf16.mxu1 %v6192_v28 }
0x3100   :  { %5630 = vmatpush3.bf16.msra.mxu1 %v6755_v46 }
0x3101   :  { %5635 = vmatprep.subr.bf16.mxu1 %v6192_v28 }
0x31be   :  { %v3157_v63 = vpop.f32.mrb[80].mxu1 }
0x31bf   :  { %6070 = vtanh.f32 %v3157_v63  ;;  %v5585_v0 = vpop.f32.mrb[81].mxu1 }
0x31c0   :  { %v3160_v20 = vpop.f32.mrb[82].mxu1 }
0x31c1   :  { %v5586_v2 = vpop.f32.mrb[83].mxu1 }
0x31c6   :  { %v3345_v6 = vpop.f32.mrb[84].mxu1 }
0x31c7   :  { %v5609_v22 = vpop.f32.mrb[85].mxu1 }
0x31c8   :  { %v3348_v25 = vpop.f32.mrb[86].mxu1 }
0x31c9   :  { %v6071_v52 = vpop.eup %6070  ;;  %v5610_v18 = vpop.f32.mrb[87].mxu1 }
0x31ca   :  { %v3164_v53 = vpack.c.bf16 %v6071_v52, %v6071_v52 }
0x31cc   :  { %5592 = vmatmul.mubr.msk.bf16.vlgmr.msra.gmra.mrb[80].mxu0 %vm155_vm0, %v3164_v53 }
0x31cd   :  { %5596 = vmatpush3.bf16.msra.mxu0 %v7150_v56  ;;  %5599 = vmatprep.mubr.msk.bf16.mxu0 %vm6193_vm4, %v6192_v28 }
0x31ce   :  { %5597 = vmatprep.subr.bf16.mxu0 %v6192_v28 }
0x31d1   :  { %5598 = vmatpush3.bf16.msra.mxu0 %v7159_v57 }
0x31d2   :  { %5611 = vmatprep.subr.bf16.mxu0 %v6192_v28 }
0x31d4   :  { %5600 = vmatmul.mubr.msk.bf16.vlgmr.msra.gmra.mrb[84].mxu0 %vm155_vm0, %v3164_v53 }
0x31d5   :  { %5619 = vmatprep.mubr.msk.bf16.mxu0 %vm6193_vm4, %v6192_v28 }
0x31da   :  { %5612 = vmatpush3.bf16.xpose.msra.mxu0 %v6777_v51 }
0x31db   :  { %5613 = vmatprep.subr.bf16.mxu0 %v6192_v28 }
0x31e2   :  { %5614 = vmatpush3.bf16.xpose.msra.mxu0 %v6782_v60 }
0x31e3   :  { %5615 = vmatprep.subr.bf16.mxu0 %v6192_v28 }
0x31ea   :  { %5616 = vmatpush3.bf16.xpose.msra.mxu0 %v6787_v35 }
0x31eb   :  { %5617 = vmatprep.subr.bf16.mxu0 %v6192_v28 }
0x31f2   :  { %5618 = vmatpush3.bf16.xpose.msra.mxu0 %v6792_v39 }
0x31f3   :  { %5655 = vmatprep.subr.bf16.mxu0 %v6192_v28 }
0x329f   :  { %v7174_v10 = vpop.f32.mrb[80].mxu0 }
0x32a0   :  { %v5593_v11 = vpop.f32.mrb[81].mxu0 }
0x32a1   :  { %v3205_v31 = vpop.f32.mrb[82].mxu0 }
0x32a2   :  { %v5594_v49 = vpop.f32.mrb[83].mxu0 }
0x32a7   :  { %v3304_v21 = vpop.f32.mrb[84].mxu0 }
0x32a8   :  { %v3310_v19 = vadd.f32 %v3304_v21, %v6326_v33  ;;  %v5601_v17 = vpop.f32.mrb[85].mxu0 }
0x32a9   :  { %v3307_v27 = vpop.f32.mrb[86].mxu0 }
0x32aa   :  { %v3351_v3 = vadd.f32 %v3345_v6, %v3310_v19  ;;  %v5602_v42 = vpop.f32.mrb[87].mxu0 }
0x32ac   :  { %v3352_v34 = vmul.f32 %v3351_v3, %v6351_v43 }
0x32ae   :  { %6072 = vtanh.f32 %v3352_v34 }
0x32b8   :  { %v6073_v59 = vpop.eup %6072 }
0x32b9   :  { %v3354_v7 = vmul.f32 0.5, %v6073_v59 }
0x32bb   :  { %v3355_v24 = vadd.f32 0.5, %v3354_v7 }
0x32bd   :  { %v3356_v15 = vsel %vm6340_vm3, %v6073_v59, %v3355_v24 }
0x32be   :  { %3359 = vrot.lane.b32.xlu0 %v3356_v15, %s6190_s5  ;;  %v3357_v33 = vmul.f32 %v3356_v15, %v7084_v50 }
0x3330   :  { %v3360_v9 = vpop.permute.xlu0 %3359 }
0x3331   :  { %v3362_v23 = vmul.f32 %v3360_v9, %v3356_v15 }
0x3333   :  { %3364 = vrot.lane.b32.xlu1 %v3362_v23, %s6191_s29 }
0x33a5   :  { %v3365_v47 = vpop.permute.xlu1 %3364 }
0x33a6   :  { %v7183_v58 = vadd.f32 %v3365_v47, %v3357_v33 }
0x33a8   :  { %6074 = vtanh.f32 %v7183_v58 }
0x33b2   :  { %v6075_v48 = vpop.eup %6074 }
0x33b3   :  { %3370 = vrot.lane.b32.xlu1 %v6075_v48, %s6190_s5 }
0x3425   :  { %v3371_v63 = vpop.permute.xlu1 %3370 }
0x3426   :  { %v3373_v0 = vmul.f32 %v3371_v63, %v3356_v15 }
0x3428   :  { %v3374_v20 = vpack.c.bf16 %v3373_v0, %v3373_v0 }
0x342a   :  { %3376 = vrot.lane.b32.xlu0 %v3374_v20, %s6191_s29 }
0x349c   :  { %v3377_v2 = vpop.permute.xlu0 %3376 }
0x349d   :  { %5620 = vmatmul.mubr.msk.bf16.vlgmr.msra.gmra.mrb[88].mxu0 %vm155_vm0, %v3377_v2 }
0x349e   :  { %5656 = vmatpush3.bf16.msra.mxu0 %v6888_v29  ;;  %5659 = vmatprep.mubr.msk.bf16.mxu0 %vm6193_vm4, %v6192_v28 }
0x349f   :  { %5657 = vmatprep.subr.bf16.mxu0 %v6192_v28 }
0x34a2   :  { %5658 = vmatpush3.bf16.msra.mxu0 %v6895_v55 }
0x34a3   :  { %5663 = vmatprep.subr.bf16.mxu0 %v6192_v28 }
0x3570   :  { %v3415_v50 = vpop.f32.mrb[88].mxu0 }
0x3571   :  { %v3421_v6 = vsel %vm6811_vm7, %v3415_v50, -1e+30  ;;  %v5621_v22 = vpop.f32.mrb[89].mxu0 }
0x3572   :  { %v3422_v25 = vsel %vm1340_vm5, %v3421_v6, -inf  ;;  %v3418_v52 = vpop.f32.mrb[90].mxu0 }
0x3573   :  { %3423 = vmax.xlane.f32.xlu1 %v3422_v25  ;;  %v5622_v18 = vpop.f32.mrb[91].mxu0 }
0x3600   :  { %v3424_v29 = vpop.xlane.xlu1 %3423 }
0x3601   :  { %v3425_v53 = vsub.f32 %v3421_v6, %v3424_v29 }
0x3603   :  { %v3426_v11 = vmul.f32 1.442695, %v3425_v53 }
0x3605   :  { %6076 = vpow2.f32 %v3426_v11 }
0x360f   :  { %v6077_v31 = vpop.eup %6076 }
0x3610   :  { %v3428_v49 = vsel %vm1340_vm5, %v6077_v31, 0.0 }
0x3611   :  { %3429 = vadd.xlane.f32.xlu0 %v3428_v49 }
0x369e   :  { %v3430_v55 = vpop.xlane.xlu0 %3429 }
0x369f   :  { %6078 = vrcp.f32 %v3430_v55 }
0x36a9   :  { %v6079_v21 = vpop.eup %6078 }
0x36aa   :  { %v3432_v19 = vmul.f32 %v6079_v21, %v6077_v31 }
0x36ac   :  { %v3433_v17 = vpack.c.bf16 %v3432_v19, %v3432_v19 }
0x36ae   :  { %5632 = vmatmul.mubr.msk.bf16.vlgmr.msra.gmra.mrb[88].mxu1 %vm1340_vm5, %v3433_v17 }
0x36af   :  { %5636 = vmatpush3.bf16.msra.mxu1 %v6822_v32  ;;  %5643 = vmatprep.mubr.msk.bf16.mxu1 %vm6193_vm4, %v6192_v28 }
0x36b0   :  { %5637 = vmatprep.subr.bf16.mxu1 %v6192_v28 }
0x36b3   :  { %5638 = vmatpush3.bf16.msra.mxu1 %v6829_v41 }
0x36b4   :  { %5639 = vmatprep.subr.bf16.mxu1 %v6192_v28 }
0x36b7   :  { %5640 = vmatpush3.bf16.msra.mxu1 %v6838_v44 }
0x36b8   :  { %5641 = vmatprep.subr.bf16.mxu1 %v6192_v28 }
0x36bb   :  { %5642 = vmatpush3.bf16.msra.mxu1 %v6846_v45 }
0x36bc   :  { %5647 = vmatprep.subr.bf16.mxu1 %v6192_v28 }
0x3781   :  { %v3471_v27 = vpop.f32.mrb[88].mxu1 }
0x3782   :  { %v3477_v3 = vpack.c.bf16 %v3471_v27, %v3471_v27  ;;  %v5633_v32 = vpop.f32.mrb[89].mxu1 }
0x3783   :  { %v3474_v42 = vpop.f32.mrb[90].mxu1 }
0x3784   :  { %v5634_v34 = vpop.f32.mrb[91].mxu1  ;;  %5644 = vmatmul.mubr.msk.bf16.vlgmr.msra.gmra.mrb[92].mxu1 %vm1340_vm5, %v3477_v3  ;;  %v7280_v3 = vld [vmem:[%s7751_s3 + $0x48] sm:$0xff]  }
0x3785   :  { %5648 = vmatpush3.bf16.msra.mxu1 %v6853_v37  ;;  %5651 = vmatprep.mubr.msk.bf16.mxu1 %vm6193_vm4, %v6192_v28 }
0x3786   :  { %5649 = vmatprep.subr.bf16.mxu1 %v6192_v28 }
0x3789   :  { %5650 = vmatpush3.bf16.msra.mxu1 %v6860_v61 }
0x378a   :  { %5671 = vmatprep.subr.bf16.mxu1 %v6192_v28 }
0x3790   :  { %5652 = vmatmul.mubr.msk.bf16.vlgmr.msra.gmra.mrb[92].mxu1 %vm155_vm0, %v3377_v2 }
0x3791   :  { %5672 = vmatpush3.bf16.msra.mxu1 %v7122_v62  ;;  %5675 = vmatprep.mubr.msk.bf16.mxu1 %vm6193_vm4, %v6192_v28 }
0x3792   :  { %5673 = vmatprep.subr.bf16.mxu1 %v6192_v28 }
0x3795   :  { %5674 = vmatpush3.bf16.msra.mxu1 %v7131_v5 }
0x3796   :  { %5691 = vmatprep.subr.bf16.mxu1 %v6192_v28 }
0x3798   :  { %5676 = vmatmul.mubr.msk.bf16.vlgmr.msra.gmra.mrb[96].mxu1 %vm155_vm0, %v3377_v2 }
0x3799   :  { %5692 = vmatpush3.bf16.msra.mxu1 %v6738_v4  ;;  %5699 = vmatprep.mubr.msk.bf16.mxu1 %vm6193_vm4, %v6192_v28 }
0x379a   :  { %5693 = vmatprep.subr.bf16.mxu1 %v6192_v28 }
0x379d   :  { %5694 = vmatpush3.bf16.msra.mxu1 %v6745_v8 }
0x379e   :  { %5695 = vmatprep.subr.bf16.mxu1 %v6192_v28 }
0x37a1   :  { %5696 = vmatpush3.bf16.msra.mxu1 %v6753_v54 }
0x37a2   :  { %5697 = vmatprep.subr.bf16.mxu1 %v6192_v28 }
0x37a5   :  { %5698 = vmatpush3.bf16.msra.mxu1 %v6755_v46 }
0x37a6   :  { %5703 = vmatprep.subr.bf16.mxu1 %v6192_v28 }
0x3863   :  { %v3555_v41 = vpop.f32.mrb[92].mxu1 }
0x3864   :  { %6080 = vtanh.f32 %v3555_v41  ;;  %v5653_v44 = vpop.f32.mrb[93].mxu1 }
0x3865   :  { %v3558_v45 = vpop.f32.mrb[94].mxu1 }
0x3866   :  { %v5654_v37 = vpop.f32.mrb[95].mxu1 }
0x386b   :  { %v3743_v61 = vpop.f32.mrb[96].mxu1 }
0x386c   :  { %v5677_v59 = vpop.f32.mrb[97].mxu1 }
0x386d   :  { %v3746_v7 = vpop.f32.mrb[98].mxu1 }
0x386e   :  { %v6081_v24 = vpop.eup %6080  ;;  %v5678_v15 = vpop.f32.mrb[99].mxu1 }
0x386f   :  { %v3562_v9 = vpack.c.bf16 %v6081_v24, %v6081_v24 }
0x3871   :  { %5660 = vmatmul.mubr.msk.bf16.vlgmr.msra.gmra.mrb[92].mxu0 %vm155_vm0, %v3562_v9 }
0x3872   :  { %5664 = vmatpush3.bf16.msra.mxu0 %v7150_v56  ;;  %5667 = vmatprep.mubr.msk.bf16.mxu0 %vm6193_vm4, %v6192_v28 }
0x3873   :  { %5665 = vmatprep.subr.bf16.mxu0 %v6192_v28 }
0x3876   :  { %5666 = vmatpush3.bf16.msra.mxu0 %v7159_v57 }
0x3877   :  { %5679 = vmatprep.subr.bf16.mxu0 %v6192_v28 }
0x3879   :  { %5668 = vmatmul.mubr.msk.bf16.vlgmr.msra.gmra.mrb[96].mxu0 %vm155_vm0, %v3562_v9 }
0x387a   :  { %5687 = vmatprep.mubr.msk.bf16.mxu0 %vm6193_vm4, %v6192_v28 }
0x387f   :  { %5680 = vmatpush3.bf16.xpose.msra.mxu0 %v6777_v51 }
0x3880   :  { %5681 = vmatprep.subr.bf16.mxu0 %v6192_v28 }
0x3887   :  { %5682 = vmatpush3.bf16.xpose.msra.mxu0 %v6782_v60 }
0x3888   :  { %5683 = vmatprep.subr.bf16.mxu0 %v6192_v28 }
0x388f   :  { %5684 = vmatpush3.bf16.xpose.msra.mxu0 %v6787_v35 }
0x3890   :  { %5685 = vmatprep.subr.bf16.mxu0 %v6192_v28 }
0x3897   :  { %5686 = vmatpush3.bf16.xpose.msra.mxu0 %v6792_v39 }
0x3898   :  { %5723 = vmatprep.subr.bf16.mxu0 %v6192_v28 }
0x3944   :  { %v7253_v23 = vpop.f32.mrb[92].mxu0 }
0x3945   :  { %v5661_v33 = vpop.f32.mrb[93].mxu0 }
0x3946   :  { %v3603_v47 = vpop.f32.mrb[94].mxu0 }
0x3947   :  { %v5662_v48 = vpop.f32.mrb[95].mxu0 }
0x3948   :  { %v7292_v48 = vld [vmem:[%s7751_s3 + $0xc0] sm:$0xff]  }
0x394c   :  { %v3702_v63 = vpop.f32.mrb[96].mxu0 }
0x394d   :  { %v3708_v0 = vadd.f32 %v3702_v63, %v6337_v38  ;;  %v5669_v20 = vpop.f32.mrb[97].mxu0  ;;  %v7301_v63 = vld [vmem:[%s7751_s3 + $0xc8] sm:$0xff]  }
0x394e   :  { %v3705_v2 = vpop.f32.mrb[98].mxu0  ;;  %v7315_v20 = vld [vmem:[%s7751_s3 + $0xd8] sm:$0xff]  }
0x394f   :  { %v3749_v50 = vadd.f32 %v3743_v61, %v3708_v0  ;;  %v5670_v6 = vpop.f32.mrb[99].mxu0  ;;  %v7308_v0 = vld [vmem:[%s7751_s3 + $0xd0] sm:$0xff]  }
0x3951   :  { %v3750_v22 = vmul.f32 %v3749_v50, %v6351_v43 }
0x3953   :  { %6082 = vtanh.f32 %v3750_v22 }
0x395d   :  { %v6083_v25 = vpop.eup %6082 }
0x395e   :  { %v3752_v52 = vmul.f32 0.5, %v6083_v25 }
0x3960   :  { %v3753_v18 = vadd.f32 0.5, %v3752_v52  ;;  %v7323_v52 = vld [vmem:[%s7751_s3 + $0xb0] sm:$0xff]  }
0x3962   :  { %v3754_v29 = vsel %vm6340_vm3, %v6083_v25, %v3753_v18  ;;  %v7332_v18 = vld [vmem:[%s7751_s3 + $0xb8] sm:$0xff]  }
0x3963   :  { %3757 = vrot.lane.b32.xlu0 %v3754_v29, %s6190_s5  ;;  %v3755_v38 = vmul.f32 %v3754_v29, %v7183_v58  ;;  %v7271_v58 = vld [vmem:[%s7751_s3 + $0x40] sm:$0xff]  }
0x39d5   :  { %v3758_v53 = vpop.permute.xlu0 %3757 }
0x39d6   :  { %v3760_v11 = vmul.f32 %v3758_v53, %v3754_v29 }
0x39d8   :  { %3762 = vrot.lane.b32.xlu1 %v3760_v11, %s6191_s29 }
0x3a4a   :  { %v3763_v31 = vpop.permute.xlu1 %3762 }
0x3a4b   :  { %v7262_v49 = vadd.f32 %v3763_v31, %v3755_v38 }
0x3a4d   :  { %6084 = vtanh.f32 %v7262_v49 }
0x3a57   :  { %v6085_v55 = vpop.eup %6084 }
0x3a58   :  { %3768 = vrot.lane.b32.xlu1 %v6085_v55, %s6190_s5 }
0x3aca   :  { %v3769_v21 = vpop.permute.xlu1 %3768 }
0x3acb   :  { %v3771_v19 = vmul.f32 %v3769_v21, %v3754_v29 }
0x3acd   :  { %v3772_v17 = vpack.c.bf16 %v3771_v19, %v3771_v19 }
0x3acf   :  { %3774 = vrot.lane.b32.xlu0 %v3772_v17, %s6191_s29 }
0x3b41   :  { %v3775_v27 = vpop.permute.xlu0 %3774 }
0x3b42   :  { %5688 = vmatmul.mubr.msk.bf16.vlgmr.msra.gmra.mrb[100].mxu0 %vm155_vm0, %v3775_v27 }
0x3b43   :  { %5724 = vmatpush3.bf16.msra.mxu0 %v7271_v58  ;;  %5727 = vmatprep.mubr.msk.bf16.mxu0 %vm6193_vm4, %v6192_v28 }
0x3b44   :  { %5725 = vmatprep.subr.bf16.mxu0 %v6192_v28 }
0x3b47   :  { %5726 = vmatpush3.bf16.msra.mxu0 %v7280_v3 }
0x3b48   :  { %5731 = vmatprep.subr.bf16.mxu0 %v6192_v28 }
0x3c15   :  { %v3813_v32 = vpop.f32.mrb[100].mxu0 }
0x3c16   :  { %v3819_v42 = vsel %vm6811_vm7, %v3813_v32, -1e+30  ;;  %v5689_v34 = vpop.f32.mrb[101].mxu0 }
0x3c17   :  { %v3820_v41 = vsel %vm1340_vm5, %v3819_v42, -inf  ;;  %v3816_v44 = vpop.f32.mrb[102].mxu0 }
0x3c18   :  { %3821 = vmax.xlane.f32.xlu1 %v3820_v41  ;;  %v5690_v45 = vpop.f32.mrb[103].mxu0 }
0x3ca5   :  { %v3822_v37 = vpop.xlane.xlu1 %3821 }
0x3ca6   :  { %v3823_v61 = vsub.f32 %v3819_v42, %v3822_v37 }
0x3ca8   :  { %v3824_v59 = vmul.f32 1.442695, %v3823_v61 }
0x3caa   :  { %6086 = vpow2.f32 %v3824_v59 }
0x3cb4   :  { %v6087_v7 = vpop.eup %6086 }
0x3cb5   :  { %v3826_v24 = vsel %vm1340_vm5, %v6087_v7, 0.0 }
0x3cb6   :  { %3827 = vadd.xlane.f32.xlu0 %v3826_v24 }
0x3d43   :  { %v3828_v15 = vpop.xlane.xlu0 %3827 }
0x3d44   :  { %6088 = vrcp.f32 %v3828_v15 }
0x3d4e   :  { %v6089_v9 = vpop.eup %6088 }
0x3d4f   :  { %v3830_v33 = vmul.f32 %v6089_v9, %v6087_v7 }
0x3d51   :  { %v3831_v47 = vpack.c.bf16 %v3830_v33, %v3830_v33 }
0x3d53   :  { %5700 = vmatmul.mubr.msk.bf16.vlgmr.msra.gmra.mrb[100].mxu1 %vm1340_vm5, %v3831_v47 }
0x3d54   :  { %5704 = vmatpush3.bf16.msra.mxu1 %v7292_v48  ;;  %5711 = vmatprep.mubr.msk.bf16.mxu1 %vm6193_vm4, %v6192_v28 }
0x3d55   :  { %5705 = vmatprep.subr.bf16.mxu1 %v6192_v28 }
0x3d58   :  { %5706 = vmatpush3.bf16.msra.mxu1 %v7301_v63 }
0x3d59   :  { %5707 = vmatprep.subr.bf16.mxu1 %v6192_v28 }
0x3d5c   :  { %5708 = vmatpush3.bf16.msra.mxu1 %v7308_v0 }
0x3d5d   :  { %5709 = vmatprep.subr.bf16.mxu1 %v6192_v28 }
0x3d60   :  { %5710 = vmatpush3.bf16.msra.mxu1 %v7315_v20 }
0x3d61   :  { %5715 = vmatprep.subr.bf16.mxu1 %v6192_v28 }
0x3e26   :  { %v3869_v2 = vpop.f32.mrb[100].mxu1 }
0x3e27   :  { %v3875_v50 = vpack.c.bf16 %v3869_v2, %v3869_v2  ;;  %v5701_v6 = vpop.f32.mrb[101].mxu1 }
0x3e28   :  { %v3872_v22 = vpop.f32.mrb[102].mxu1 }
0x3e29   :  { %v5702_v25 = vpop.f32.mrb[103].mxu1  ;;  %5712 = vmatmul.mubr.msk.bf16.vlgmr.msra.gmra.mrb[104].mxu1 %vm1340_vm5, %v3875_v50 }
0x3e2a   :  { %5716 = vmatpush3.bf16.msra.mxu1 %v7323_v52  ;;  %5719 = vmatprep.mubr.msk.bf16.mxu1 %vm6193_vm4, %v6192_v28 }
0x3e2b   :  { %5717 = vmatprep.subr.bf16.mxu1 %v6192_v28 }
0x3e2e   :  { %5718 = vmatpush3.bf16.msra.mxu1 %v7332_v18 }
0x3e2f   :  { %5739 = vmatprep.subr.bf16.mxu1 %v6192_v28 }
0x3e35   :  { %5720 = vmatmul.mubr.msk.bf16.vlgmr.msra.gmra.mrb[104].mxu1 %vm155_vm0, %v3775_v27 }
0x3e36   :  { %5740 = vmatpush3.bf16.msra.mxu1 %v7122_v62  ;;  %5743 = vmatprep.mubr.msk.bf16.mxu1 %vm6193_vm4, %v6192_v28 }
0x3e37   :  { %5741 = vmatprep.subr.bf16.mxu1 %v6192_v28 }
0x3e3a   :  { %5742 = vmatpush3.bf16.msra.mxu1 %v7131_v5 }
0x3e3b   :  { %5759 = vmatprep.subr.bf16.mxu1 %v6192_v28 }
0x3e3d   :  { %5744 = vmatmul.mubr.msk.bf16.vlgmr.msra.gmra.mrb[108].mxu1 %vm155_vm0, %v3775_v27 }
0x3e3e   :  { %5760 = vmatpush3.bf16.msra.mxu1 %v6738_v4  ;;  %5767 = vmatprep.mubr.msk.bf16.mxu1 %vm6193_vm4, %v6192_v28 }
0x3e3f   :  { %5761 = vmatprep.subr.bf16.mxu1 %v6192_v28 }
0x3e42   :  { %5762 = vmatpush3.bf16.msra.mxu1 %v6745_v8 }
0x3e43   :  { %5763 = vmatprep.subr.bf16.mxu1 %v6192_v28 }
0x3e46   :  { %5764 = vmatpush3.bf16.msra.mxu1 %v6753_v54 }
0x3e47   :  { %5765 = vmatprep.subr.bf16.mxu1 %v6192_v28 }
0x3e4a   :  { %5766 = vmatpush3.bf16.msra.mxu1 %v6755_v46 }
0x3e4b   :  { %5771 = vmatprep.subr.bf16.mxu1 %v6192_v28 }
0x3f08   :  { %v3953_v29 = vpop.f32.mrb[104].mxu1 }
0x3f09   :  { %6090 = vtanh.f32 %v3953_v29  ;;  %v5721_v53 = vpop.f32.mrb[105].mxu1 }
0x3f0a   :  { %v3956_v11 = vpop.f32.mrb[106].mxu1 }
0x3f0b   :  { %v5722_v38 = vpop.f32.mrb[107].mxu1 }
0x3f10   :  { %v4141_v31 = vpop.f32.mrb[108].mxu1 }
0x3f11   :  { %v5745_v55 = vpop.f32.mrb[109].mxu1 }
0x3f12   :  { %v4144_v21 = vpop.f32.mrb[110].mxu1 }
0x3f13   :  { %v6091_v19 = vpop.eup %6090  ;;  %v5746_v17 = vpop.f32.mrb[111].mxu1 }
0x3f14   :  { %v3960_v27 = vpack.c.bf16 %v6091_v19, %v6091_v19 }
0x3f16   :  { %5728 = vmatmul.mubr.msk.bf16.vlgmr.msra.gmra.mrb[104].mxu0 %vm155_vm0, %v3960_v27 }
0x3f17   :  { %5732 = vmatpush3.bf16.msra.mxu0 %v7150_v56  ;;  %5735 = vmatprep.mubr.msk.bf16.mxu0 %vm6193_vm4, %v6192_v28 }
0x3f18   :  { %5733 = vmatprep.subr.bf16.mxu0 %v6192_v28 }
0x3f1b   :  { %5734 = vmatpush3.bf16.msra.mxu0 %v7159_v57 }
0x3f1c   :  { %5747 = vmatprep.subr.bf16.mxu0 %v6192_v28 }
0x3f1e   :  { %5736 = vmatmul.mubr.msk.bf16.vlgmr.msra.gmra.mrb[108].mxu0 %vm155_vm0, %v3960_v27 }
0x3f1f   :  { %5755 = vmatprep.mubr.msk.bf16.mxu0 %vm6193_vm4, %v6192_v28 }
0x3f24   :  { %5748 = vmatpush3.bf16.xpose.msra.mxu0 %v6777_v51 }
0x3f25   :  { %5749 = vmatprep.subr.bf16.mxu0 %v6192_v28 }
0x3f2c   :  { %5750 = vmatpush3.bf16.xpose.msra.mxu0 %v6782_v60 }
0x3f2d   :  { %5751 = vmatprep.subr.bf16.mxu0 %v6192_v28 }
0x3f34   :  { %5752 = vmatpush3.bf16.xpose.msra.mxu0 %v6787_v35 }
0x3f35   :  { %5753 = vmatprep.subr.bf16.mxu0 %v6192_v28 }
0x3f3c   :  { %5754 = vmatpush3.bf16.xpose.msra.mxu0 %v6792_v39 }
0x3f3d   :  { %5791 = vmatprep.subr.bf16.mxu0 %v6192_v28 }
0x3fe9   :  { %v7372_v32 = vpop.f32.mrb[104].mxu0 }
0x3fea   :  { %v5729_v42 = vpop.f32.mrb[105].mxu0 }
0x3feb   :  { %v4001_v34 = vpop.f32.mrb[106].mxu0 }
0x3fec   :  { %v5730_v41 = vpop.f32.mrb[107].mxu0 }
0x3ff1   :  { %v4100_v44 = vpop.f32.mrb[108].mxu0 }
0x3ff2   :  { %v4106_v45 = vadd.f32 %v4100_v44, %v6324_v30  ;;  %v5737_v37 = vpop.f32.mrb[109].mxu0 }
0x3ff3   :  { %v4103_v61 = vpop.f32.mrb[110].mxu0 }
0x3ff4   :  { %v4147_v59 = vadd.f32 %v4141_v31, %v4106_v45  ;;  %v5738_v7 = vpop.f32.mrb[111].mxu0 }
0x3ff6   :  { %v4148_v24 = vmul.f32 %v4147_v59, %v6351_v43 }
0x3ff8   :  { %6092 = vtanh.f32 %v4148_v24 }
0x4002   :  { %v6093_v15 = vpop.eup %6092 }
0x4003   :  { %v4150_v9 = vmul.f32 0.5, %v6093_v15 }
0x4005   :  { %v4151_v33 = vadd.f32 0.5, %v4150_v9 }
0x4007   :  { %v4152_v47 = vsel %vm6340_vm3, %v6093_v15, %v4151_v33 }
0x4008   :  { %4155 = vrot.lane.b32.xlu0 %v4152_v47, %s6190_s5  ;;  %v4153_v30 = vmul.f32 %v4152_v47, %v7262_v49 }
0x407a   :  { %v4156_v2 = vpop.permute.xlu0 %4155 }
0x407b   :  { %v4158_v50 = vmul.f32 %v4156_v2, %v4152_v47 }
0x407d   :  { %4160 = vrot.lane.b32.xlu1 %v4158_v50, %s6191_s29 }
0x40ef   :  { %v4161_v6 = vpop.permute.xlu1 %4160 }
0x40f0   :  { %v7381_v22 = vadd.f32 %v4161_v6, %v4153_v30 }
0x40f2   :  { %6094 = vtanh.f32 %v7381_v22 }
0x40fc   :  { %v6095_v25 = vpop.eup %6094 }
0x40fd   :  { %4166 = vrot.lane.b32.xlu1 %v6095_v25, %s6190_s5 }
0x416f   :  { %v4167_v29 = vpop.permute.xlu1 %4166 }
0x4170   :  { %v4169_v53 = vmul.f32 %v4167_v29, %v4152_v47 }
0x4172   :  { %v4170_v11 = vpack.c.bf16 %v4169_v53, %v4169_v53 }
0x4174   :  { %4172 = vrot.lane.b32.xlu0 %v4170_v11, %s6191_s29 }
0x41e6   :  { %v4173_v38 = vpop.permute.xlu0 %4172 }
0x41e7   :  { %5756 = vmatmul.mubr.msk.bf16.vlgmr.msra.gmra.mrb[112].mxu0 %vm155_vm0, %v4173_v38 }
0x41e8   :  { %5792 = vmatpush3.bf16.msra.mxu0 %v7271_v58  ;;  %5795 = vmatprep.mubr.msk.bf16.mxu0 %vm6193_vm4, %v6192_v28 }
0x41e9   :  { %5793 = vmatprep.subr.bf16.mxu0 %v6192_v28 }
0x41ec   :  { %5794 = vmatpush3.bf16.msra.mxu0 %v7280_v3 }
0x41ed   :  { %5799 = vmatprep.subr.bf16.mxu0 %v6192_v28 }
0x42ba   :  { %v4211_v49 = vpop.f32.mrb[112].mxu0 }
0x42bb   :  { %v4217_v31 = vsel %vm6811_vm7, %v4211_v49, -1e+30  ;;  %v5757_v55 = vpop.f32.mrb[113].mxu0 }
0x42bc   :  { %v4218_v21 = vsel %vm1340_vm5, %v4217_v31, -inf  ;;  %v4214_v19 = vpop.f32.mrb[114].mxu0 }
0x42bd   :  { %4219 = vmax.xlane.f32.xlu1 %v4218_v21  ;;  %v5758_v17 = vpop.f32.mrb[115].mxu0 }
0x434a   :  { %v4220_v27 = vpop.xlane.xlu1 %4219 }
0x434b   :  { %v4221_v42 = vsub.f32 %v4217_v31, %v4220_v27 }
0x434d   :  { %v4222_v34 = vmul.f32 1.442695, %v4221_v42 }
0x434f   :  { %6096 = vpow2.f32 %v4222_v34 }
0x4359   :  { %v6097_v41 = vpop.eup %6096 }
0x435a   :  { %v4224_v44 = vsel %vm1340_vm5, %v6097_v41, 0.0 }
0x435b   :  { %4225 = vadd.xlane.f32.xlu0 %v4224_v44 }
0x43e8   :  { %v4226_v45 = vpop.xlane.xlu0 %4225 }
0x43e9   :  { %6098 = vrcp.f32 %v4226_v45 }
0x43f3   :  { %v6099_v37 = vpop.eup %6098 }
0x43f4   :  { %v4228_v61 = vmul.f32 %v6099_v37, %v6097_v41 }
0x43f6   :  { %v4229_v59 = vpack.c.bf16 %v4228_v61, %v4228_v61 }
0x43f8   :  { %5768 = vmatmul.mubr.msk.bf16.vlgmr.msra.gmra.mrb[112].mxu1 %vm1340_vm5, %v4229_v59 }
0x43f9   :  { %5772 = vmatpush3.bf16.msra.mxu1 %v7292_v48  ;;  %5779 = vmatprep.mubr.msk.bf16.mxu1 %vm6193_vm4, %v6192_v28 }
0x43fa   :  { %5773 = vmatprep.subr.bf16.mxu1 %v6192_v28 }
0x43fd   :  { %5774 = vmatpush3.bf16.msra.mxu1 %v7301_v63 }
0x43fe   :  { %5775 = vmatprep.subr.bf16.mxu1 %v6192_v28 }
0x4401   :  { %5776 = vmatpush3.bf16.msra.mxu1 %v7308_v0 }
0x4402   :  { %5777 = vmatprep.subr.bf16.mxu1 %v6192_v28 }
0x4405   :  { %5778 = vmatpush3.bf16.msra.mxu1 %v7315_v20 }
0x4406   :  { %5783 = vmatprep.subr.bf16.mxu1 %v6192_v28 }
0x44cb   :  { %v4267_v7 = vpop.f32.mrb[112].mxu1 }
0x44cc   :  { %v4273_v24 = vpack.c.bf16 %v4267_v7, %v4267_v7  ;;  %v5769_v15 = vpop.f32.mrb[113].mxu1  ;;  %v6195_v7 = vmov 1  }
0x44cd   :  { %v4270_v9 = vpop.f32.mrb[114].mxu1  ;;  %5911 = vset.pattern.permute.xlu1 %v6195_v7 }
0x44ce   :  { %v5770_v33 = vpop.f32.mrb[115].mxu1  ;;  %5780 = vmatmul.mubr.msk.bf16.vlgmr.msra.gmra.mrb[116].mxu1 %vm1340_vm5, %v4273_v24 }
0x44cf   :  { %5784 = vmatpush3.bf16.msra.mxu1 %v7323_v52  ;;  %5787 = vmatprep.mubr.msk.bf16.mxu1 %vm6193_vm4, %v6192_v28  ;;  %v2013_v33 = vsel %vm7478_vm12, -1e+30, %v6917_v13 }
0x44d0   :  { %5785 = vmatprep.subr.bf16.mxu1 %v6192_v28 }
0x44d3   :  { %5786 = vmatpush3.bf16.msra.mxu1 %v7332_v18 }
0x44d4   :  { %5807 = vmatprep.subr.bf16.mxu1 %v6192_v28 }
0x44da   :  { %5788 = vmatmul.mubr.msk.bf16.vlgmr.msra.gmra.mrb[116].mxu1 %vm155_vm0, %v4173_v38 }
0x44db   :  { %5808 = vmatpush3.bf16.msra.mxu1 %v7122_v62  ;;  %5811 = vmatprep.mubr.msk.bf16.mxu1 %vm6193_vm4, %v6192_v28 }
0x44dc   :  { %5809 = vmatprep.subr.bf16.mxu1 %v6192_v28 }
0x44df   :  { %5810 = vmatpush3.bf16.msra.mxu1 %v7131_v5 }
0x44e0   :  { %5827 = vmatprep.subr.bf16.mxu1 %v6192_v28 }
0x44e2   :  { %5812 = vmatmul.mubr.msk.bf16.vlgmr.msra.gmra.mrb[120].mxu1 %vm155_vm0, %v4173_v38 }
0x44e3   :  { %5828 = vmatpush3.bf16.msra.mxu1 %v6738_v4  ;;  %5835 = vmatprep.mubr.msk.bf16.mxu1 %vm6193_vm4, %v6192_v28 }
0x44e4   :  { %5829 = vmatprep.subr.bf16.mxu1 %v6192_v28 }
0x44e7   :  { %5830 = vmatpush3.bf16.msra.mxu1 %v6745_v8 }
0x44e8   :  { %5831 = vmatprep.subr.bf16.mxu1 %v6192_v28 }
0x44eb   :  { %5832 = vmatpush3.bf16.msra.mxu1 %v6753_v54 }
0x44ec   :  { %5833 = vmatprep.subr.bf16.mxu1 %v6192_v28 }
0x44ef   :  { %5834 = vmatpush3.bf16.msra.mxu1 %v6755_v46 }
0x44f0   :  { %5839 = vmatprep.subr.bf16.mxu1 %v6192_v28 }
0x45ad   :  { %v4351_v62 = vpop.f32.mrb[116].mxu1 }
0x45ae   :  { %6100 = vtanh.f32 %v4351_v62  ;;  %v5789_v4 = vpop.f32.mrb[117].mxu1  ;;  %v2014_v62 = vsel %vm1340_vm5, %v2013_v33, -inf }
0x45af   :  { %v4354_v5 = vpop.f32.mrb[118].mxu1  ;;  %v7490_v4 = vld [vmem:[%s7756_s2] sm:$0xff] }
0x45b0   :  { %v5790_v47 = vpop.f32.mrb[119].mxu1  ;;  %vm2035_vm1 = vcmp.ne.s32.totalorder %v7490_v4, 0 }
0x45b5   :  { %v4539_v2 = vpop.f32.mrb[120].mxu1 }
0x45b6   :  { %v5813_v50 = vpop.f32.mrb[121].mxu1 }
0x45b7   :  { %v4542_v30 = vpop.f32.mrb[122].mxu1 }
0x45b8   :  { %v6101_v6 = vpop.eup %6100  ;;  %v5814_v8 = vpop.f32.mrb[123].mxu1 }
0x45b9   :  { %v4358_v25 = vpack.c.bf16 %v6101_v6, %v6101_v6 }
0x45bb   :  { %5796 = vmatmul.mubr.msk.bf16.vlgmr.msra.gmra.mrb[116].mxu0 %vm155_vm0, %v4358_v25 }
0x45bc   :  { %5800 = vmatpush3.bf16.msra.mxu0 %v7150_v56  ;;  %5803 = vmatprep.mubr.msk.bf16.mxu0 %vm6193_vm4, %v6192_v28 }
0x45bd   :  { %5801 = vmatprep.subr.bf16.mxu0 %v6192_v28 }
0x45c0   :  { %5802 = vmatpush3.bf16.msra.mxu0 %v7159_v57 }
0x45c1   :  { %5815 = vmatprep.subr.bf16.mxu0 %v6192_v28 }
0x45c3   :  { %5804 = vmatmul.mubr.msk.bf16.vlgmr.msra.gmra.mrb[120].mxu0 %vm155_vm0, %v4358_v25 }
0x45c4   :  { %5823 = vmatprep.mubr.msk.bf16.mxu0 %vm6193_vm4, %v6192_v28 }
0x45c9   :  { %5816 = vmatpush3.bf16.xpose.msra.mxu0 %v6777_v51 }
0x45ca   :  { %5817 = vmatprep.subr.bf16.mxu0 %v6192_v28 }
0x45d1   :  { %5818 = vmatpush3.bf16.xpose.msra.mxu0 %v6782_v60 }
0x45d2   :  { %5819 = vmatprep.subr.bf16.mxu0 %v6192_v28 }
0x45d9   :  { %5820 = vmatpush3.bf16.xpose.msra.mxu0 %v6787_v35 }
0x45da   :  { %5821 = vmatprep.subr.bf16.mxu0 %v6192_v28 }
0x45e1   :  { %5822 = vmatpush3.bf16.xpose.msra.mxu0 %v6792_v39 }
0x45e2   :  { %5859 = vmatprep.subr.bf16.mxu0 %v6192_v28 }
0x468e   :  { %v7451_v54 = vpop.f32.mrb[116].mxu0 }
0x468f   :  { %v5797_v46 = vpop.f32.mrb[117].mxu0 }
0x4690   :  { %v4399_v56 = vpop.f32.mrb[118].mxu0 }
0x4691   :  { %v5798_v57 = vpop.f32.mrb[119].mxu0 }
0x4696   :  { %v4498_v51 = vpop.f32.mrb[120].mxu0 }
0x4697   :  { %v4504_v29 = vadd.f32 %v4498_v51, %v6335_v36  ;;  %v5805_v53 = vpop.f32.mrb[121].mxu0 }
0x4698   :  { %v4501_v60 = vpop.f32.mrb[122].mxu0 }
0x4699   :  { %v4545_v11 = vadd.f32 %v4539_v2, %v4504_v29  ;;  %v5806_v38 = vpop.f32.mrb[123].mxu0  ;;  %v2041_v60 = vsel %vm2040_vm15, %v2013_v33, -inf }
0x469b   :  { %v4546_v35 = vmul.f32 %v4545_v11, %v6351_v43 }
0x469d   :  { %6102 = vtanh.f32 %v4546_v35 }
0x46a7   :  { %v6103_v49 = vpop.eup %6102 }
0x46a8   :  { %v4548_v31 = vmul.f32 0.5, %v6103_v49 }
0x46aa   :  { %v4549_v39 = vadd.f32 0.5, %v4548_v31 }
0x46ac   :  { %v4550_v55 = vsel %vm6340_vm3, %v6103_v49, %v4549_v39 }
0x46ad   :  { %4553 = vrot.lane.b32.xlu0 %v4550_v55, %s6190_s5  ;;  %v4551_v36 = vmul.f32 %v4550_v55, %v7381_v22 }
0x471f   :  { %v4554_v21 = vpop.permute.xlu0 %4553 }
0x4720   :  { %v4556_v19 = vmul.f32 %v4554_v21, %v4550_v55 }
0x4722   :  { %4558 = vrot.lane.b32.xlu1 %v4556_v19, %s6191_s29 }
0x4794   :  { %v4559_v17 = vpop.permute.xlu1 %4558 }
0x4795   :  { %v4561_v27 = vadd.f32 %v4559_v17, %v4551_v36 }
0x4797   :  { %6104 = vtanh.f32 %v4561_v27 }
0x47a1   :  { %v6105_v42 = vpop.eup %6104 }
0x47a2   :  { %4564 = vrot.lane.b32.xlu1 %v6105_v42, %s6190_s5 }
0x4814   :  { %v4565_v43 = vpop.permute.xlu1 %4564 }
0x4815   :  { %v4567_v34 = vmul.f32 %v4565_v43, %v4550_v55 }
0x4817   :  { %v4568_v41 = vpack.c.bf16 %v4567_v34, %v4567_v34 }
0x4819   :  { %4570 = vrot.lane.b32.xlu0 %v4568_v41, %s6191_s29 }
0x488b   :  { %v7462_v40 = vpop.permute.xlu0 %4570 }
0x488c   :  { %5824 = vmatmul.mubr.msk.bf16.vlgmr.msra.gmra.mrb[124].mxu0 %vm155_vm0, %v7462_v40 }
0x488d   :  { %5860 = vmatpush3.bf16.msra.mxu0 %v7271_v58  ;;  %5863 = vmatprep.mubr.msk.bf16.mxu0 %vm6193_vm4, %v6192_v28 }
0x488e   :  { %5861 = vmatprep.subr.bf16.mxu0 %v6192_v28 }
0x4891   :  { %5862 = vmatpush3.bf16.msra.mxu0 %v7280_v3 }
0x495f   :  { %v4609_v22 = vpop.f32.mrb[124].mxu0 }
0x4960   :  { %v4615_v44 = vsel %vm6811_vm7, %v4609_v22, -1e+30  ;;  %v5825_v45 = vpop.f32.mrb[125].mxu0 }
0x4961   :  { %v4616_v37 = vsel %vm1340_vm5, %v4615_v44, -inf  ;;  %v4612_v61 = vpop.f32.mrb[126].mxu0 }
0x4962   :  { %4617 = vmax.xlane.f32.xlu1 %v4616_v37  ;;  %v5826_v59 = vpop.f32.mrb[127].mxu0 }
0x4963   :  { %v2412_v59 = vsel %vm7478_vm12, -1e+30, %v6996_v12 }
0x49ef   :  { %v4618_v58 = vpop.xlane.xlu1 %4617 }
0x49f0   :  { %v4619_v24 = vsub.f32 %v4615_v44, %v4618_v58  ;;  %v2413_v58 = vsel %vm1340_vm5, %v2412_v59, -inf }
0x49f2   :  { %v4620_v15 = vmul.f32 1.442695, %v4619_v24 }
0x49f4   :  { %6106 = vpow2.f32 %v4620_v15 }
0x49fe   :  { %v6107_v3 = vpop.eup %6106 }
0x49ff   :  { %v4622_v9 = vsel %vm1340_vm5, %v6107_v3, 0.0 }
0x4a00   :  { %4623 = vadd.xlane.f32.xlu0 %v4622_v9 }
0x4a04   :  { %2015 = vmax.xlane.f32.xlu0 %v2014_v62 }
0x4a1a   :  { %2027 = vperm.xlu0 %5908, %v7490_v4  }
0x4a1e   :  { %5909 = vset.pattern.permute.xlu0 %v6195_v7 }
0x4a1f   :  { %2058 = vperm.xlu0 %5909, %v7490_v4   ;;  %v1576_v4 = vld [vmem:[%s7756_s2 + $0x8] sm:$0xff] }
0x4a20   :  { %vm2434_vm2 = vcmp.ne.s32.totalorder %v1576_v4, 0 }
0x4a23   :  { %2062 = vrot.lane.b32.xlu0 %v2013_v33, %s6190_s5 }
0x4a24   :  { %5910 = vset.pattern.permute.xlu0 %v6188_v1 }
0x4a8d   :  { %v4624_v13 = vpop.xlane.xlu0 %4623 }
0x4a8e   :  { %6108 = vrcp.f32 %v4624_v13 }
0x4a91   :  { %v7497_v5 = vpop.xlane.xlu0 %2015 }
0x4a92   :  { %v2017_v47 = vsub.f32 %v2013_v33, %v7497_v5 }
0x4a94   :  { %v2018_v2 = vmul.f32 1.442695, %v2017_v47 }
0x4a96   :  { %6110 = vpow2.f32 %v2018_v2 }
0x4a98   :  { %v6109_v50 = vpop.eup %6108 }
0x4a99   :  { %v4626_v30 = vmul.f32 %v6109_v50, %v6107_v3  ;;  %v2028_v6 = vpop.permute.xlu0 %2027 }
0x4a9a   :  { %vm2029_vm13 = vcmp.eq.s32.totalorder %v6320_v26, %v2028_v6 }
0x4a9b   :  { %v4627_v8 = vpack.c.bf16 %v4626_v30, %v4626_v30  ;;  %v2030_v57 = vsel %vm2029_vm13, %v2013_v33, 0.0 }
0x4a9c   :  { %v2031_v53 = vsel %vm1340_vm5, %v2030_v57, 0.0 }
0x4a9d   :  { %5836 = vmatmul.mubr.msk.bf16.vlgmr.msra.gmra.mrb[124].mxu1 %vm1340_vm5, %v4627_v8 }
0x4a9e   :  { %v2059_v25 = vpop.permute.xlu0 %2058  ;;  %5840 = vmatpush3.bf16.msra.mxu1 %v7292_v48  ;;  %5847 = vmatprep.mubr.msk.bf16.mxu1 %vm6193_vm4, %v6192_v28 }
0x4a9f   :  { %5841 = vmatprep.subr.bf16.mxu1 %v6192_v28  ;;  %vm2060_vm14 = vcmp.eq.s32.totalorder %v6320_v26, %v2059_v25  ;;  %v2439_v25 = vsel %vm2040_vm15, %v2412_v59, -inf }
0x4aa0   :  { %v6111_v46 = vpop.eup %6110 }
0x4aa1   :  { %v2020_v56 = vsel %vm1340_vm5, %v6111_v46, 0.0 }
0x4aa2   :  { %2021 = vadd.xlane.f32.xlu1 %v2020_v56  ;;  %v2063_v51 = vpop.permute.xlu0 %2062  ;;  %5842 = vmatpush3.bf16.msra.mxu1 %v7301_v63 }
0x4aa3   :  { %v2065_v29 = vsel %vm2060_vm14, %v2063_v51, 0.0  ;;  %5843 = vmatprep.subr.bf16.mxu1 %v6192_v28 }
0x4aa4   :  { %v2066_v48 = vsel %vm1340_vm5, %v2065_v29, 0.0 }
0x4aa5   :  { %2067 = vadd.xlane.f32.xlu0 %v2066_v48 }
0x4aa6   :  { %2032 = vadd.xlane.f32.xlu1 %v2031_v53  ;;  %5844 = vmatpush3.bf16.msra.mxu1 %v7308_v0 }
0x4aa7   :  { %5845 = vmatprep.subr.bf16.mxu1 %v6192_v28 }
0x4aaa   :  { %2042 = vmax.xlane.f32.xlu1 %v2041_v60  ;;  %5846 = vmatpush3.bf16.msra.mxu1 %v7315_v20  ;;  %v4952_v60 = vsel %vm2434_vm2, 1.0, %v6192_v28 }
0x4aab   :  { %5851 = vmatprep.subr.bf16.mxu1 %v6192_v28 }
0x4b2f   :  { %v7517_v63 = vpop.xlane.xlu1 %2021 }
0x4b33   :  { %v7519_v11 = vpop.xlane.xlu1 %2032 }
0x4b37   :  { %v2043_v38 = vpop.xlane.xlu1 %2042 }
0x4b38   :  { %v2044_v35 = vsub.f32 %v2013_v33, %v2043_v38 }
0x4b3a   :  { %v2045_v49 = vmul.f32 1.442695, %v2044_v35 }
0x4b3c   :  { %6112 = vpow2.f32 %v2045_v49 }
0x4b46   :  { %v6113_v31 = vpop.eup %6112 }
0x4b47   :  { %2048 = vrot.lane.b32.xlu1 %v6113_v31, %s6190_s5 }
0x4b70   :  { %v4665_v0 = vpop.f32.mrb[124].mxu1 }
0x4b71   :  { %v4671_v39 = vpack.c.bf16 %v4665_v0, %v4665_v0  ;;  %v5837_v55 = vpop.f32.mrb[125].mxu1 }
0x4b72   :  { %v4668_v21 = vpop.f32.mrb[126].mxu1 }
0x4b73   :  { %v5838_v19 = vpop.f32.mrb[127].mxu1  ;;  %5848 = vmatmul.mubr.msk.bf16.vlgmr.msra.gmra.mrb[128].mxu1 %vm1340_vm5, %v4671_v39 }
0x4b74   :  { %5852 = vmatpush3.bf16.msra.mxu1 %v7323_v52  ;;  %5855 = vmatprep.mubr.msk.bf16.mxu1 %vm6193_vm4, %v6192_v28 }
0x4b75   :  { %5853 = vmatprep.subr.bf16.mxu1 %v6192_v28 }
0x4b78   :  { %5854 = vmatpush3.bf16.msra.mxu1 %v7332_v18  ;;  %v2068_v18 = vpop.xlane.xlu0 %2067 }
0x4b7f   :  { %5856 = vmatmul.mubr.msk.bf16.vlgmr.msra.gmra.mrb[128].mxu1 %vm155_vm0, %v7462_v40  ;;  %v4944_v40 = vsel %vm2035_vm1, 1.0, %v6192_v28 }
0x4bb9   :  { %v2049_v20 = vpop.permute.xlu1 %2048 }
0x4bba   :  { %v2051_v36 = vsel %vm1340_vm5, %v2049_v20, 0.0 }
0x4bbb   :  { %2052 = vadd.xlane.f32.xlu1 %v2051_v36 }
0x4c48   :  { %v2053_v17 = vpop.xlane.xlu1 %2052 }
0x4c49   :  { %6114 = vlog2.f32 %v2053_v17 }
0x4c52   :  { %v4749_v27 = vpop.f32.mrb[128].mxu1 }
0x4c53   :  { %v6115_v42 = vpop.eup %6114  ;;  %6116 = vtanh.f32 %v4749_v27  ;;  %v5857_v52 = vpop.f32.mrb[129].mxu1 }
0x4c54   :  { %v2055_v43 = vmul.f32 0.6931472, %v6115_v42  ;;  %v4752_v34 = vpop.f32.mrb[130].mxu1  ;;  %v2810_v42 = vsel %vm7478_vm12, -1e+30, %v7075_v14 }
0x4c55   :  { %v5858_v41 = vpop.f32.mrb[131].mxu1  ;;  %v2811_v52 = vsel %vm1340_vm5, %v2810_v42, -inf }
0x4c56   :  { %v2056_v22 = vadd.f32 %v2055_v43, %v2043_v38  ;;  %v1577_v43 = vld [vmem:[%s7756_s2 + $0x10] sm:$0xff] }
0x4c57   :  { %vm2832_vm6 = vcmp.ne.s32.totalorder %v1577_v43, 0 }
0x4c58   :  { %v2069_v44 = vsub.f32 %v2068_v18, %v2056_v22 }
0x4c5a   :  { %v2070_v45 = vmul.f32 %v4944_v40, %v2069_v44 }
0x4c5c   :  { %2072 = vrot.lane.b32.xlu1 %v2070_v45, %s6196_s13 }
0x4c5d   :  { %v6117_v37 = vpop.eup %6116 }
0x4c5e   :  { %v4756_v61 = vpack.c.bf16 %v6117_v37, %v6117_v37 }
0x4c60   :  { %5864 = vmatmul.mubr.msk.bf16.vlgmr.msra.gmra.mrb[128].mxu0 %vm155_vm0, %v4756_v61 }
0x4c80   :  { %2414 = vmax.xlane.f32.xlu1 %v2413_v58 }
0x4cce   :  { %v2073_v24 = vpop.permute.xlu1 %2072 }
0x4d0d   :  { %v2415_v15 = vpop.xlane.xlu1 %2414 }
0x4d0e   :  { %v2416_v3 = vsub.f32 %v2412_v59, %v2415_v15 }
0x4d10   :  { %v2417_v9 = vmul.f32 1.442695, %v2416_v3 }
0x4d12   :  { %6118 = vpow2.f32 %v2417_v9  ;;  %v2837_v9 = vsel %vm2040_vm15, %v2810_v42, -inf }
0x4d13   :  { %6120 = vlog2.f32 %v7517_v63 }
0x4d1c   :  { %v6119_v33 = vpop.eup %6118 }
0x4d1d   :  { %v2419_v62 = vsel %vm1340_vm5, %v6119_v33, 0.0  ;;  %v6121_v46 = vpop.eup %6120 }
0x4d1e   :  { %2420 = vadd.xlane.f32.xlu0 %v2419_v62  ;;  %v2024_v56 = vmul.f32 0.6931472, %v6121_v46 }
0x4d20   :  { %v2025_v51 = vadd.f32 %v2024_v56, %v7497_v5 }
0x4d22   :  { %v2034_v48 = vsub.f32 %v7519_v11, %v2025_v51 }
0x4d24   :  { %v2038_v35 = vmul.f32 %v4944_v40, %v2034_v48 }
0x4d26   :  { %v2075_v31 = vadd.f32 %v2073_v24, %v2038_v35 }
0x4d33   :  { %v7543_v13 = vpop.f32.mrb[128].mxu0 }
0x4d34   :  { %2426 = vperm.xlu0 %5910, %v1576_v4   ;;  %v5865_v12 = vpop.f32.mrb[129].mxu0 }
0x4d35   :  { %v4797_v47 = vpop.f32.mrb[130].mxu0 }
0x4d36   :  { %v5866_v2 = vpop.f32.mrb[131].mxu0 }
0x4d38   :  { %5913 = vset.pattern.permute.xlu0 %v6195_v7 }
0x4dab   :  { %v2421_v50 = vpop.xlane.xlu0 %2420 }
0x4dac   :  { %6122 = vlog2.f32 %v2421_v50 }
0x4db3   :  { %v2427_v30 = vpop.permute.xlu0 %2426 }
0x4db4   :  { %vm2428_vm0 = vcmp.eq.s32.totalorder %v6320_v26, %v2427_v30 }
0x4db5   :  { %v2429_v6 = vsel %vm2428_vm0, %v2412_v59, 0.0 }
0x4db6   :  { %v2430_v8 = vsel %vm1340_vm5, %v2429_v6, 0.0  ;;  %v6123_v57 = vpop.eup %6122 }
0x4db7   :  { %2431 = vadd.xlane.f32.xlu1 %v2430_v8  ;;  %v2423_v29 = vmul.f32 0.6931472, %v6123_v57 }
0x4db9   :  { %v2424_v53 = vadd.f32 %v2423_v29, %v2415_v15 }
0x4dbb   :  { %2440 = vmax.xlane.f32.xlu1 %v2439_v25  ;;  %v4960_v25 = vsel %vm2832_vm6, 1.0, %v6192_v28 }
0x4e44   :  { %v2432_v38 = vpop.xlane.xlu1 %2431 }
0x4e45   :  { %v2433_v49 = vsub.f32 %v2432_v38, %v2424_v53 }
0x4e47   :  { %v2437_v0 = vmul.f32 %v4952_v60, %v2433_v49 }
0x4e48   :  { %v2441_v39 = vpop.xlane.xlu1 %2440 }
0x4e49   :  { %v2442_v63 = vsub.f32 %v2412_v59, %v2441_v39  ;;  %v2438_v55 = vadd.f32 %v2437_v0, %v2075_v31 }
0x4e4b   :  { %v2443_v21 = vmul.f32 1.442695, %v2442_v63 }
0x4e4d   :  { %6124 = vpow2.f32 %v2443_v21 }
0x4e57   :  { %v6125_v19 = vpop.eup %6124 }
0x4e58   :  { %2446 = vrot.lane.b32.xlu1 %v6125_v19, %s6190_s5  ;;  %v3208_v19 = vsel %vm7478_vm12, -1e+30, %v7174_v10 }
0x4e5c   :  { %2456 = vperm.xlu1 %5911, %v1576_v4  }
0x4e60   :  { %2460 = vrot.lane.b32.xlu1 %v2412_v59, %s6190_s5 }
0x4e61   :  { %5912 = vset.pattern.permute.xlu1 %v6188_v1 }
0x4eca   :  { %v2447_v5 = vpop.permute.xlu1 %2446 }
0x4ecb   :  { %v2449_v11 = vsel %vm1340_vm5, %v2447_v5, 0.0  ;;  %v3209_v5 = vsel %vm1340_vm5, %v3208_v19, -inf }
0x4ecc   :  { %2450 = vadd.xlane.f32.xlu0 %v2449_v11 }
0x4edb   :  { %v2457_v20 = vpop.permute.xlu1 %2456 }
0x4edc   :  { %vm2458_vm3 = vcmp.eq.s32.totalorder %v6320_v26, %v2457_v20 }
0x4edf   :  { %v2461_v36 = vpop.permute.xlu1 %2460 }
0x4ee0   :  { %v2463_v17 = vsel %vm2458_vm3, %v2461_v36, 0.0 }
0x4ee1   :  { %v2464_v27 = vsel %vm1340_vm5, %v2463_v17, 0.0 }
0x4ee2   :  { %2465 = vadd.xlane.f32.xlu1 %v2464_v27 }
0x4ee6   :  { %2812 = vmax.xlane.f32.xlu1 %v2811_v52 }
0x4ef7   :  { %2824 = vperm.xlu1 %5912, %v1577_v43  }
0x4f59   :  { %v2451_v34 = vpop.xlane.xlu0 %2450 }
0x4f5a   :  { %6126 = vlog2.f32 %v2451_v34 }
0x4f64   :  { %v6127_v41 = vpop.eup %6126 }
0x4f65   :  { %v2453_v22 = vmul.f32 0.6931472, %v6127_v41 }
0x4f67   :  { %v2454_v18 = vadd.f32 %v2453_v22, %v2441_v39 }
0x4f6f   :  { %v2466_v44 = vpop.xlane.xlu1 %2465 }
0x4f70   :  { %v2467_v40 = vsub.f32 %v2466_v44, %v2454_v18  ;;  %v3235_v44 = vsel %vm2040_vm15, %v3208_v19, -inf }
0x4f72   :  { %v2468_v45 = vmul.f32 %v4952_v60, %v2467_v40 }
0x4f73   :  { %v2813_v37 = vpop.xlane.xlu1 %2812 }
0x4f74   :  { %2470 = vrot.lane.b32.xlu0 %v2468_v45, %s6196_s13  ;;  %v2814_v58 = vsub.f32 %v2810_v42, %v2813_v37 }
0x4f76   :  { %v2815_v24 = vmul.f32 1.442695, %v2814_v58 }
0x4f77   :  { %v2825_v14 = vpop.permute.xlu1 %2824 }
0x4f78   :  { %vm2826_vm4 = vcmp.eq.s32.totalorder %v6320_v26, %v2825_v14  ;;  %6128 = vpow2.f32 %v2815_v24  ;;  %v7598_v14 = vsel %vm7478_vm12, -1e+30, %v7253_v23 }
0x4f79   :  { %v2827_v61 = vsel %vm2826_vm4, %v2810_v42, 0.0 }
0x4f7a   :  { %v2828_v59 = vsel %vm1340_vm5, %v2827_v61, 0.0  ;;  %v3607_v61 = vsel %vm1340_vm5, %v7598_v14, -inf }
0x4f7b   :  { %2829 = vadd.xlane.f32.xlu1 %v2828_v59 }
0x4f82   :  { %v6129_v15 = vpop.eup %6128 }
0x4f83   :  { %v2817_v3 = vsel %vm1340_vm5, %v6129_v15, 0.0 }
0x4f93   :  { %2818 = vadd.xlane.f32.xlu0 %v2817_v3 }
0x4f97   :  { %2838 = vmax.xlane.f32.xlu0 %v2837_v9 }
0x4fe6   :  { %v2471_v33 = vpop.permute.xlu0 %2470 }
0x4fe7   :  { %v2473_v62 = vadd.f32 %v2471_v33, %v2438_v55 }
0x5008   :  { %v2830_v8 = vpop.xlane.xlu1 %2829 }
0x5020   :  { %v2819_v4 = vpop.xlane.xlu0 %2818 }
0x5021   :  { %6130 = vlog2.f32 %v2819_v4 }
0x5024   :  { %v2839_v12 = vpop.xlane.xlu0 %2838 }
0x5025   :  { %v2840_v47 = vsub.f32 %v2810_v42, %v2839_v12 }
0x5027   :  { %v2841_v2 = vmul.f32 1.442695, %v2840_v47 }
0x5029   :  { %6132 = vpow2.f32 %v2841_v2 }
0x502b   :  { %v6131_v50 = vpop.eup %6130 }
0x502c   :  { %v2821_v30 = vmul.f32 0.6931472, %v6131_v50 }
0x502e   :  { %v2822_v6 = vadd.f32 %v2821_v30, %v2813_v37 }
0x5030   :  { %v2831_v46 = vsub.f32 %v2830_v8, %v2822_v6 }
0x5032   :  { %v2835_v56 = vmul.f32 %v4960_v25, %v2831_v46 }
0x5033   :  { %v6133_v57 = vpop.eup %6132 }
0x5034   :  { %2844 = vrot.lane.b32.xlu0 %v6133_v57, %s6190_s5  ;;  %v2836_v51 = vadd.f32 %v2835_v56, %v2473_v62 }
0x5038   :  { %2854 = vperm.xlu0 %5913, %v1577_v43   ;;  %v1578_v43 = vld [vmem:[%s7756_s2 + $0x18] sm:$0xff] }
0x5039   :  { %vm3230_vm10 = vcmp.ne.s32.totalorder %v1578_v43, 0 }
0x503a   :  { %v4968_v15 = vsel %vm3230_vm10, 1.0, %v6192_v28 }
0x503c   :  { %5914 = vset.pattern.permute.xlu0 %v6188_v1 }
0x50a6   :  { %v2845_v29 = vpop.permute.xlu0 %2844 }
0x50a7   :  { %v2847_v48 = vsel %vm1340_vm5, %v2845_v29, 0.0 }
0x50a8   :  { %2848 = vadd.xlane.f32.xlu1 %v2847_v48 }
0x50b7   :  { %v2855_v53 = vpop.permute.xlu0 %2854 }
0x50b8   :  { %vm2856_vm7 = vcmp.eq.s32.totalorder %v6320_v26, %v2855_v53 }
0x50b9   :  { %2858 = vrot.lane.b32.xlu1 %v2810_v42, %s6190_s5 }
0x5135   :  { %v2849_v60 = vpop.xlane.xlu1 %2848 }
0x5136   :  { %6134 = vlog2.f32 %v2849_v60 }
0x5139   :  { %v2859_v38 = vpop.permute.xlu1 %2858 }
0x513a   :  { %v2861_v35 = vsel %vm2856_vm7, %v2859_v38, 0.0  ;;  %v1579_v38 = vld [vmem:[%s7756_s2 + $0x20] sm:$0xff]  ;;  %vm4862_vm7 = vcmask 7168  }
0x513b   :  { %v2862_v49 = vsel %vm1340_vm5, %v2861_v35, 0.0  ;;  %v3633_v35 = vsel %vm2040_vm15, %v7598_v14, -inf  ;;  %vm3628_vm13 = vcmp.ne.s32.totalorder %v1579_v38, 0 }
0x513c   :  { %2863 = vadd.xlane.f32.xlu0 %v2862_v49  ;;  %v7617_v49 = vsel %vm7478_vm12, -1e+30, %v7372_v32 }
0x5140   :  { %v6135_v31 = vpop.eup %6134 }
0x5141   :  { %v2851_v0 = vmul.f32 0.6931472, %v6135_v31  ;;  %v4031_v31 = vsel %vm2040_vm15, %v7617_v49, -inf }
0x5143   :  { %v2852_v39 = vadd.f32 %v2851_v0, %v2839_v12  ;;  %v7624_v0 = vsel %vm7478_vm12, -1e+30, %v7451_v54 }
0x51c9   :  { %v2864_v63 = vpop.xlane.xlu0 %2863 }
0x51ca   :  { %v2865_v55 = vsub.f32 %v2864_v63, %v2852_v39  ;;  %v4429_v39 = vsel %vm2040_vm15, %v7624_v0, -inf }
0x51cc   :  { %v2866_v21 = vmul.f32 %v4960_v25, %v2865_v55 }
0x51ce   :  { %2868 = vrot.lane.b32.xlu1 %v2866_v21, %s6196_s13 }
0x51f2   :  { %3210 = vmax.xlane.f32.xlu1 %v3209_v5 }
0x5240   :  { %v2869_v11 = vpop.permute.xlu1 %2868 }
0x5241   :  { %v2871_v20 = vadd.f32 %v2869_v11, %v2836_v51 }
0x527f   :  { %v3211_v36 = vpop.xlane.xlu1 %3210 }
0x5280   :  { %v3212_v17 = vsub.f32 %v3208_v19, %v3211_v36 }
0x5282   :  { %v3213_v27 = vmul.f32 1.442695, %v3212_v17 }
0x5284   :  { %6136 = vpow2.f32 %v3213_v27 }
0x528e   :  { %v6137_v42 = vpop.eup %6136 }
0x528f   :  { %v3215_v52 = vsel %vm1340_vm5, %v6137_v42, 0.0 }
0x5290   :  { %3216 = vadd.xlane.f32.xlu0 %v3215_v52  ;;  %v4976_v52 = vsel %vm3628_vm13, 1.0, %v6192_v28 }
0x52a6   :  { %3222 = vperm.xlu0 %5914, %v1578_v43  }
0x52aa   :  { %5915 = vset.pattern.permute.xlu0 %v6195_v7 }
0x52ab   :  { %3252 = vperm.xlu0 %5915, %v1578_v43  }
0x52af   :  { %3256 = vrot.lane.b32.xlu0 %v3208_v19, %s6190_s5 }
0x52b0   :  { %5919 = vset.pattern.permute.xlu0 %v6188_v1 }
0x531d   :  { %v3217_v10 = vpop.xlane.xlu0 %3216 }
0x531e   :  { %6138 = vlog2.f32 %v3217_v10 }
0x5325   :  { %v3223_v34 = vpop.permute.xlu0 %3222 }
0x5326   :  { %vm3224_vm8 = vcmp.eq.s32.totalorder %v6320_v26, %v3223_v34 }
0x5327   :  { %v3225_v41 = vsel %vm3224_vm8, %v3208_v19, 0.0 }
0x5328   :  { %v3226_v22 = vsel %vm1340_vm5, %v3225_v41, 0.0  ;;  %v6139_v59 = vpop.eup %6138 }
0x5329   :  { %3227 = vadd.xlane.f32.xlu1 %v3226_v22  ;;  %v3219_v58 = vmul.f32 0.6931472, %v6139_v59 }
0x532a   :  { %v3253_v18 = vpop.permute.xlu0 %3252 }
0x532b   :  { %vm3254_vm9 = vcmp.eq.s32.totalorder %v6320_v26, %v3253_v18  ;;  %v3220_v24 = vadd.f32 %v3219_v58, %v3211_v36 }
0x532d   :  { %3236 = vmax.xlane.f32.xlu1 %v3235_v44 }
0x532e   :  { %v3257_v40 = vpop.permute.xlu0 %3256 }
0x532f   :  { %v3259_v45 = vsel %vm3254_vm9, %v3257_v40, 0.0 }
0x5330   :  { %v3260_v37 = vsel %vm1340_vm5, %v3259_v45, 0.0 }
0x5331   :  { %3261 = vadd.xlane.f32.xlu0 %v3260_v37 }
0x5335   :  { %3608 = vmax.xlane.f32.xlu0 %v3607_v61 }
0x53b6   :  { %v3228_v3 = vpop.xlane.xlu1 %3227 }
0x53b7   :  { %v3229_v9 = vsub.f32 %v3228_v3, %v3220_v24 }
0x53b9   :  { %v3233_v33 = vmul.f32 %v4968_v15, %v3229_v9 }
0x53ba   :  { %v3237_v62 = vpop.xlane.xlu1 %3236 }
0x53bb   :  { %v3238_v4 = vsub.f32 %v3208_v19, %v3237_v62  ;;  %v3234_v12 = vadd.f32 %v3233_v33, %v2871_v20 }
0x53bd   :  { %v3239_v23 = vmul.f32 1.442695, %v3238_v4 }
0x53be   :  { %v3262_v47 = vpop.xlane.xlu0 %3261 }
0x53bf   :  { %6140 = vpow2.f32 %v3239_v23 }
0x53c2   :  { %v3609_v2 = vpop.xlane.xlu0 %3608 }
0x53c3   :  { %v3610_v50 = vsub.f32 %v7598_v14, %v3609_v2 }
0x53c5   :  { %v3611_v30 = vmul.f32 1.442695, %v3610_v50 }
0x53c7   :  { %6142 = vpow2.f32 %v3611_v30 }
0x53c9   :  { %v6141_v6 = vpop.eup %6140 }
0x53ca   :  { %3242 = vrot.lane.b32.xlu1 %v6141_v6, %s6190_s5 }
0x53d1   :  { %v6143_v8 = vpop.eup %6142 }
0x53d2   :  { %v3613_v25 = vsel %vm1340_vm5, %v6143_v8, 0.0 }
0x53d3   :  { %3614 = vadd.xlane.f32.xlu0 %v3613_v25 }
0x543c   :  { %v3243_v46 = vpop.permute.xlu1 %3242 }
0x543d   :  { %v3245_v56 = vsel %vm1340_vm5, %v3243_v46, 0.0 }
0x543e   :  { %3246 = vadd.xlane.f32.xlu1 %v3245_v56 }
0x5460   :  { %v3615_v36 = vpop.xlane.xlu0 %3614 }
0x54cb   :  { %v3247_v57 = vpop.xlane.xlu1 %3246 }
0x54cc   :  { %6144 = vlog2.f32 %v3247_v57 }
0x54d6   :  { %v6145_v51 = vpop.eup %6144 }
0x54d7   :  { %v3249_v29 = vmul.f32 0.6931472, %v6145_v51 }
0x54d9   :  { %v3250_v48 = vadd.f32 %v3249_v29, %v3237_v62  ;;  %v4005_v62 = vsel %vm1340_vm5, %v7617_v49, -inf }
0x54db   :  { %v3263_v53 = vsub.f32 %v3262_v47, %v3250_v48  ;;  %v4403_v47 = vsel %vm1340_vm5, %v7624_v0, -inf  ;;  %v1580_v48 = vld [vmem:[%s7756_s2 + $0x28] sm:$0xff] }
0x54dc   :  { %vm4026_vm0 = vcmp.ne.s32.totalorder %v1580_v48, 0 }
0x54dd   :  { %v3264_v60 = vmul.f32 %v4968_v15, %v3263_v53 }
0x54df   :  { %3266 = vrot.lane.b32.xlu1 %v3264_v60, %s6196_s13  ;;  %v7674_v60 = vld [vmem:[%s7756_s2 + $0x30] sm:$0xff] }
0x54e3   :  { %3620 = vperm.xlu1 %5912, %v1579_v38  }
0x54e7   :  { %5916 = vset.pattern.permute.xlu1 %v6195_v7 }
0x5507   :  { %3634 = vmax.xlane.f32.xlu1 %v3633_v35  ;;  %v7687_v35 = vsel %vm7478_vm12, -1e+30, %v7543_v13 }
0x550b   :  { %4032 = vmax.xlane.f32.xlu1 %v4031_v31  ;;  %v4827_v31 = vsel %vm2040_vm15, %v7687_v35, -inf }
0x550f   :  { %4430 = vmax.xlane.f32.xlu1 %v4429_v39 }
0x5520   :  { %3650 = vperm.xlu1 %5916, %v1579_v38   ;;  %v7680_v38 = vld [vmem:[%s7756_s2 + $0x38] sm:$0xff] }
0x5521   :  { %vm4822_vm6 = vcmp.ne.s32.totalorder %v7680_v38, 0 }
0x5524   :  { %5917 = vset.pattern.permute.xlu1 %v6188_v1 }
0x5551   :  { %v3267_v63 = vpop.permute.xlu1 %3266 }
0x5552   :  { %v3269_v32 = vadd.f32 %v3267_v63, %v3234_v12 }
0x5562   :  { %v3621_v55 = vpop.permute.xlu1 %3620 }
0x5563   :  { %vm3622_vm11 = vcmp.eq.s32.totalorder %v6320_v26, %v3621_v55 }
0x5564   :  { %v3623_v21 = vsel %vm3622_vm11, %v7598_v14, 0.0 }
0x5565   :  { %v3624_v19 = vsel %vm1340_vm5, %v3623_v21, 0.0 }
0x5566   :  { %3625 = vadd.xlane.f32.xlu0 %v3624_v19 }
0x5594   :  { %v3635_v54 = vpop.xlane.xlu1 %3634 }
0x5595   :  { %v3636_v5 = vsub.f32 %v7598_v14, %v3635_v54 }
0x5597   :  { %v3637_v11 = vmul.f32 1.442695, %v3636_v5  ;;  %v4801_v5 = vsel %vm1340_vm5, %v7687_v35, -inf }
0x5598   :  { %v7638_v44 = vpop.xlane.xlu1 %4032 }
0x5599   :  { %6146 = vpow2.f32 %v3637_v11  ;;  %v4034_v4 = vsub.f32 %v7617_v49, %v7638_v44 }
0x559a   :  { %6148 = vlog2.f32 %v3615_v36 }
0x559b   :  { %v4035_v12 = vmul.f32 1.442695, %v4034_v4 }
0x559c   :  { %v7640_v40 = vpop.xlane.xlu1 %4430 }
0x559d   :  { %v4432_v51 = vsub.f32 %v7624_v0, %v7640_v40 }
0x559f   :  { %v4433_v29 = vmul.f32 1.442695, %v4432_v51 }
0x55a0   :  { %v3651_v45 = vpop.permute.xlu1 %3650 }
0x55a1   :  { %vm3652_vm14 = vcmp.eq.s32.totalorder %v6320_v26, %v3651_v45  ;;  %v4984_v45 = vsel %vm4026_vm0, 1.0, %v6192_v28 }
0x55a3   :  { %v6147_v20 = vpop.eup %6146 }
0x55a4   :  { %3640 = vrot.lane.b32.xlu0 %v6147_v20, %s6190_s5  ;;  %v6149_v17 = vpop.eup %6148 }
0x55a5   :  { %v3617_v27 = vmul.f32 0.6931472, %v6149_v17 }
0x55a7   :  { %v3618_v42 = vadd.f32 %v3617_v27, %v3609_v2 }
0x55f3   :  { %v3626_v43 = vpop.xlane.xlu0 %3625 }
0x55f4   :  { %v3627_v10 = vsub.f32 %v3626_v43, %v3618_v42 }
0x55f6   :  { %v3631_v34 = vmul.f32 %v4976_v52, %v3627_v10 }
0x55f8   :  { %v3632_v41 = vadd.f32 %v3631_v34, %v3269_v32 }
0x5616   :  { %v3641_v22 = vpop.permute.xlu0 %3640 }
0x5617   :  { %v3643_v18 = vsel %vm1340_vm5, %v3641_v22, 0.0 }
0x5618   :  { %3644 = vadd.xlane.f32.xlu0 %v3643_v18 }
0x562e   :  { %3654 = vrot.lane.b32.xlu0 %v7598_v14, %s6190_s5 }
0x56a5   :  { %v3645_v37 = vpop.xlane.xlu0 %3644 }
0x56a6   :  { %6150 = vlog2.f32 %v3645_v37 }
0x56a7   :  { %6152 = vpow2.f32 %v4035_v12 }
0x56a9   :  { %v3655_v61 = vpop.permute.xlu0 %3654 }
0x56aa   :  { %v3657_v59 = vsel %vm3652_vm14, %v3655_v61, 0.0 }
0x56ab   :  { %v3658_v58 = vsel %vm1340_vm5, %v3657_v59, 0.0 }
0x56ac   :  { %3659 = vadd.xlane.f32.xlu1 %v3658_v58 }
0x56b0   :  { %v6151_v24 = vpop.eup %6150 }
0x56b1   :  { %v3647_v15 = vmul.f32 0.6931472, %v6151_v24  ;;  %v6153_v23 = vpop.eup %6152 }
0x56b3   :  { %v3648_v3 = vadd.f32 %v3647_v15, %v3635_v54 }
0x5739   :  { %v3660_v9 = vpop.xlane.xlu1 %3659 }
0x573a   :  { %v3661_v33 = vsub.f32 %v3660_v9, %v3648_v3 }
0x573c   :  { %v3662_v14 = vmul.f32 %v4976_v52, %v3661_v33 }
0x573e   :  { %3664 = vrot.lane.b32.xlu0 %v3662_v14, %s6196_s13 }
0x575d   :  { %4006 = vmax.xlane.f32.xlu0 %v4005_v62 }
0x5773   :  { %4038 = vrot.lane.b32.xlu0 %v6153_v23, %s6190_s5 }
0x5777   :  { %4052 = vrot.lane.b32.xlu0 %v7617_v49, %s6190_s5 }
0x577b   :  { %4450 = vrot.lane.b32.xlu0 %v7624_v0, %s6190_s5 }
0x579a   :  { %4404 = vmax.xlane.f32.xlu0 %v4403_v47 }
0x57b0   :  { %v3665_v2 = vpop.permute.xlu0 %3664 }
0x57b1   :  { %v7656_v50 = vadd.f32 %v3665_v2, %v3632_v41 }
0x57ea   :  { %v7658_v30 = vpop.xlane.xlu0 %4006 }
0x57eb   :  { %v4008_v6 = vsub.f32 %v7617_v49, %v7658_v30 }
0x57ed   :  { %v4009_v8 = vmul.f32 1.442695, %v4008_v6 }
0x57ee   :  { %v4039_v25 = vpop.permute.xlu0 %4038 }
0x57ef   :  { %6154 = vpow2.f32 %v4009_v8  ;;  %v4041_v46 = vsel %vm1340_vm5, %v4039_v25, 0.0 }
0x57f0   :  { %4042 = vadd.xlane.f32.xlu0 %v4041_v46  ;;  %6156 = vpow2.f32 %v4433_v29 }
0x57f2   :  { %v4053_v21 = vpop.permute.xlu0 %4052 }
0x57f9   :  { %v6155_v56 = vpop.eup %6154 }
0x57fa   :  { %v4011_v57 = vsel %vm1340_vm5, %v6155_v56, 0.0  ;;  %v6157_v53 = vpop.eup %6156 }
0x57fb   :  { %4012 = vadd.xlane.f32.xlu1 %v4011_v57 }
0x580c   :  { %4018 = vperm.xlu1 %5917, %v1580_v48  }
0x5810   :  { %4436 = vrot.lane.b32.xlu1 %v6157_v53, %s6190_s5 }
0x5811   :  { %5918 = vset.pattern.permute.xlu1 %v6195_v7 }
0x5814   :  { %4048 = vperm.xlu1 %5918, %v1580_v48  }
0x5818   :  { %4446 = vperm.xlu1 %5918, %v7674_v60  }
0x581c   :  { %4844 = vperm.xlu1 %5918, %v7680_v38  }
0x5820   :  { %5920 = vset.pattern.permute.xlu1 %v6188_v1 }
0x5840   :  { %4828 = vmax.xlane.f32.xlu1 %v4827_v31 }
0x5851   :  { %4848 = vrot.lane.b32.xlu1 %v7687_v35, %s6190_s5 }
0x5888   :  { %v4013_v39 = vpop.xlane.xlu1 %4012 }
0x588c   :  { %v4019_v63 = vpop.permute.xlu1 %4018 }
0x588d   :  { %vm4020_vm1 = vcmp.eq.s32.totalorder %v6320_v26, %v4019_v63 }
0x588e   :  { %v4021_v32 = vsel %vm4020_vm1, %v7617_v49, 0.0 }
0x588f   :  { %v4022_v1 = vsel %vm1340_vm5, %v4021_v32, 0.0 }
0x5890   :  { %v4437_v55 = vpop.permute.xlu1 %4436  ;;  %4023 = vadd.xlane.f32.xlu0 %v4022_v1 }
0x5891   :  { %v4439_v16 = vsel %vm1340_vm5, %v4437_v55, 0.0 }
0x5894   :  { %v4049_v13 = vpop.permute.xlu1 %4048  ;;  %4440 = vadd.xlane.f32.xlu0 %v4439_v16 }
0x5895   :  { %vm4050_vm12 = vcmp.eq.s32.totalorder %v6320_v26, %v4049_v13 }
0x5896   :  { %v4055_v19 = vsel %vm4050_vm12, %v4053_v21, 0.0 }
0x5897   :  { %v4056_v54 = vsel %vm1340_vm5, %v4055_v19, 0.0 }
0x5898   :  { %4057 = vadd.xlane.f32.xlu1 %v4056_v54  ;;  %v4447_v49 = vpop.permute.xlu1 %4446 }
0x5899   :  { %vm4448_vm2 = vcmp.eq.s32.totalorder %v6320_v26, %v4447_v49 }
0x589c   :  { %4802 = vmax.xlane.f32.xlu1 %v4801_v5  ;;  %v4845_v11 = vpop.permute.xlu1 %4844 }
0x589d   :  { %vm4846_vm15 = vcmp.eq.s32.totalorder %v6320_v26, %v4845_v11 }
0x58aa   :  { %4416 = vperm.xlu0 %5919, %v7674_v60  }
0x58ae   :  { %5921 = vset.pattern.permute.xlu0 %v6195_v7  ;;  %v4451_v7 = vpop.permute.xlu0 %4450 }
0x58af   :  { %v4453_v12 = vsel %vm4448_vm2, %v4451_v7, 0.0 }
0x58b0   :  { %v4454_v47 = vsel %vm1340_vm5, %v4453_v12, 0.0 }
0x58b2   :  { %v7710_v34 = vpop.xlane.xlu0 %4404 }
0x58b3   :  { %v4406_v33 = vsub.f32 %v7624_v0, %v7710_v34 }
0x58b5   :  { %v4407_v14 = vmul.f32 1.442695, %v4406_v33 }
0x58b6   :  { %v4043_v22 = vpop.xlane.xlu0 %4042 }
0x58cd   :  { %v7703_v20 = vpop.xlane.xlu1 %4828 }
0x58ce   :  { %v4830_v36 = vsub.f32 %v7687_v35, %v7703_v20 }
0x58d0   :  { %v4831_v17 = vmul.f32 1.442695, %v4830_v36 }
0x58d1   :  { %v4849_v27 = vpop.permute.xlu1 %4848 }
0x58d2   :  { %6158 = vpow2.f32 %v4831_v17  ;;  %v4851_v42 = vsel %vm4846_vm15, %v4849_v27, 0.0 }
0x58d3   :  { %v4852_v52 = vsel %vm1340_vm5, %v4851_v42, 0.0  ;;  %6160 = vlog2.f32 %v4013_v39 }
0x58d4   :  { %4853 = vadd.xlane.f32.xlu0 %v4852_v52  ;;  %6162 = vpow2.f32 %v4407_v14 }
0x58dc   :  { %v6159_v43 = vpop.eup %6158 }
0x58dd   :  { %4834 = vrot.lane.b32.xlu1 %v6159_v43, %s6190_s5  ;;  %v6161_v10 = vpop.eup %6160 }
0x58de   :  { %v4015_v41 = vmul.f32 0.6931472, %v6161_v10  ;;  %v6163_v2 = vpop.eup %6162 }
0x58e0   :  { %v4016_v18 = vadd.f32 %v4015_v41, %v7658_v30  ;;  %v4409_v30 = vsel %vm1340_vm5, %v6163_v2, 0.0 }
0x591d   :  { %v4024_v37 = vpop.xlane.xlu0 %4023 }
0x591e   :  { %v4025_v61 = vsub.f32 %v4024_v37, %v4016_v18 }
0x5920   :  { %v4029_v59 = vmul.f32 %v4984_v45, %v4025_v61 }
0x5921   :  { %v4441_v23 = vpop.xlane.xlu0 %4440 }
0x5922   :  { %v7715_v58 = vadd.f32 %v4029_v59, %v7656_v50 }
0x5925   :  { %v4058_v24 = vpop.xlane.xlu1 %4057 }
0x5929   :  { %v7717_v15 = vpop.xlane.xlu1 %4802  ;;  %v4417_v50 = vpop.permute.xlu0 %4416 }
0x592a   :  { %v4804_v62 = vsub.f32 %v7687_v35, %v7717_v15  ;;  %vm4418_vm3 = vcmp.eq.s32.totalorder %v6320_v26, %v4417_v50 }
0x592b   :  { %v4419_v25 = vsel %vm4418_vm3, %v7624_v0, 0.0 }
0x592c   :  { %v4805_v4 = vmul.f32 1.442695, %v4804_v62  ;;  %v4420_v46 = vsel %vm1340_vm5, %v4419_v25, 0.0 }
0x592e   :  { %6164 = vpow2.f32 %v4805_v4 }
0x592f   :  { %6166 = vlog2.f32 %v4043_v22 }
0x5938   :  { %v6165_v6 = vpop.eup %6164 }
0x5939   :  { %v4807_v8 = vsel %vm1340_vm5, %v6165_v6, 0.0  ;;  %v6167_v48 = vpop.eup %6166 }
0x593a   :  { %v4045_v31 = vmul.f32 0.6931472, %v6167_v48 }
0x593c   :  { %v4046_v0 = vadd.f32 %v4045_v31, %v7638_v44 }
0x593e   :  { %v4059_v63 = vsub.f32 %v4058_v24, %v4046_v0 }
0x5940   :  { %v4060_v55 = vmul.f32 %v4984_v45, %v4059_v63 }
0x594f   :  { %v4835_v3 = vpop.permute.xlu1 %4834 }
0x5950   :  { %v4837_v9 = vsel %vm1340_vm5, %v4835_v3, 0.0 }
0x5951   :  { %4838 = vadd.xlane.f32.xlu1 %v4837_v9 }
0x5961   :  { %v4854_v1 = vpop.xlane.xlu0 %4853 }
0x5962   :  { %4814 = vperm.xlu1 %5920, %v7680_v38  }
0x5986   :  { %4455 = vadd.xlane.f32.xlu1 %v4454_v47 }
0x598a   :  { %4410 = vadd.xlane.f32.xlu1 %v4409_v30 }
0x598e   :  { %4808 = vadd.xlane.f32.xlu1 %v4807_v8 }
0x5992   :  { %4421 = vadd.xlane.f32.xlu1 %v4420_v46 }
0x59de   :  { %v4839_v56 = vpop.xlane.xlu1 %4838 }
0x59df   :  { %6168 = vlog2.f32 %v4839_v56 }
0x59e0   :  { %6170 = vlog2.f32 %v4441_v23 }
0x59e2   :  { %v4815_v57 = vpop.permute.xlu1 %4814 }
0x59e3   :  { %vm4816_vm4 = vcmp.eq.s32.totalorder %v6320_v26, %v4815_v57  ;;  %v5000_v26 = vsel %vm4822_vm6, 1.0, %v6192_v28 }
0x59e4   :  { %v4817_v51 = vsel %vm4816_vm4, %v7687_v35, 0.0 }
0x59e5   :  { %v4818_v29 = vsel %vm1340_vm5, %v4817_v51, 0.0  ;;  %vm4424_vm5 = vcmp.ne.s32.totalorder %v7674_v60, 0 }
0x59e6   :  { %4819 = vadd.xlane.f32.xlu1 %v4818_v29  ;;  %v4992_v19 = vsel %vm4424_vm5, 1.0, %v6192_v28 }
0x59e9   :  { %v6169_v53 = vpop.eup %6168 }
0x59ea   :  { %v4841_v39 = vmul.f32 0.6931472, %v6169_v53  ;;  %v6171_v13 = vpop.eup %6170 }
0x59eb   :  { %v4443_v21 = vmul.f32 0.6931472, %v6171_v13 }
0x59ec   :  { %v4842_v32 = vadd.f32 %v4841_v39, %v7703_v20 }
0x59ed   :  { %v4444_v44 = vadd.f32 %v4443_v21, %v7640_v40 }
0x59ee   :  { %v4855_v16 = vsub.f32 %v4854_v1, %v4842_v32 }
0x59f0   :  { %v4856_v35 = vmul.f32 %v5000_v26, %v4855_v16 }
0x59f7   :  { %4062 = vrot.lane.b32.xlu1 %v4060_v55, %s6196_s13 }
0x59fb   :  { %4858 = vrot.lane.b32.xlu1 %v4856_v35, %s6196_s13 }
0x5a13   :  { %v4456_v38 = vpop.xlane.xlu1 %4455 }
0x5a14   :  { %v4457_v54 = vsub.f32 %v4456_v38, %v4444_v44 }
0x5a16   :  { %v4458_v5 = vmul.f32 %v4992_v19, %v4457_v54 }
0x5a17   :  { %v4411_v49 = vpop.xlane.xlu1 %4410 }
0x5a18   :  { %4460 = vrot.lane.b32.xlu0 %v4458_v5, %s6196_s13  ;;  %6172 = vlog2.f32 %v4411_v49 }
0x5a1b   :  { %v4809_v20 = vpop.xlane.xlu1 %4808 }
0x5a1c   :  { %6174 = vlog2.f32 %v4809_v20 }
0x5a1f   :  { %v4422_v17 = vpop.xlane.xlu1 %4421 }
0x5a22   :  { %v6173_v11 = vpop.eup %6172 }
0x5a23   :  { %v4413_v36 = vmul.f32 0.6931472, %v6173_v11 }
0x5a25   :  { %v4414_v27 = vadd.f32 %v4413_v36, %v7710_v34 }
0x5a26   :  { %v6175_v7 = vpop.eup %6174 }
0x5a27   :  { %v4423_v60 = vsub.f32 %v4422_v17, %v4414_v27  ;;  %v4811_v10 = vmul.f32 0.6931472, %v6175_v7 }
0x5a29   :  { %v4427_v40 = vmul.f32 %v4992_v19, %v4423_v60  ;;  %v4812_v41 = vadd.f32 %v4811_v10, %v7717_v15 }
0x5a73   :  { %v4820_v42 = vpop.xlane.xlu1 %4819 }
0x5a74   :  { %v4821_v22 = vsub.f32 %v4820_v42, %v4812_v41 }
0x5a76   :  { %v4825_v45 = vmul.f32 %v5000_v26, %v4821_v22 }
0x5a77   :  { %v4063_v52 = vpop.permute.xlu1 %4062 }
0x5a78   :  { %v4065_v28 = vadd.f32 %v4063_v52, %v7715_v58 }
0x5a7a   :  { %v4428_v43 = vadd.f32 %v4427_v40, %v4065_v28 }
0x5a7b   :  { %v4859_v59 = vpop.permute.xlu1 %4858 }
0x5a8a   :  { %v4461_v18 = vpop.permute.xlu0 %4460 }
0x5a8b   :  { %v4463_v37 = vadd.f32 %v4461_v18, %v4428_v43 }
0x5a8d   :  { %v4826_v61 = vadd.f32 %v4825_v45, %v4463_v37 }
0x5a8f   :  { %v4861_v34 = vadd.f32 %v4859_v59, %v4826_v61 }
0x5a91   :  { %4863 = vst.msk [vmem:[%s7757_s6] sm:$0xff] %vm4862_vm7, %v4861_v34 }

</bundles_post_ra>
